<compile_context>
chip_gen: v7x
topology: tpu7x:2x2x1
jax: 0.10.0
libtpu: 0.0.40
codegen_flags: <defaults>
</compile_context>

<pallas_src>
import functools

import numpy as np
import jax
import jax.numpy as jnp
from jax import lax
from jax.experimental import pallas as pl
from jax.experimental.pallas import tpu as pltpu

VMEM = pltpu.MemorySpace.VMEM


# ---------------------------------------------------------------------------
# Kernel 1: landmark-INDEPENDENT attention branch, tiled over nodes.
#   o[n] = alpha_o . LeakyReLU(W @ h_n), emitted lane-major as (1, N).
# ---------------------------------------------------------------------------
def _orig_kernel(h_ref, w_ref, alpha_o_ref, o_ref):
    # (D, tile) = W @ h_tile^T  (contract on the input-feature dim of both;
    # torch nn.Linear stores weight (out, in) so this is exactly x @ W^T, T'd)
    p = lax.dot_general(w_ref[...], h_ref[...], (((1,), (1,)), ((), ())),
                        preferred_element_type=jnp.float32)
    lrelu = jnp.where(p > 0, p, 0.2 * p)
    # (1, tile): lane-dense output, no sublane->lane relayout
    o_ref[...] = lax.dot_general(alpha_o_ref[...], lrelu, (((1,), (0,)), ((), ())),
                                 preferred_element_type=jnp.float32)


def orig_attention_scores(h, att_w, alpha_o_row, tile_n=1024):
    n, d = h.shape
    if n <= tile_n:
        return pl.pallas_call(
            _orig_kernel,
            out_shape=jax.ShapeDtypeStruct((1, n), jnp.float32),
            in_specs=[pl.BlockSpec(memory_space=VMEM)] * 3,
            out_specs=pl.BlockSpec(memory_space=VMEM),
        )(h, att_w, alpha_o_row)
    # large-N path: pipelined row tiles, "parallel" so v7x can split them
    n_pad = ((n + tile_n - 1) // tile_n) * tile_n
    h_p = jnp.pad(h, ((0, n_pad - n), (0, 0)))
    o = pl.pallas_call(
        _orig_kernel,
        out_shape=jax.ShapeDtypeStruct((1, n_pad), jnp.float32),
        grid=(n_pad // tile_n,),
        in_specs=[pl.BlockSpec((tile_n, d), lambda i: (i, 0)),
                  pl.BlockSpec((d, d), lambda i: (0, 0)),
                  pl.BlockSpec((1, d), lambda i: (0, 0))],
        out_specs=pl.BlockSpec((1, tile_n), lambda i: (0, i)),
        compiler_params=pltpu.CompilerParams(
            dimension_semantics=("parallel",),
            vmem_limit_bytes=48 * 1024 * 1024),
    )(h_p, att_w, alpha_o_row)
    return o[:, :n]


# ---------------------------------------------------------------------------
# Kernel 2: ALL landmark graphs in one ungridded call (no grid=(L,) overhead).
#   GCN over every landmark graph (batched via a block-diagonal propagation
#   matrix) -> attention-W projection -> LeakyReLU -> c = alpha_c . (.)
#   Output lane-major (1, L*K).
# ---------------------------------------------------------------------------
def _landmark_kernel(a_stack_ref, a_bd_ref, attw_ref, alpha_c_ref, *rest,
                     num_layers):
    w_refs = rest[:num_layers]
    c_ref = rest[num_layers]

    # TODO(synk): the original GCN class is not provided; a standard Kipf-style
    # GCN (sym-normalized A + self loops, ReLU between layers) is assumed.
    # H0 = I per landmark  =>  A_norm @ H0 stacked over landmarks = a_stack.
    feat = a_stack_ref[...]                       # (L*K, K)
    a_bd = a_bd_ref[...]                          # (L*K, L*K) block-diagonal
    for li in range(num_layers):
        feat = jnp.dot(feat, w_refs[li][...], preferred_element_type=jnp.float32)
        if li < num_layers - 1:
            feat = jnp.maximum(feat, 0.0)
            feat = jnp.dot(a_bd, feat, preferred_element_type=jnp.float32)

    coar_t = lax.dot_general(attw_ref[...], feat, (((1,), (1,)), ((), ())),
                             preferred_element_type=jnp.float32)      # (D, L*K)
    coar_t = jnp.where(coar_t > 0, coar_t, 0.2 * coar_t)
    c_ref[...] = lax.dot_general(alpha_c_ref[...], coar_t, (((1,), (0,)), ((), ())),
                                 preferred_element_type=jnp.float32)  # (1, L*K)


def landmark_coar_scores(a_stack, a_bd, att_w, alpha_c_row, gcn_ws):
    lk = a_bd.shape[0]
    num_layers = len(gcn_ws)
    return pl.pallas_call(
        functools.partial(_landmark_kernel, num_layers=num_layers),
        out_shape=jax.ShapeDtypeStruct((1, lk), jnp.float32),
        in_specs=[pl.BlockSpec(memory_space=VMEM)] * (4 + num_layers),
        out_specs=pl.BlockSpec(memory_space=VMEM),
    )(a_stack, a_bd, att_w, alpha_c_row, *gcn_ws)


# ---------------------------------------------------------------------------
# Kernel 3: fused pooling, grid=(G,), all L landmarks per grid step.
#   sigmoid + row-softmax of the raw assignment scores
#   pool_adj   = assign^T adj assign                 (zero diag), packed (K, L*K)
#   rev        = assign_nor pool_adj assign_nor^T    (zero diag)
#   Lap(rev), Lap(adj) emitted directly (pad self-loops folded in)
#   pooled features = assign^T feat for all L, packed lane-dense (K, L*D)
# ---------------------------------------------------------------------------
def _pool_kernel(raw_ref, adj_ref, feat_ref, mask_ref, eye_ref,
                 lrev_ref, ladj_ref, pa_ref, pf_ref,
                 *, num_landmarks, k_size, feat_dim):
    raw = raw_ref[0]                      # (n_max, L*K) raw attention scores
    adj = adj_ref[0]                      # (n_max, n_max) zero-padded adjacency
    feat = feat_ref[0]                    # (n_max, D)     zero-padded features
    mask = mask_ref[0]                    # (n_max, 1)     1.0 for real rows
    eye = eye_ref[...]                    # (n_max, n_max) resident identity

    offdiag_n = 1.0 - eye                 # reused L+? times per step
    offdiag_k = offdiag_n[:k_size, :k_size]
    pad_eye = eye * (1.0 - mask)          # self-loop on padded rows only

    # ---- Laplacian of the graph adjacency (landmark independent, once) -----
    # NOTE: like the torch reference, no zero-degree guard for real nodes.
    adj_eff = adj + pad_eye
    dinv_c = lax.rsqrt(jnp.sum(adj_eff, axis=1, keepdims=True))      # (n_max,1)
    dinv_r = lax.rsqrt(jnp.sum(adj_eff, axis=0, keepdims=True))      # (1,n_max)
    lap_a = eye - dinv_c * adj_eff * dinv_r
    ladj_ref[0] = 0.5 * (lap_a + lap_a.T)

    pa_list = []
    pf_list = []
    for l in range(num_landmarks):
        # sigmoid + softmax(dim=1) fused; padded rows masked afterwards
        s = jax.nn.sigmoid(raw[:, l * k_size:(l + 1) * k_size])       # (n_max,K)
        m = jnp.max(s, axis=1, keepdims=True)
        ex = jnp.exp(s - m)
        assign = ex / jnp.sum(ex, axis=1, keepdims=True)               # exact
        assign = assign * mask

        # pool_adj = assign^T adj assign, zero diagonal
        tmp = lax.dot_general(assign, adj, (((0,), (0,)), ((), ())),
                              preferred_element_type=jnp.float32)      # (K,n_max)
        pa = jnp.dot(tmp, assign, preferred_element_type=jnp.float32)  # (K,K)
        pa = pa * offdiag_k

        # reverse_adj = assign_nor pool_adj assign_nor^T, zero diagonal
        col_sum = jnp.sum(assign, axis=0, keepdims=True)               # (1,K)
        anor = assign / col_sum                                        # exact
        t2 = jnp.dot(anor, pa, preferred_element_type=jnp.float32)     # (n_max,K)
        rev = lax.dot_general(t2, anor, (((1,), (1,)), ((), ())),
                              preferred_element_type=jnp.float32)      # (n_max,n_max)
        rev = rev * offdiag_n

        # symmetric normalized Laplacian of rev, pad self-loops folded in
        rev_eff = rev + pad_eye
        rdinv_c = lax.rsqrt(jnp.sum(rev_eff, axis=1, keepdims=True))
        rdinv_r = lax.rsqrt(jnp.sum(rev_eff, axis=0, keepdims=True))
        lap_r = eye - rdinv_c * rev_eff * rdinv_r
        lrev_ref[0, l] = 0.5 * (lap_r + lap_r.T)

        # pooled node features; tiny (K,D) GEMM, kept per landmark and packed
        pf_list.append(lax.dot_general(assign, feat, (((0,), (0,)), ((), ())),
                                       preferred_element_type=jnp.float32))
        pa_list.append(pa)

    # single lane-dense stores for the small packed outputs
    pa_ref[0] = jnp.concatenate(pa_list, axis=1)     # (K, L*K)
    pf_ref[0] = jnp.concatenate(pf_list, axis=1)     # (K, L*D)


def pool_all(raw_pad, adj_pad, feat_pad, row_mask, eye_n, num_landmarks):
    G, n_max, lk = raw_pad.shape
    K = lk // num_landmarks
    D = feat_pad.shape[-1]
    L = num_landmarks
    kern = functools.partial(_pool_kernel, num_landmarks=L, k_size=K, feat_dim=D)
    # TODO(synk): for very large n_max on v7x (64 MiB VMEM) the (L,n_max,n_max)
    # Laplacian output block should be tiled / single-buffered; not needed at
    # these sizes.
    return pl.pallas_call(
        kern,
        out_shape=(jax.ShapeDtypeStruct((G, L, n_max, n_max), jnp.float32),
                   jax.ShapeDtypeStruct((G, n_max, n_max), jnp.float32),
                   jax.ShapeDtypeStruct((G, K, L * K), jnp.float32),
                   jax.ShapeDtypeStruct((G, K, L * D), jnp.float32)),
        grid=(G,),
        in_specs=[
            pl.BlockSpec((1, n_max, lk), lambda g: (g, 0, 0)),
            pl.BlockSpec((1, n_max, n_max), lambda g: (g, 0, 0)),
            pl.BlockSpec((1, n_max, D), lambda g: (g, 0, 0)),
            pl.BlockSpec((1, n_max, 1), lambda g: (g, 0, 0)),
            pl.BlockSpec((n_max, n_max), lambda g: (0, 0)),   # resident identity
        ],
        out_specs=(
            pl.BlockSpec((1, L, n_max, n_max), lambda g: (g, 0, 0, 0)),
            pl.BlockSpec((1, n_max, n_max), lambda g: (g, 0, 0)),
            pl.BlockSpec((1, K, L * K), lambda g: (g, 0, 0)),
            pl.BlockSpec((1, K, L * D), lambda g: (g, 0, 0)),
        ),
        compiler_params=pltpu.CompilerParams(
            dimension_semantics=("parallel",),
            vmem_limit_bytes=48 * 1024 * 1024),
    )(raw_pad, adj_pad, feat_pad, row_mask, eye_n)


# --------------------------------------------------------------- jitted core
@functools.partial(jax.jit, static_argnums=(7, 8, 9))
def _sdpool_core(params, h, adj_pad, row_mask, eye_n, rows_idx, feat_idx,
                 K, L, D):
    G, n_max = adj_pad.shape[0], adj_pad.shape[1]
    n_total = h.shape[0]

    # ---- landmark adjacencies -> normalized GCN propagation matrices -------
    iu = jnp.triu_indices(K, k=1)
    eye_k = jnp.eye(K, dtype=jnp.float32)
    a_list = []
    for i in range(L):
        A = jnp.zeros((K, K), jnp.float32).at[iu[0], iu[1]].set(
            params["adj_landmark"][i])
        A = A + A.T
        A_bin = (A != 0).astype(jnp.float32)        # torch.nonzero -> unweighted edges
        A_hat = A_bin + eye_k
        dis = jnp.sum(A_hat, axis=0) ** -0.5
        a_list.append(A_hat * dis[None, :] * dis[:, None])
    a_norm = jnp.stack(a_list)                       # (L, K, K)
    a_stack = a_norm.reshape(L * K, K)               # stacked A_norm @ I
    a_bd = jax.scipy.linalg.block_diag(*a_list)      # (L*K, L*K)

    alpha_row = params["att_alpha_row"]              # (1, 2D), [alpha_c | alpha_o]
    alpha_c_row = alpha_row[:, :D]
    alpha_o_row = alpha_row[:, D:]

    # ---- attention scores (two small fused kernels) -------------------------
    o_row = orig_attention_scores(h, params["att_W"], alpha_o_row)      # (1, N)
    c_row = landmark_coar_scores(a_stack, a_bd, params["att_W"],
                                 alpha_c_row, params["gcn_ws"])          # (1, L*K)

    # flat score of pair f (= k*N + n) is c[k] + o[n]; torch's reshape(-1, K) is
    # a raw row-major reinterpretation.  One broadcast-add + reshape:
    c_mat = c_row.reshape(L, K)
    o_vec = o_row[0]
    e_view = (c_mat[:, :, None] + o_vec[None, None, :]).reshape(L, n_total, K)
    # per-graph row windows, packed lane-dense (G, n_max, L*K); one gather
    raw_rows = e_view[:, rows_idx, :]                                    # (L,G,n_max,K)
    raw_pad = jnp.transpose(raw_rows, (1, 2, 0, 3)).reshape(G, n_max, L * K)

    # pad node features with a single scatter (no per-graph update-slices)
    feat_pad = jnp.zeros((G * n_max, D), jnp.float32).at[feat_idx].set(h)
    feat_pad = feat_pad.reshape(G, n_max, D)

    lap_rev, lap_adj, pa_all, pf_all = pool_all(
        raw_pad, adj_pad, feat_pad, row_mask, eye_n, L)

    # ---- spectra (XLA eigensolver) + per-graph candidate selection ---------
    eig_adj = jnp.flip(jnp.linalg.eigvalsh(lap_adj), axis=-1)            # (G, n_max)
    eig_rev = jnp.flip(jnp.linalg.eigvalsh(lap_rev), axis=-1)            # (G, L, n_max)
    sp = jnp.sum(jnp.abs(eig_adj[:, None, :] - eig_rev), axis=-1)        # (G, L)

    best = jnp.argmin(sp, axis=1)        # first minimum, same as strict '<' loop
    sp_min = jnp.min(sp, axis=1)

    pa_r = pa_all.reshape(G, K, L, K)
    pf_r = pf_all.reshape(G, K, L, D)
    sel_pa = jnp.take_along_axis(pa_r, best[:, None, None, None], axis=2)[:, :, 0, :]
    sel_pf = jnp.take_along_axis(pf_r, best[:, None, None, None], axis=2)[:, :, 0, :]
    pooled_feat = sel_pf.reshape(G * K, D)
    return sel_pa, pooled_feat, sp_min


# ------------------------------------------------------------ public wrapper
def sdpool_forward(params, h, adj_list, batch_num_nodes,
                   size_landmark_graphs, num_landmark_graphs, hidden_dim):
    K, L, D = size_landmark_graphs, num_landmark_graphs, hidden_dim
    G = len(batch_num_nodes)
    n_total = int(sum(batch_num_nodes))
    n_max = int(max(batch_num_nodes))
    n_max = ((n_max + 7) // 8) * 8       # sublane-aligned; extra padded rows only
                                         # add matching zero eigenvalues to both spectra

    # host-side (numpy) padding / index prep: no per-graph XLA update-slice ops
    adj_pad = np.zeros((G, n_max, n_max), np.float32)
    row_mask = np.zeros((G, n_max, 1), np.float32)
    rows_idx = np.zeros((G, n_max), np.int32)
    feat_idx = np.zeros((n_total,), np.int32)
    off = 0
    for g, n in enumerate(batch_num_nodes):
        # TODO(synk): the num_nodes < size_landmark_graphs branch (graph kept
        # un-pooled) is not implemented; all test graphs have n >= K.
        adj_pad[g, :n, :n] = np.asarray(adj_list[g], dtype=np.float32)
        row_mask[g, :n, 0] = 1.0
        rows_idx[g] = np.clip(off + np.arange(n_max), 0, n_total - 1)
        feat_idx[off:off + n] = g * n_max + np.arange(n)
        off += n
    eye_n = np.eye(n_max, dtype=np.float32)

    sel_pa, pooled_feat, sp_min = _sdpool_core(
        params, h, jnp.asarray(adj_pad), jnp.asarray(row_mask),
        jnp.asarray(eye_n), jnp.asarray(rows_idx), jnp.asarray(feat_idx),
        K, L, D)

    pool_adjs = [sel_pa[g] for g in range(G)]
    sp_dists = [sp_min[g] for g in range(G)]
    # (pool_batch_g analogue, pool_batch_g.ndata['feat'], batch_sp_dist)
    return pool_adjs, pooled_feat, sp_dists


if __name__ == "__main__":
    K = 8                 # size_landmark_graphs
    L = 2                 # num_landmark_graphs
    hidden_dim = 32
    num_gcn_layers = 2
    graph_sizes = (12, 12)
    n_total = sum(graph_sizes)

    key = jax.random.PRNGKey(0)
    keys = jax.random.split(key, 16)

    # ---- deterministic parameter init ------------------------------------
    params = {}
    params["adj_landmark"] = [
        jax.random.uniform(keys[i], (K * (K - 1) // 2,), jnp.float32)
        for i in range(L)
    ]
    gcn_dims = [K] + [hidden_dim] * (num_gcn_layers - 1) + [hidden_dim]
    params["gcn_ws"] = []
    for l in range(num_gcn_layers):
        fan_in, fan_out = gcn_dims[l], gcn_dims[l + 1]
        scale = (2.0 / (fan_in + fan_out)) ** 0.5
        params["gcn_ws"].append(
            scale * jax.random.normal(keys[4 + l], (fan_in, fan_out), jnp.float32))
    params["att_W"] = ((1.0 / hidden_dim) ** 0.5) * jax.random.normal(
        keys[8], (hidden_dim, hidden_dim), jnp.float32)          # (out, in)
    params["att_alpha_row"] = ((1.0 / (2 * hidden_dim)) ** 0.5) * jax.random.normal(
        keys[9], (1, 2 * hidden_dim), jnp.float32)               # lane-major alpha

    # ---- inputs: node features + dense adjacency per graph ---------------
    h = jax.random.normal(keys[10], (n_total, hidden_dim), jnp.float32)
    adj_list = []
    for gi, n in enumerate(graph_sizes):
        m = (jax.random.uniform(keys[12 + gi], (n, n)) < 0.35).astype(jnp.float32)
        A = jnp.triu(m, 1)
        A = A + A.T
        ring = jnp.zeros((n, n), jnp.float32).at[
            jnp.arange(n), (jnp.arange(n) + 1) % n].set(1.0)
        A = jnp.clip(A + ring + ring.T, 0.0, 1.0)   # connected, no self loops
        adj_list.append(A)
    adj_list = tuple(adj_list)

    pool_adjs, pooled_feat, sp_dists = sdpool_forward(
        params, h, adj_list, graph_sizes, K, L, hidden_dim)

    jax.block_until_ready(pooled_feat)
    for pa in pool_adjs:
        jax.block_until_ready(pa)
    for sd in sp_dists:
        jax.block_until_ready(sd)

    print("KERNEL_OK")
</pallas_src>

<mosaic_0001>
module attributes {stable_mosaic.version = 11 : i64} {
  func.func private @main(%arg0: i32) attributes {dimension_semantics = [#tpu.dimension_semantics<core_parallel>], iteration_bounds = array<i64: 2>, tpu.core_type = #tpu.core_type<sc_scalar_subcore>, window_params = []} {
    return
  }
}

module attributes {stable_mosaic.version = 11 : i64} {
  func.func private @main(%arg0: i32) attributes {dimension_semantics = [#tpu.dimension_semantics<core_parallel>], iteration_bounds = array<i64: 2>, tpu.core_type = #tpu.core_type<sc_scalar_subcore>, window_params = []} {
    return
  }
}

module attributes {stable_mosaic.version = 11 : i64} {
  func.func @_orig_kernel(%arg0: memref<24x32xf32, #tpu.memory_space<vmem>>, %arg1: memref<32x32xf32, #tpu.memory_space<vmem>>, %arg2: memref<1x32xf32, #tpu.memory_space<vmem>>, %arg3: memref<1x24xf32, #tpu.memory_space<vmem>>) attributes {dimension_semantics = [], scalar_prefetch = 0 : i64, scratch_operands = 0 : i64, tpu.core_type = #tpu.core_type<tc>} {
    %c0 = arith.constant 0 : index
    %c0_0 = arith.constant 0 : index
    %0 = vector.load %arg1[%c0, %c0_0] : memref<32x32xf32, #tpu.memory_space<vmem>>, vector<32x32xf32>
    %c0_1 = arith.constant 0 : index
    %c0_2 = arith.constant 0 : index
    %1 = vector.load %arg0[%c0_1, %c0_2] : memref<24x32xf32, #tpu.memory_space<vmem>>, vector<24x32xf32>
    %cst = arith.constant dense<0.000000e+00> : vector<32x24xf32>
    %2 = tpu.matmul %0, %1, %cst {dimension_numbers = #tpu.dot_dimension_numbers<[1], [1], [0], [0], [0, 0, 1, 0], [], []>} : vector<32x32xf32>, vector<24x32xf32>, vector<32x24xf32> -> vector<32x24xf32>
    %cst_3 = arith.constant 0.000000e+00 : f32
    %3 = vector.broadcast %cst_3 : f32 to vector<32x24xf32>
    %4 = arith.cmpf ogt, %2, %3 : vector<32x24xf32>
    %cst_4 = arith.constant 2.000000e-01 : f32
    %5 = vector.broadcast %cst_4 : f32 to vector<32x24xf32>
    %6 = arith.mulf %5, %2 : vector<32x24xf32>
    %7 = arith.select %4, %2, %6 : vector<32x24xi1>, vector<32x24xf32>
    %c0_5 = arith.constant 0 : index
    %c0_6 = arith.constant 0 : index
    %8 = vector.load %arg2[%c0_5, %c0_6] : memref<1x32xf32, #tpu.memory_space<vmem>>, vector<1x32xf32>
    %cst_7 = arith.constant dense<0.000000e+00> : vector<1x24xf32>
    %9 = tpu.matmul %8, %7, %cst_7 {dimension_numbers = #tpu.dot_dimension_numbers<[1], [0], [0], [1], [0, 0, 1, 1], [], []>} : vector<1x32xf32>, vector<32x24xf32>, vector<1x24xf32> -> vector<1x24xf32>
    %c0_8 = arith.constant 0 : index
    %c0_9 = arith.constant 0 : index
    %10 = vector.load %arg3[%c0_8, %c0_9] : memref<1x24xf32, #tpu.memory_space<vmem>>, vector<1x24xf32>
    tpu.vector_store %arg3[%c0_8, %c0_9], %9 {strides = array<i32>} : memref<1x24xf32, #tpu.memory_space<vmem>>, vector<1x24xf32>,
    return
  }
}

module attributes {stable_mosaic.version = 11 : i64} {
  func.func @_landmark_kernel(%arg0: memref<16x8xf32, #tpu.memory_space<vmem>>, %arg1: memref<16x16xf32, #tpu.memory_space<vmem>>, %arg2: memref<32x32xf32, #tpu.memory_space<vmem>>, %arg3: memref<1x32xf32, #tpu.memory_space<vmem>>, %arg4: memref<8x32xf32, #tpu.memory_space<vmem>>, %arg5: memref<32x32xf32, #tpu.memory_space<vmem>>, %arg6: memref<1x16xf32, #tpu.memory_space<vmem>>) attributes {dimension_semantics = [], scalar_prefetch = 0 : i64, scratch_operands = 0 : i64, tpu.core_type = #tpu.core_type<tc>} {
    %c0 = arith.constant 0 : index
    %c0_0 = arith.constant 0 : index
    %0 = vector.load %arg0[%c0, %c0_0] : memref<16x8xf32, #tpu.memory_space<vmem>>, vector<16x8xf32>
    %c0_1 = arith.constant 0 : index
    %c0_2 = arith.constant 0 : index
    %1 = vector.load %arg1[%c0_1, %c0_2] : memref<16x16xf32, #tpu.memory_space<vmem>>, vector<16x16xf32>
    %c0_3 = arith.constant 0 : index
    %c0_4 = arith.constant 0 : index
    %2 = vector.load %arg4[%c0_3, %c0_4] : memref<8x32xf32, #tpu.memory_space<vmem>>, vector<8x32xf32>
    %cst = arith.constant dense<0.000000e+00> : vector<16x32xf32>
    %3 = tpu.matmul %0, %2, %cst {dimension_numbers = #tpu.dot_dimension_numbers<[1], [0], [0], [1], [0, 0, 1, 1], [], []>} : vector<16x8xf32>, vector<8x32xf32>, vector<16x32xf32> -> vector<16x32xf32>
    %cst_5 = arith.constant 0.000000e+00 : f32
    %4 = vector.broadcast %cst_5 : f32 to vector<16x32xf32>
    %5 = arith.maximumf %3, %4 : vector<16x32xf32>
    %cst_6 = arith.constant dense<0.000000e+00> : vector<16x32xf32>
    %6 = tpu.matmul %1, %5, %cst_6 {dimension_numbers = #tpu.dot_dimension_numbers<[1], [0], [0], [1], [0, 0, 1, 1], [], []>} : vector<16x16xf32>, vector<16x32xf32>, vector<16x32xf32> -> vector<16x32xf32>
    %c0_7 = arith.constant 0 : index
    %c0_8 = arith.constant 0 : index
    %7 = vector.load %arg5[%c0_7, %c0_8] : memref<32x32xf32, #tpu.memory_space<vmem>>, vector<32x32xf32>
    %cst_9 = arith.constant dense<0.000000e+00> : vector<16x32xf32>
    %8 = tpu.matmul %6, %7, %cst_9 {dimension_numbers = #tpu.dot_dimension_numbers<[1], [0], [0], [1], [0, 0, 1, 1], [], []>} : vector<16x32xf32>, vector<32x32xf32>, vector<16x32xf32> -> vector<16x32xf32>
    %c0_10 = arith.constant 0 : index
    %c0_11 = arith.constant 0 : index
    %9 = vector.load %arg2[%c0_10, %c0_11] : memref<32x32xf32, #tpu.memory_space<vmem>>, vector<32x32xf32>
    %cst_12 = arith.constant dense<0.000000e+00> : vector<32x16xf32>
    %10 = tpu.matmul %9, %8, %cst_12 {dimension_numbers = #tpu.dot_dimension_numbers<[1], [1], [0], [0], [0, 0, 1, 0], [], []>} : vector<32x32xf32>, vector<16x32xf32>, vector<32x16xf32> -> vector<32x16xf32>
    %cst_13 = arith.constant 0.000000e+00 : f32
    %11 = vector.broadcast %cst_13 : f32 to vector<32x16xf32>
    %12 = arith.cmpf ogt, %10, %11 : vector<32x16xf32>
    %cst_14 = arith.constant 2.000000e-01 : f32
    %13 = vector.broadcast %cst_14 : f32 to vector<32x16xf32>
    %14 = arith.mulf %13, %10 : vector<32x16xf32>
    %15 = arith.select %12, %10, %14 : vector<32x16xi1>, vector<32x16xf32>
    %c0_15 = arith.constant 0 : index
    %c0_16 = arith.constant 0 : index
    %16 = vector.load %arg3[%c0_15, %c0_16] : memref<1x32xf32, #tpu.memory_space<vmem>>, vector<1x32xf32>
    %cst_17 = arith.constant dense<0.000000e+00> : vector<1x16xf32>
    %17 = tpu.matmul %16, %15, %cst_17 {dimension_numbers = #tpu.dot_dimension_numbers<[1], [0], [0], [1], [0, 0, 1, 1], [], []>} : vector<1x32xf32>, vector<32x16xf32>, vector<1x16xf32> -> vector<1x16xf32>
    %c0_18 = arith.constant 0 : index
    %c0_19 = arith.constant 0 : index
    %18 = vector.load %arg6[%c0_18, %c0_19] : memref<1x16xf32, #tpu.memory_space<vmem>>, vector<1x16xf32>
    tpu.vector_store %arg6[%c0_18, %c0_19], %17 {strides = array<i32>} : memref<1x16xf32, #tpu.memory_space<vmem>>, vector<1x16xf32>,
    return
  }
}

module attributes {stable_mosaic.version = 11 : i64} {
  func.func @_pool_kernel(%arg0: i32, %arg1: memref<1x16x16xf32, #tpu.memory_space<vmem>>, %arg2: memref<1x16x16xf32, #tpu.memory_space<vmem>>, %arg3: memref<1x16x32xf32, #tpu.memory_space<vmem>>, %arg4: memref<1x16x1xf32, #tpu.memory_space<vmem>>, %arg5: memref<16x16xf32, #tpu.memory_space<vmem>>, %arg6: memref<1x2x16x16xf32, #tpu.memory_space<vmem>>, %arg7: memref<1x16x16xf32, #tpu.memory_space<vmem>>, %arg8: memref<1x8x16xf32, #tpu.memory_space<vmem>>, %arg9: memref<1x8x64xf32, #tpu.memory_space<vmem>>) attributes {dimension_semantics = [#tpu.dimension_semantics<parallel>], iteration_bounds = array<i64: 2>, scalar_prefetch = 0 : i64, scratch_operands = 0 : i64, tpu.core_type = #tpu.core_type<tc>, window_params = [{transform_indices = @transform_0, window_bounds = array<i64: 1, 16, 16>}, {transform_indices = @transform_1, window_bounds = array<i64: 1, 16, 16>}, {transform_indices = @transform_2, window_bounds = array<i64: 1, 16, 32>}, {transform_indices = @transform_3, window_bounds = array<i64: 1, 16, 1>}, {pipeline_mode = #tpu.pipeline_mode<synchronous>, transform_indices = @transform_4, window_bounds = array<i64: 16, 16>}, {transform_indices = @transform_5, window_bounds = array<i64: 1, 2, 16, 16>}, {transform_indices = @transform_6, window_bounds = array<i64: 1, 16, 16>}, {transform_indices = @transform_7, window_bounds = array<i64: 1, 8, 16>}, {transform_indices = @transform_8, window_bounds = array<i64: 1, 8, 64>}]} {
    %c0 = arith.constant 0 : index
    %c0_0 = arith.constant 0 : index
    %c0_1 = arith.constant 0 : index
    %0 = vector.load %arg1[%c0, %c0_0, %c0_1] : memref<1x16x16xf32, #tpu.memory_space<vmem>>, vector<1x16x16xf32>
    %1 = vector.shape_cast %0 : vector<1x16x16xf32> to vector<16x16xf32>
    %c0_2 = arith.constant 0 : index
    %c0_3 = arith.constant 0 : index
    %c0_4 = arith.constant 0 : index
    %2 = vector.load %arg2[%c0_2, %c0_3, %c0_4] : memref<1x16x16xf32, #tpu.memory_space<vmem>>, vector<1x16x16xf32>
    %3 = vector.shape_cast %2 : vector<1x16x16xf32> to vector<16x16xf32>
    %c0_5 = arith.constant 0 : index
    %c0_6 = arith.constant 0 : index
    %c0_7 = arith.constant 0 : index
    %4 = vector.load %arg3[%c0_5, %c0_6, %c0_7] : memref<1x16x32xf32, #tpu.memory_space<vmem>>, vector<1x16x32xf32>
    %5 = vector.shape_cast %4 : vector<1x16x32xf32> to vector<16x32xf32>
    %c0_8 = arith.constant 0 : index
    %c0_9 = arith.constant 0 : index
    %c0_10 = arith.constant 0 : index
    %6 = vector.load %arg4[%c0_8, %c0_9, %c0_10] : memref<1x16x1xf32, #tpu.memory_space<vmem>>, vector<1x16x1xf32>
    %7 = vector.shape_cast %6 : vector<1x16x1xf32> to vector<16x1xf32>
    %c0_11 = arith.constant 0 : index
    %c0_12 = arith.constant 0 : index
    %8 = vector.load %arg5[%c0_11, %c0_12] : memref<16x16xf32, #tpu.memory_space<vmem>>, vector<16x16xf32>
    %cst = arith.constant 1.000000e+00 : f32
    %9 = vector.broadcast %cst : f32 to vector<16x16xf32>
    %10 = arith.subf %9, %8 : vector<16x16xf32>
    %11 = vector.extract_strided_slice %10 {offsets = [0, 0], sizes = [8, 8], strides = [1, 1]} : vector<16x16xf32> to vector<8x8xf32>
    %cst_13 = arith.constant 1.000000e+00 : f32
    %12 = vector.broadcast %cst_13 : f32 to vector<16x1xf32>
    %13 = arith.subf %12, %7 : vector<16x1xf32>
    %14 = vector.broadcast %13 : vector<16x1xf32> to vector<16x16xf32>
    %15 = arith.mulf %8, %14 : vector<16x16xf32>
    %16 = arith.addf %3, %15 : vector<16x16xf32>
    %cst_14 = arith.constant dense<0.000000e+00> : vector<16xf32>
    %17 = vector.multi_reduction <add>, %16, %cst_14 [1] : vector<16x16xf32> to vector<16xf32>
    %18 = vector.shape_cast %17 : vector<16xf32> to vector<16x1xf32>
    %19 = math.rsqrt %18 : vector<16x1xf32>
    %cst_15 = arith.constant dense<0.000000e+00> : vector<16xf32>
    %20 = vector.multi_reduction <add>, %16, %cst_15 [0] : vector<16x16xf32> to vector<16xf32>
    %21 = vector.shape_cast %20 : vector<16xf32> to vector<1x16xf32>
    %22 = math.rsqrt %21 : vector<1x16xf32>
    %23 = vector.broadcast %19 : vector<16x1xf32> to vector<16x16xf32>
    %24 = arith.mulf %23, %16 : vector<16x16xf32>
    %25 = vector.broadcast %22 : vector<1x16xf32> to vector<16x16xf32>
    %26 = arith.mulf %24, %25 : vector<16x16xf32>
    %27 = arith.subf %8, %26 : vector<16x16xf32>
    %28 = tpu.transpose %27, [1, 0] : vector<16x16xf32> -> vector<16x16xf32>
    %29 = arith.addf %27, %28 : vector<16x16xf32>
    %cst_16 = arith.constant 5.000000e-01 : f32
    %30 = vector.broadcast %cst_16 : f32 to vector<16x16xf32>
    %31 = arith.mulf %30, %29 : vector<16x16xf32>
    %c0_17 = arith.constant 0 : index
    %c0_18 = arith.constant 0 : index
    %c0_19 = arith.constant 0 : index
    %32 = vector.load %arg7[%c0_17, %c0_18, %c0_19] : memref<1x16x16xf32, #tpu.memory_space<vmem>>, vector<1x16x16xf32>
    %33 = vector.shape_cast %32 : vector<1x16x16xf32> to vector<16x16xf32>
    %34 = vector.shape_cast %31 : vector<16x16xf32> to vector<1x16x16xf32>
    tpu.vector_store %arg7[%c0_17, %c0_18, %c0_19], %34 {strides = array<i32>} : memref<1x16x16xf32, #tpu.memory_space<vmem>>, vector<1x16x16xf32>,
    %35 = vector.extract_strided_slice %1 {offsets = [0, 0], sizes = [16, 8], strides = [1, 1]} : vector<16x16xf32> to vector<16x8xf32>
    %36 = arith.negf %35 : vector<16x8xf32>
    %37 = math.exp %36 : vector<16x8xf32>
    %cst_20 = arith.constant 1.000000e+00 : f32
    %38 = vector.broadcast %cst_20 : f32 to vector<16x8xf32>
    %39 = arith.addf %38, %37 : vector<16x8xf32>
    %40 = arith.divf %38, %39 : vector<16x8xf32>
    %cst_21 = arith.constant dense<0xFF800000> : vector<16xf32>
    %41 = vector.multi_reduction <maximumf>, %40, %cst_21 [1] : vector<16x8xf32> to vector<16xf32>
    %42 = vector.shape_cast %41 : vector<16xf32> to vector<16x1xf32>
    %43 = vector.broadcast %42 : vector<16x1xf32> to vector<16x8xf32>
    %44 = arith.subf %40, %43 : vector<16x8xf32>
    %45 = math.exp %44 : vector<16x8xf32>
    %cst_22 = arith.constant dense<0.000000e+00> : vector<16xf32>
    %46 = vector.multi_reduction <add>, %45, %cst_22 [1] : vector<16x8xf32> to vector<16xf32>
    %47 = vector.shape_cast %46 : vector<16xf32> to vector<16x1xf32>
    %48 = vector.broadcast %47 : vector<16x1xf32> to vector<16x8xf32>
    %49 = arith.divf %45, %48 : vector<16x8xf32>
    %50 = vector.broadcast %7 : vector<16x1xf32> to vector<16x8xf32>
    %51 = arith.mulf %49, %50 : vector<16x8xf32>
    %cst_23 = arith.constant dense<0.000000e+00> : vector<8x16xf32>
    %52 = tpu.matmul %51, %3, %cst_23 {dimension_numbers = #tpu.dot_dimension_numbers<[0], [0], [1], [1], [0, 1, 1, 1], [], []>} : vector<16x8xf32>, vector<16x16xf32>, vector<8x16xf32> -> vector<8x16xf32>
    %cst_24 = arith.constant dense<0.000000e+00> : vector<8x8xf32>
    %53 = tpu.matmul %52, %51, %cst_24 {dimension_numbers = #tpu.dot_dimension_numbers<[1], [0], [0], [1], [0, 0, 1, 1], [], []>} : vector<8x16xf32>, vector<16x8xf32>, vector<8x8xf32> -> vector<8x8xf32>
    %54 = arith.mulf %53, %11 : vector<8x8xf32>
    %cst_25 = arith.constant dense<0.000000e+00> : vector<8xf32>
    %55 = vector.multi_reduction <add>, %51, %cst_25 [0] : vector<16x8xf32> to vector<8xf32>
    %56 = vector.shape_cast %55 : vector<8xf32> to vector<1x8xf32>
    %57 = vector.broadcast %56 : vector<1x8xf32> to vector<16x8xf32>
    %58 = arith.divf %51, %57 : vector<16x8xf32>
    %cst_26 = arith.constant dense<0.000000e+00> : vector<16x8xf32>
    %59 = tpu.matmul %58, %54, %cst_26 {dimension_numbers = #tpu.dot_dimension_numbers<[1], [0], [0], [1], [0, 0, 1, 1], [], []>} : vector<16x8xf32>, vector<8x8xf32>, vector<16x8xf32> -> vector<16x8xf32>
    %cst_27 = arith.constant dense<0.000000e+00> : vector<16x16xf32>
    %60 = tpu.matmul %59, %58, %cst_27 {dimension_numbers = #tpu.dot_dimension_numbers<[1], [1], [0], [0], [0, 0, 1, 0], [], []>} : vector<16x8xf32>, vector<16x8xf32>, vector<16x16xf32> -> vector<16x16xf32>
    %61 = arith.mulf %60, %10 : vector<16x16xf32>
    %62 = arith.addf %61, %15 : vector<16x16xf32>
    %cst_28 = arith.constant dense<0.000000e+00> : vector<16xf32>
    %63 = vector.multi_reduction <add>, %62, %cst_28 [1] : vector<16x16xf32> to vector<16xf32>
    %64 = vector.shape_cast %63 : vector<16xf32> to vector<16x1xf32>
    %65 = math.rsqrt %64 : vector<16x1xf32>
    %cst_29 = arith.constant dense<0.000000e+00> : vector<16xf32>
    %66 = vector.multi_reduction <add>, %62, %cst_29 [0] : vector<16x16xf32> to vector<16xf32>
    %67 = vector.shape_cast %66 : vector<16xf32> to vector<1x16xf32>
    %68 = math.rsqrt %67 : vector<1x16xf32>
    %69 = vector.broadcast %65 : vector<16x1xf32> to vector<16x16xf32>
    %70 = arith.mulf %69, %62 : vector<16x16xf32>
    %71 = vector.broadcast %68 : vector<1x16xf32> to vector<16x16xf32>
    %72 = arith.mulf %70, %71 : vector<16x16xf32>
    %73 = arith.subf %8, %72 : vector<16x16xf32>
    %74 = tpu.transpose %73, [1, 0] : vector<16x16xf32> -> vector<16x16xf32>
    %75 = arith.addf %73, %74 : vector<16x16xf32>
    %cst_30 = arith.constant 5.000000e-01 : f32
    %76 = vector.broadcast %cst_30 : f32 to vector<16x16xf32>
    %77 = arith.mulf %76, %75 : vector<16x16xf32>
    %c0_31 = arith.constant 0 : index
    %c0_32 = arith.constant 0 : index
    %c0_33 = arith.constant 0 : index
    %c0_34 = arith.constant 0 : index
    %78 = vector.load %arg6[%c0_31, %c0_32, %c0_33, %c0_34] : memref<1x2x16x16xf32, #tpu.memory_space<vmem>>, vector<1x1x16x16xf32>
    %79 = vector.shape_cast %78 : vector<1x1x16x16xf32> to vector<16x16xf32>
    %80 = vector.shape_cast %77 : vector<16x16xf32> to vector<1x1x16x16xf32>
    tpu.vector_store %arg6[%c0_31, %c0_32, %c0_33, %c0_34], %80 {strides = array<i32>} : memref<1x2x16x16xf32, #tpu.memory_space<vmem>>, vector<1x1x16x16xf32>,
    %cst_35 = arith.constant dense<0.000000e+00> : vector<8x32xf32>
    %81 = tpu.matmul %51, %5, %cst_35 {dimension_numbers = #tpu.dot_dimension_numbers<[0], [0], [1], [1], [0, 1, 1, 1], [], []>} : vector<16x8xf32>, vector<16x32xf32>, vector<8x32xf32> -> vector<8x32xf32>
    %82 = vector.extract_strided_slice %1 {offsets = [0, 8], sizes = [16, 8], strides = [1, 1]} : vector<16x16xf32> to vector<16x8xf32>
    %83 = arith.negf %82 : vector<16x8xf32>
    %84 = math.exp %83 : vector<16x8xf32>
    %cst_36 = arith.constant 1.000000e+00 : f32
    %85 = vector.broadcast %cst_36 : f32 to vector<16x8xf32>
    %86 = arith.addf %85, %84 : vector<16x8xf32>
    %87 = arith.divf %85, %86 : vector<16x8xf32>
    %cst_37 = arith.constant dense<0xFF800000> : vector<16xf32>
    %88 = vector.multi_reduction <maximumf>, %87, %cst_37 [1] : vector<16x8xf32> to vector<16xf32>
    %89 = vector.shape_cast %88 : vector<16xf32> to vector<16x1xf32>
    %90 = vector.broadcast %89 : vector<16x1xf32> to vector<16x8xf32>
    %91 = arith.subf %87, %90 : vector<16x8xf32>
    %92 = math.exp %91 : vector<16x8xf32>
    %cst_38 = arith.constant dense<0.000000e+00> : vector<16xf32>
    %93 = vector.multi_reduction <add>, %92, %cst_38 [1] : vector<16x8xf32> to vector<16xf32>
    %94 = vector.shape_cast %93 : vector<16xf32> to vector<16x1xf32>
    %95 = vector.broadcast %94 : vector<16x1xf32> to vector<16x8xf32>
    %96 = arith.divf %92, %95 : vector<16x8xf32>
    %97 = vector.broadcast %7 : vector<16x1xf32> to vector<16x8xf32>
    %98 = arith.mulf %96, %97 : vector<16x8xf32>
    %cst_39 = arith.constant dense<0.000000e+00> : vector<8x16xf32>
    %99 = tpu.matmul %98, %3, %cst_39 {dimension_numbers = #tpu.dot_dimension_numbers<[0], [0], [1], [1], [0, 1, 1, 1], [], []>} : vector<16x8xf32>, vector<16x16xf32>, vector<8x16xf32> -> vector<8x16xf32>
    %cst_40 = arith.constant dense<0.000000e+00> : vector<8x8xf32>
    %100 = tpu.matmul %99, %98, %cst_40 {dimension_numbers = #tpu.dot_dimension_numbers<[1], [0], [0], [1], [0, 0, 1, 1], [], []>} : vector<8x16xf32>, vector<16x8xf32>, vector<8x8xf32> -> vector<8x8xf32>
    %101 = arith.mulf %100, %11 : vector<8x8xf32>
    %cst_41 = arith.constant dense<0.000000e+00> : vector<8xf32>
    %102 = vector.multi_reduction <add>, %98, %cst_41 [0] : vector<16x8xf32> to vector<8xf32>
    %103 = vector.shape_cast %102 : vector<8xf32> to vector<1x8xf32>
    %104 = vector.broadcast %103 : vector<1x8xf32> to vector<16x8xf32>
    %105 = arith.divf %98, %104 : vector<16x8xf32>
    %cst_42 = arith.constant dense<0.000000e+00> : vector<16x8xf32>
    %106 = tpu.matmul %105, %101, %cst_42 {dimension_numbers = #tpu.dot_dimension_numbers<[1], [0], [0], [1], [0, 0, 1, 1], [], []>} : vector<16x8xf32>, vector<8x8xf32>, vector<16x8xf32> -> vector<16x8xf32>
    %cst_43 = arith.constant dense<0.000000e+00> : vector<16x16xf32>
    %107 = tpu.matmul %106, %105, %cst_43 {dimension_numbers = #tpu.dot_dimension_numbers<[1], [1], [0], [0], [0, 0, 1, 0], [], []>} : vector<16x8xf32>, vector<16x8xf32>, vector<16x16xf32> -> vector<16x16xf32>
    %108 = arith.mulf %107, %10 : vector<16x16xf32>
    %109 = arith.addf %108, %15 : vector<16x16xf32>
    %cst_44 = arith.constant dense<0.000000e+00> : vector<16xf32>
    %110 = vector.multi_reduction <add>, %109, %cst_44 [1] : vector<16x16xf32> to vector<16xf32>
    %111 = vector.shape_cast %110 : vector<16xf32> to vector<16x1xf32>
    %112 = math.rsqrt %111 : vector<16x1xf32>
    %cst_45 = arith.constant dense<0.000000e+00> : vector<16xf32>
    %113 = vector.multi_reduction <add>, %109, %cst_45 [0] : vector<16x16xf32> to vector<16xf32>
    %114 = vector.shape_cast %113 : vector<16xf32> to vector<1x16xf32>
    %115 = math.rsqrt %114 : vector<1x16xf32>
    %116 = vector.broadcast %112 : vector<16x1xf32> to vector<16x16xf32>
    %117 = arith.mulf %116, %109 : vector<16x16xf32>
    %118 = vector.broadcast %115 : vector<1x16xf32> to vector<16x16xf32>
    %119 = arith.mulf %117, %118 : vector<16x16xf32>
    %120 = arith.subf %8, %119 : vector<16x16xf32>
    %121 = tpu.transpose %120, [1, 0] : vector<16x16xf32> -> vector<16x16xf32>
    %122 = arith.addf %120, %121 : vector<16x16xf32>
    %cst_46 = arith.constant 5.000000e-01 : f32
    %123 = vector.broadcast %cst_46 : f32 to vector<16x16xf32>
    %124 = arith.mulf %123, %122 : vector<16x16xf32>
    %c0_47 = arith.constant 0 : index
    %c1 = arith.constant 1 : index
    %c0_48 = arith.constant 0 : index
    %c0_49 = arith.constant 0 : index
    %125 = vector.load %arg6[%c0_47, %c1, %c0_48, %c0_49] : memref<1x2x16x16xf32, #tpu.memory_space<vmem>>, vector<1x1x16x16xf32>
    %126 = vector.shape_cast %125 : vector<1x1x16x16xf32> to vector<16x16xf32>
    %127 = vector.shape_cast %124 : vector<16x16xf32> to vector<1x1x16x16xf32>
    tpu.vector_store %arg6[%c0_47, %c1, %c0_48, %c0_49], %127 {strides = array<i32>} : memref<1x2x16x16xf32, #tpu.memory_space<vmem>>, vector<1x1x16x16xf32>,
    %cst_50 = arith.constant dense<0.000000e+00> : vector<8x32xf32>
    %128 = tpu.matmul %98, %5, %cst_50 {dimension_numbers = #tpu.dot_dimension_numbers<[0], [0], [1], [1], [0, 1, 1, 1], [], []>} : vector<16x8xf32>, vector<16x32xf32>, vector<8x32xf32> -> vector<8x32xf32>
    %129 = tpu.concatenate %54, %101 in 1 : vector<8x8xf32>, vector<8x8xf32> -> vector<8x16xf32>
    %c0_51 = arith.constant 0 : index
    %c0_52 = arith.constant 0 : index
    %c0_53 = arith.constant 0 : index
    %130 = vector.load %arg8[%c0_51, %c0_52, %c0_53] : memref<1x8x16xf32, #tpu.memory_space<vmem>>, vector<1x8x16xf32>
    %131 = vector.shape_cast %130 : vector<1x8x16xf32> to vector<8x16xf32>
    %132 = vector.shape_cast %129 : vector<8x16xf32> to vector<1x8x16xf32>
    tpu.vector_store %arg8[%c0_51, %c0_52, %c0_53], %132 {strides = array<i32>} : memref<1x8x16xf32, #tpu.memory_space<vmem>>, vector<1x8x16xf32>,
    %133 = tpu.concatenate %81, %128 in 1 : vector<8x32xf32>, vector<8x32xf32> -> vector<8x64xf32>
    %c0_54 = arith.constant 0 : index
    %c0_55 = arith.constant 0 : index
    %c0_56 = arith.constant 0 : index
    %134 = vector.load %arg9[%c0_54, %c0_55, %c0_56] : memref<1x8x64xf32, #tpu.memory_space<vmem>>, vector<1x8x64xf32>
    %135 = vector.shape_cast %134 : vector<1x8x64xf32> to vector<8x64xf32>
    %136 = vector.shape_cast %133 : vector<8x64xf32> to vector<1x8x64xf32>
    tpu.vector_store %arg9[%c0_54, %c0_55, %c0_56], %136 {strides = array<i32>} : memref<1x8x64xf32, #tpu.memory_space<vmem>>, vector<1x8x64xf32>,
    return
  }
  func.func @transform_0(%arg0: i32) -> (i32, i32, i32) {
    %c0_i32 = arith.constant 0 : i32
    %c0_i32_0 = arith.constant 0 : i32
    %c0_i32_1 = arith.constant 0 : i32
    return %arg0, %c0_i32, %c0_i32_0 : i32, i32, i32
  }
  func.func @transform_1(%arg0: i32) -> (i32, i32, i32) {
    %c0_i32 = arith.constant 0 : i32
    %c0_i32_0 = arith.constant 0 : i32
    %c0_i32_1 = arith.constant 0 : i32
    return %arg0, %c0_i32, %c0_i32_0 : i32, i32, i32
  }
  func.func @transform_2(%arg0: i32) -> (i32, i32, i32) {
    %c0_i32 = arith.constant 0 : i32
    %c0_i32_0 = arith.constant 0 : i32
    %c0_i32_1 = arith.constant 0 : i32
    return %arg0, %c0_i32, %c0_i32_0 : i32, i32, i32
  }
  func.func @transform_3(%arg0: i32) -> (i32, i32, i32) {
    %c0_i32 = arith.constant 0 : i32
    %c0_i32_0 = arith.constant 0 : i32
    %c0_i32_1 = arith.constant 0 : i32
    return %arg0, %c0_i32, %c0_i32_0 : i32, i32, i32
  }
  func.func @transform_4(%arg0: i32) -> (i32, i32) {
    %c0_i32 = arith.constant 0 : i32
    %c0_i32_0 = arith.constant 0 : i32
    %c0_i32_1 = arith.constant 0 : i32
    return %c0_i32, %c0_i32_0 : i32, i32
  }
  func.func @transform_5(%arg0: i32) -> (i32, i32, i32, i32) {
    %c0_i32 = arith.constant 0 : i32
    %c0_i32_0 = arith.constant 0 : i32
    %c0_i32_1 = arith.constant 0 : i32
    %c0_i32_2 = arith.constant 0 : i32
    return %arg0, %c0_i32, %c0_i32_0, %c0_i32_1 : i32, i32, i32, i32
  }
  func.func @transform_6(%arg0: i32) -> (i32, i32, i32) {
    %c0_i32 = arith.constant 0 : i32
    %c0_i32_0 = arith.constant 0 : i32
    %c0_i32_1 = arith.constant 0 : i32
    return %arg0, %c0_i32, %c0_i32_0 : i32, i32, i32
  }
  func.func @transform_7(%arg0: i32) -> (i32, i32, i32) {
    %c0_i32 = arith.constant 0 : i32
    %c0_i32_0 = arith.constant 0 : i32
    %c0_i32_1 = arith.constant 0 : i32
    return %arg0, %c0_i32, %c0_i32_0 : i32, i32, i32
  }
  func.func @transform_8(%arg0: i32) -> (i32, i32, i32) {
    %c0_i32 = arith.constant 0 : i32
    %c0_i32_0 = arith.constant 0 : i32
    %c0_i32_1 = arith.constant 0 : i32
    return %arg0, %c0_i32, %c0_i32_0 : i32, i32, i32
  }
}

</mosaic_0001>

<bundles_post_ra>
// kernel: _sdpool_core.3
= control target key start
LH: loop header
LB: loop body
LE: loop exit
PB: predicated region body
PF: predicated region fallthrough
CT: control target
= control target key end

     0   :  { %vm21_vm0 = vcmask 261120   ;;  %v278_v8 = vmov 0.0|0.0   ;;  %vm279_vm2 = vmmov 0   ;;  %v280_v9 = vmov 0.0   ;;  %s337_s0 = inlined_call_operand.vmem [shape: f32[24,32], index: 0, kind: input, shape index: {}]   ;;  %s338_s1 = inlined_call_operand.vmem [shape: f32[32,32], index: 1, kind: input, shape index: {}]   ;;  %s339_s2 = inlined_call_operand.vmem [shape: f32[1,32], index: 2, kind: input, shape index: {}]   ;;  %s340_s3 = inlined_call_operand.vmem [shape: f32[1,24], index: 3, kind: output, shape index: {}]  }
   0x1   :  { %v18_v0 = vld [vmem:[%s337_s0] sm:$0xff]  ;;  %v19_v1 = vld [vmem:[%s337_s0 + $0x8] sm:$0xff]  ;;  %vm264_vm1 = vmpackc.low %vm21_vm0, %vm21_vm0  ;;  %269 = vmatprep.subr.bf16.mxu1 %v278_v8  ;;  %260 = vmatprep.mubr.msk.f32.mxu1 %vm279_vm2, %v280_v9  ;;  %vm214_vm7 = vcmask 188416  }
   0x2   :  { %v263_v2 = vpack.c.bf16 %v19_v1, %v18_v0  ;;  %v14_v3 = vld [vmem:[%s338_s1] sm:$0xff]  ;;  %v20_v4 = vld [vmem:[%s337_s0 + $0x10] sm:$0xff]  ;;  %v15_v5 = vld [vmem:[%s338_s1 + $0x8] sm:$0xff] }
   0x3   :  { %246 = vmatprep.mubr.msk.f32.mxu0 %vm21_vm0, %v14_v3  ;;  %v16_v6 = vld [vmem:[%s338_s1 + $0x10] sm:$0xff]  ;;  %v17_v7 = vld [vmem:[%s338_s1 + $0x18] sm:$0xff]  ;;  %v140_v24 = vld [vmem:[%s339_s2] sm:$0x1] }
   0x4   :  { %265 = vmatprep.subr.msk.bf16.mxu0 %vm264_vm1, %v263_v2 }
   0x5   :  { %268 = vmatpush3.bf16.xpose.msk.msra.mxu0 %vm264_vm1, %v263_v2 }
   0x6   :  { %244 = vmatprep.subr.msk.mxu0 %vm21_vm0, %v20_v4 }
   0xd   :  { %245 = vmatpush3.xpose.msk.msra.mxu0 %vm21_vm0, %v20_v4 }
  0x10   :  { %247 = vmatmul.mubr.msk.f32.vlgmr.msra.gmra.mrb[0].mxu0 %vm21_vm0, %v15_v5 }
  0x11   :  { %249 = vmatprep.mubr.msk.f32.mxu0 %vm21_vm0, %v16_v6 }
  0x14   :  { %250 = vmatmul.mubr.msk.f32.gmra.mrb[2].mxu0 %vm21_vm0, %v17_v7 }
  0xe3   :  { %v248_v10 = vpop.f32.mrb[0].mxu0 }
  0xe4   :  { %vm129_vm3 = vcmp.gt.f32.partialorder %v248_v10, 0.0  ;;  %v133_v11 = vmul.f32 0.2, %v248_v10  ;;  %v109_v12 = vpop.f32.mrb[1].mxu0 }
  0xe5   :  { %vm128_vm4 = vcmp.gt.f32.partialorder %v109_v12, 0.0  ;;  %v132_v13 = vmul.f32 0.2, %v109_v12 }
  0xe6   :  { %v137_v14 = vsel %vm129_vm3, %v248_v10, %v133_v11 }
  0xe7   :  { %v251_v15 = vpop.f32.mrb[2].mxu0  ;;  %v136_v16 = vsel %vm128_vm4, %v109_v12, %v132_v13 }
  0xe8   :  { %vm131_vm5 = vcmp.gt.f32.partialorder %v251_v15, 0.0  ;;  %v135_v17 = vmul.f32 0.2, %v251_v15  ;;  %v119_v18 = vpop.f32.mrb[3].mxu0  ;;  %v270_v19 = vpack.c.bf16 %v137_v14, %v136_v16 }
  0xe9   :  { %vm130_vm6 = vcmp.gt.f32.partialorder %v119_v18, 0.0  ;;  %v134_v20 = vmul.f32 0.2, %v119_v18 }
  0xea   :  { %v139_v21 = vsel %vm131_vm5, %v251_v15, %v135_v17  ;;  %271 = vmatpush3.bf16.msra.mxu1 %v270_v19 }
  0xeb   :  { %v138_v22 = vsel %vm130_vm6, %v119_v18, %v134_v20  ;;  %272 = vmatprep.subr.bf16.mxu1 %v278_v8 }
  0xec   :  { %v273_v23 = vpack.c.bf16 %v139_v21, %v138_v22 }
  0xee   :  { %274 = vmatpush3.bf16.msra.mxu1 %v273_v23 }
  0xf1   :  { %261 = vmatmul.mubr.msk.f32.vlgmr.msra.gmra.mrb[0].mxu1 %vm21_vm0, %v140_v24 }
 0x1c4   :  { %v210_v25 = vpop.f32.mrb[0].mxu1 }
 0x1c5   :  { %215 = vst.msk [vmem:[%s340_s3] sm:$0x1] %vm214_vm7, %v210_v25  ;;  %v262_v26 = vpop.f32.mrb[1].mxu1 }

// kernel: _sdpool_core.4
= control target key start
LH: loop header
LB: loop body
LE: loop exit
PB: predicated region body
PF: predicated region fallthrough
CT: control target
= control target key end

     0   :  { %vm28_vm0 = vcmask 64512   ;;  %vm112_vm1 = vcmask 130048   ;;  %vm198_vm2 = vcmask 261120   ;;  %v587_v25 = vmov 0.0|0.0   ;;  %s681_s4 = inlined_call_operand.vmem [shape: f32[8,32], index: 4, kind: input, shape index: {}]   ;;  %s682_s0 = inlined_call_operand.vmem [shape: f32[16,8], index: 0, kind: input, shape index: {}]   ;;  %s683_s1 = inlined_call_operand.vmem [shape: f32[16,16], index: 1, kind: input, shape index: {}]   ;;  %s684_s5 = inlined_call_operand.vmem [shape: f32[32,32], index: 5, kind: input, shape index: {}]   ;;  %s685_s2 = inlined_call_operand.vmem [shape: f32[32,32], index: 2, kind: input, shape index: {}]   ;;  %s686_s3 = inlined_call_operand.vmem [shape: f32[1,32], index: 3, kind: input, shape index: {}]   ;;  %s687_s6 = inlined_call_operand.vmem [shape: f32[1,16], index: 6, kind: output, shape index: {}]  }
   0x1   :  { %v27_v0 = vld [vmem:[%s681_s4] sm:$0xff]  ;;  %v24_v2 = vld [vmem:[%s682_s0 + $0x8] sm:$0xff]  ;;  %v196_v6 = vld [vmem:[%s684_s5 + $0x10] sm:$0xff]  ;;  %vm588_vm4 = vmmov 0   ;;  %v589_v26 = vmov 0.0   ;;  %vm473_vm9 = vcmask 122880  }
   0x2   :  { %v23_v1 = vld [vmem:[%s682_s0] sm:$0xff]  ;;  %516 = vmatprep.subr.mxu0 %v27_v0  ;;  %v195_v5 = vld [vmem:[%s684_s5 + $0x8] sm:$0xff]  ;;  %v197_v8 = vld [vmem:[%s684_s5 + $0x18] sm:$0xff] }
   0x3   :  { %518 = vmatprep.mubr.msk.f32.mxu0 %vm28_vm0, %v23_v1  ;;  %517 = vmatpush3.msra.mxu0 %v27_v0  ;;  %v25_v3 = vld [vmem:[%s683_s1] sm:$0xff]  ;;  %v568_v9 = vpack.c.bf16 %v197_v8, %v196_v6  ;;  %v26_v15 = vld [vmem:[%s683_s1 + $0x8] sm:$0xff]  ;;  %vm573_vm3 = vmpackc.low %vm198_vm2, %vm198_vm2 }
   0x4   :  { %519 = vmatmul.mubr.msk.f32.vlgmr.msra.gmra.mrb[0].mxu0 %vm28_vm0, %v24_v2  ;;  %525 = vmatprep.mubr.msk.f32.mxu1 %vm112_vm1, %v25_v3  ;;  %v194_v4 = vld [vmem:[%s684_s5] sm:$0xff]  ;;  %v281_v22 = vld [vmem:[%s685_s2 + $0x8] sm:$0xff]  ;;  %v282_v23 = vld [vmem:[%s685_s2 + $0x10] sm:$0xff] }
   0x5   :  { %v564_v7 = vpack.c.bf16 %v195_v5, %v194_v4  ;;  %v280_v18 = vld [vmem:[%s685_s2] sm:$0xff]  ;;  %v283_v24 = vld [vmem:[%s685_s2 + $0x18] sm:$0xff] }
   0x6   :  { %v399_v41 = vld [vmem:[%s686_s3] sm:$0x1] }
   0x7   :  { %565 = vmatprep.subr.bf16.mxu0 %v564_v7 }
   0x8   :  { %567 = vmatpush3.bf16.msra.mxu0 %v564_v7 }
   0x9   :  { %569 = vmatprep.subr.bf16.mxu0 %v568_v9 }
   0xc   :  { %571 = vmatpush3.bf16.msra.mxu0 %v568_v9 }
   0xd   :  { %578 = vmatprep.subr.bf16.mxu0 %v587_v25 }
  0xd7   :  { %v520_v10 = vpop.f32.mrb[0].mxu0 }
  0xd8   :  { %v111_v11 = vmax.f32 %v520_v10, 0.0  ;;  %v101_v12 = vpop.f32.mrb[1].mxu0 }
  0xd9   :  { %v110_v13 = vmax.f32 %v101_v12, 0.0 }
  0xdb   :  { %v560_v14 = vpack.c.bf16 %v111_v11, %v110_v13 }
  0xdd   :  { %561 = vmatprep.subr.bf16.mxu1 %v560_v14 }
  0xde   :  { %563 = vmatpush3.bf16.msra.mxu1 %v560_v14 }
  0xe1   :  { %526 = vmatmul.mubr.msk.f32.vlgmr.msra.gmra.mrb[0].mxu1 %vm112_vm1, %v26_v15 }
  0xe2   :  { %543 = vmatprep.mubr.msk.f32.mxu1 %vm198_vm2, %v280_v18 }
 0x1b4   :  { %v527_v16 = vpop.f32.mrb[0].mxu1 }
 0x1b5   :  { %v185_v17 = vpop.f32.mrb[1].mxu1 }
 0x1b6   :  { %536 = vmatprep.mubr.msk.f32.mxu0 %vm198_vm2, %v185_v17 }
 0x1b7   :  { %537 = vmatmul.mubr.msk.f32.vlgmr.msra.gmra.mrb[2].mxu0 %vm198_vm2, %v527_v16 }
 0x1b8   :  { %557 = vmatprep.mubr.msk.f32.mxu0 %vm588_vm4, %v589_v26 }
 0x28a   :  { %v538_v19 = vpop.f32.mrb[2].mxu0 }
 0x28b   :  { %v271_v20 = vpop.f32.mrb[3].mxu0 }
 0x28c   :  { %v572_v21 = vpack.c.bf16 %v538_v19, %v271_v20 }
 0x28e   :  { %574 = vmatprep.subr.msk.bf16.mxu1 %vm573_vm3, %v572_v21 }
 0x28f   :  { %577 = vmatpush3.bf16.xpose.msk.msra.mxu1 %vm573_vm3, %v572_v21 }
 0x296   :  { %544 = vmatmul.mubr.msk.f32.vlgmr.msra.gmra.mrb[2].mxu1 %vm198_vm2, %v281_v22 }
 0x297   :  { %546 = vmatprep.mubr.msk.f32.mxu1 %vm198_vm2, %v282_v23 }
 0x29a   :  { %547 = vmatmul.mubr.msk.f32.gmra.mrb[4].mxu1 %vm198_vm2, %v283_v24 }
 0x369   :  { %v545_v27 = vpop.f32.mrb[2].mxu1 }
 0x36a   :  { %vm388_vm5 = vcmp.gt.f32.partialorder %v545_v27, 0.0  ;;  %v392_v28 = vmul.f32 0.2, %v545_v27  ;;  %v368_v29 = vpop.f32.mrb[3].mxu1 }
 0x36b   :  { %vm387_vm6 = vcmp.gt.f32.partialorder %v368_v29, 0.0  ;;  %v391_v30 = vmul.f32 0.2, %v368_v29 }
 0x36c   :  { %v396_v31 = vsel %vm388_vm5, %v545_v27, %v392_v28 }
 0x36d   :  { %v395_v32 = vsel %vm387_vm6, %v368_v29, %v391_v30  ;;  %v548_v33 = vpop.f32.mrb[4].mxu1 }
 0x36e   :  { %v579_v34 = vpack.c.bf16 %v396_v31, %v395_v32  ;;  %vm390_vm7 = vcmp.gt.f32.partialorder %v548_v33, 0.0  ;;  %v394_v35 = vmul.f32 0.2, %v548_v33  ;;  %v378_v36 = vpop.f32.mrb[5].mxu1 }
 0x36f   :  { %vm389_vm8 = vcmp.gt.f32.partialorder %v378_v36, 0.0  ;;  %v393_v37 = vmul.f32 0.2, %v378_v36 }
 0x370   :  { %v398_v38 = vsel %vm390_vm7, %v548_v33, %v394_v35  ;;  %580 = vmatpush3.bf16.msra.mxu0 %v579_v34 }
 0x371   :  { %v397_v39 = vsel %vm389_vm8, %v378_v36, %v393_v37  ;;  %581 = vmatprep.subr.bf16.mxu0 %v587_v25 }
 0x372   :  { %v582_v40 = vpack.c.bf16 %v398_v38, %v397_v39 }
 0x374   :  { %583 = vmatpush3.bf16.msra.mxu0 %v582_v40 }
 0x377   :  { %558 = vmatmul.mubr.msk.f32.vlgmr.msra.gmra.mrb[4].mxu0 %vm198_vm2, %v399_v41 }
 0x44a   :  { %v469_v42 = vpop.f32.mrb[4].mxu0 }
 0x44b   :  { %474 = vst.msk [vmem:[%s687_s6] sm:$0x1] %vm473_vm9, %v469_v42  ;;  %v559_v43 = vpop.f32.mrb[5].mxu0 }

// kernel: custom-call.6
= control target key start
LH: loop header
LB: loop body
LE: loop exit
PB: predicated region body
PF: predicated region fallthrough
CT: control target
= control target key end

     0   :  { %s2107_s0 = inlined_call_operand.vmem [shape: f32[2,8,8], index: 0, kind: input, shape index: {}]   ;;  %s2108_s1 = inlined_call_operand.vmem [shape: f32[2,8,8], index: 1, kind: input, shape index: {}]   ;;  %s2109_s2 = inlined_call_operand.vmem [shape: f32[2,8,8], index: 2, kind: input, shape index: {}]   ;;  %s2110_s3 = inlined_call_operand.vmem [shape: f32[2,8,8], index: 3, kind: input, shape index: {}]   ;;  %s2111_s4 = inlined_call_operand.vmem [shape: f32[2,8], index: 4, kind: output, shape index: {0}]   ;;  %s2112_s5 = inlined_call_operand.vmem [shape: f32[2,8], index: 5, kind: output, shape index: {1}]   ;;  %s2113_s6 = inlined_call_operand.hbm [shape: f32[2,8,8], index: 6, kind: output, shape index: {2}]   ;;  %s2114_s7 = inlined_call_operand.hbm [shape: f32[2,8,8], index: 7, kind: output, shape index: {3}]   ;;  %s2115_s8 = inlined_call_operand.hbm [shape: f32[2,8,8], index: 8, kind: output, shape index: {4}]   ;;  %s2116_s9 = inlined_call_operand.hbm [shape: f32[2,8,8], index: 9, kind: output, shape index: {5}]  }
   0x1   :  { %2117 = sst [smem:[#allocation32_spill]] %s2107_s0 }
   0x2   :  { %11 = vsyncpa [#allocation9], 0 }
   0x3   :  { %13 = vsyncpa [#allocation9 + $0x1], 0 }
   0x4   :  { %14 = vsyncpa [#allocation11], 0 }
   0x5   :  { %16 = vsyncpa [#allocation11 + $0x1], 0 }
   0x6   :  { %17 = vsyncpa [#allocation14], 0 }
   0x7   :  { %19 = vsyncpa [#allocation14 + $0x1], 0  ;;  %s1723_s30 = smov 0   ;;  %s1725_s10 = smov 0  }
   0x8   :  { %s1727_s11 = smov 0  }
   0x9 LB: > { %s1739_s12 = sadd.s32 4294967295, %s1656_s11   ;;  %s1743_s14 = sadd.s32 1, %s1656_s11   ;;  %s1656_s11 = sphi %s1727_s11, %s2134_s11   ;;  %s1652_s10 = sphi %s1725_s10, %s2133_s10   ;;  %s1648_s30 = sphi %s1723_s30, %s2132_s30  }
   0xa   : > { %s29_s15 = sshrl.u32 %s1656_s11, 3  ;;  %s30_s16 = sshrl.u32 %s1743_s14, 3 }
   0xb   : > { %s34_s17 = sadd.s32 1, %s1652_s10  ;;  %s31_s18 = ssub.s32 %s29_s15, %s30_s16 }
   0xc   : > { %p44_p0 = scmp.ne.s32.totalorder %s1652_s10, %s1648_s30  ;;  %p32_p1 = scmp.eq.s32.totalorder %s31_s18, 0 }
   0xd   : > { %p45_p2 = scmp.eq.s32.totalorder %s1739_s12, 1  ;;  %p1404_p4 = scmp.ge.s32.totalorder %s1656_s11, 2 }
   0xe   : > { %s1752_s19 = scalar_select %p32_p1, %s1652_s10, %s34_s17  }
   0xf   : > { %p1754_p3 = por %p45_p2, %p44_p0  ;;  %95 = sbr.rel (%p1404_p4) target bundleno = 27 (0x1b), region = 16 }
  0x10   : > { %2118 = sst [smem:[#allocation31_spill]] %s1752_s19  ;;  %s97_s21 = sand.u32 (!%p1404_p4), 1, %s1656_s11  }
  0x11   : > { %s1406_s22 = sshll.u32 (!%p1404_p4), %s1656_s11, 3  ;;  %s1405_s23 = sshll.u32 (!%p1404_p4), %s97_s21, 3 }
  0x12   : > { %s2120_s0 = sld [smem:[#allocation32_spill]] (!%p1404_p4)  ;;  %s99_s27 = scalar_lea.vmem (!%p1404_p4), [#allocation0], %s1405_s23 }
  0x13   : > { %s139_s15 = scalar_lea.vmem (!%p1404_p4), %s2108_s1, %s1406_s22  ;;  %s177_s18 = scalar_lea.vmem (!%p1404_p4), %s2109_s2, %s1406_s22 }
  0x14   : > { %v167_v1 = vld [vmem:[%s139_s15] sm:$0xff] (!%p1404_p4)  ;;  %s137_s13 = scalar_lea.vmem (!%p1404_p4), [#allocation1], %s1405_s23  ;;  %s215_s24 = scalar_lea.vmem (!%p1404_p4), %s2110_s3, %s1406_s22 }
  0x15   : > { %168 = vst [vmem:[%s137_s13] sm:$0xff] (!%p1404_p4), %v167_v1  ;;  %v205_v2 = vld [vmem:[%s177_s18] sm:$0xff] (!%p1404_p4)  ;;  %s175_s25 = scalar_lea.vmem (!%p1404_p4), [#allocation2], %s1405_s23 }
  0x16   : > { %206 = vst [vmem:[%s175_s25] sm:$0xff] %v205_v2  ;;  %v243_v3 = vld [vmem:[%s215_s24] sm:$0xff] }
  0x18   : > { %s101_s26 = scalar_lea.vmem %s2120_s0, %s1406_s22 }
  0x19   : > { %v129_v0 = vld [vmem:[%s101_s26] sm:$0xff]  ;;  %s213_s26 = scalar_lea.vmem [#allocation3], %s1405_s23 }
  0x1a   : > { %130 = vst [vmem:[%s99_s27] sm:$0xff] %v129_v0  ;;  %244 = vst [vmem:[%s213_s26] sm:$0xff] %v243_v3 }
  0x1b PF: > { %p1413_p5 = scmp.ge.s32.totalorder %s1656_s11, 1  ;;  %p249_p6 = scmp.lt.s32.totalorder %s1656_s11, 3 }
  0x1d   : > { %p250_p7 = pnand %p1413_p5, %p249_p6 }
  0x1f   : > { %253 = sbr.rel (%p250_p7) target bundleno = 1094 (0x446), region = 156 }
  0x26   : > { %s1778_s13 = sand.u32 1, %s1739_s12   ;;  %s290_s27 = sand.u32 1, %s1648_s30   ;;  %v338_v4 = vlaneseq  ;;  %v1666_v11 = vmov 0.0  }
  0x27   : > { %s1414_s19 = sshll.u32 %s1778_s13, 3  ;;  %s1782_s22 = sshll.u32 %s290_s27, 1 }
  0x28   : > { %v1784_v5 = vand.u32 127, %v338_v4  ;;  %v1786_v6 = vshrl.u32 %v338_v4, 7  ;;  %s258_s23 = scalar_lea.vmem [#allocation0], %s1414_s19  ;;  %s262_s28 = scalar_lea.vmem [#allocation1], %s1414_s19 }
  0x29   : > { %v322_v7 = vld [vmem:[%s258_s23] sm:$0xff]  ;;  %v325_v8 = vld [vmem:[%s262_s28] sm:$0xff]  ;;  %s266_s29 = scalar_lea.vmem [#allocation2], %s1414_s19  ;;  %s270_s15 = scalar_lea.vmem [#allocation3], %s1414_s19 }
  0x2a   : > { %v328_v9 = vld [vmem:[%s266_s29] sm:$0xff]  ;;  %v331_v10 = vld [vmem:[%s270_s15] sm:$0xff]  ;;  %s1788_s16 = scalar_lea.vmem [#allocation8], %s1414_s19  ;;  %s1791_s30 = scalar_lea.vmem [#allocation10], %s1414_s19  ;;  %v340_v5 = vmov %v1784_v5  ;;  %v343_v6 = vmov %v1786_v6  ;;  %vm1293_vm2 = vcmp.lt.s32.totalorder %v1784_v5, 8 }
  0x2b   : > { %333 = vst [vmem:[%s1788_s16] sm:$0xff] %v1666_v11  ;;  %334 = vst [vmem:[%s1791_s30] sm:$0xff] %v1666_v11  ;;  %s321_s17 = smov [#allocation15]  ;;  %s324_s18 = smov [#allocation16]  ;;  %v353_v5 = vmov %v1784_v5  ;;  %v356_v6 = vmov %v1786_v6  ;;  %vm347_vm0 = vcmp.eq.s32.totalorder %v343_v6, %v340_v5 }
  0x2c   : > { %s1794_s21 = scalar_lea.vmem [#allocation12], %s1414_s19  ;;  %s1797_s24 = scalar_lea.vmem [#allocation13], %s1414_s19  ;;  %323 = vst [vmem:[%s321_s17] sm:$0xff] %v322_v7  ;;  %326 = vst [vmem:[%s324_s18] sm:$0xff] %v325_v8  ;;  %vm360_vm1 = vcmp.eq.s32.totalorder %v356_v6, %v353_v5  ;;  %v1285_v5 = vmov %v1784_v5  ;;  %v1288_v6 = vmov %v1786_v6 }
  0x2d   : > { %335 = vst [vmem:[%s1794_s21] sm:$0xff] %v1666_v11  ;;  %336 = vst [vmem:[%s1797_s24] sm:$0xff] %v1666_v11  ;;  %s327_s25 = smov [#allocation17]  ;;  %s330_s26 = smov [#allocation18]  ;;  %vm1298_vm3 = vcmp.eq.s32.totalorder %v1288_v6, %v1285_v5  ;;  %v1336_v5 = vmov %v1784_v5  ;;  %v1305_v6 = vmov %v1786_v6 }
  0x2e   : > { %329 = vst [vmem:[%s327_s25] sm:$0xff] %v328_v9  ;;  %332 = vst [vmem:[%s330_s26] sm:$0xff] %v331_v10  ;;  %s337_s16 = smov %s1788_s16  ;;  %s350_s24 = smov %s1797_s24  ;;  %v1302_v5 = vmov %v1784_v5  ;;  %v1339_v6 = vmov %v1786_v6 }
  0x2f   : > { %s1289_s23 = smov [#allocation15]  ;;  %s1306_s28 = smov [#allocation16]  ;;  %v1319_v5 = vmov %v1784_v5  ;;  %v1322_v6 = vmov %v1786_v6  ;;  %vm1349_vm4 = vcmp.eq.s32.totalorder %v1339_v6, %v1336_v5 }
  0x30   : > { %s1323_s29 = smov [#allocation17]  ;;  %s1340_s15 = smov [#allocation18] }
  0x32   : > { %v344_v12 = vld [vmem:[%s337_s16] sm:$0xff] }
  0x33   : > { %v348_v13 = vsel %vm347_vm0, 1.0, %v344_v12  ;;  %v1295_v16 = vld [vmem:[%s1289_s23] sm:$0xff] }
  0x34   : > { %v357_v14 = vld [vmem:[%s350_s24] sm:$0xff]  ;;  %349 = vst [vmem:[%s337_s16] sm:$0xff] %v348_v13  ;;  %v1296_v18 = vsel %vm1293_vm2, %v1295_v16, 0.0 }
  0x35   : > { %v361_v15 = vsel %vm360_vm1, 1.0, %v357_v14  ;;  %v1312_v17 = vld [vmem:[%s1306_s28] sm:$0xff]  ;;  %v1297_v22 = vmul.f32 %v1296_v18, %v1296_v18 }
  0x36   : > { %362 = vst [vmem:[%s350_s24] sm:$0xff] %v361_v15  ;;  %v1313_v19 = vsel %vm1293_vm2, %v1312_v17, 0.0  ;;  %v1329_v20 = vld [vmem:[%s1323_s29] sm:$0xff] }
  0x37   : > { %v1346_v21 = vld [vmem:[%s1340_s15] sm:$0xff]  ;;  %v1314_v23 = vmul.f32 %v1313_v19, %v1313_v19  ;;  %v1330_v24 = vsel %vm1293_vm2, %v1329_v20, 0.0  ;;  %v1299_v29 = vsel %vm1298_vm3, 0.0, %v1297_v22 }
  0x38   : > { %v1347_v25 = vsel %vm1293_vm2, %v1346_v21, 0.0  ;;  %v1331_v26 = vmul.f32 %v1330_v24, %v1330_v24 }
  0x39   : > { %v1316_v27 = vadd.f32 %v1314_v23, %v1297_v22  ;;  %v1348_v28 = vmul.f32 %v1347_v25, %v1347_v25  ;;  %v1315_v30 = vadd.f32 %v1314_v23, %v1299_v29 }
  0x3b   : > { %v1333_v31 = vadd.f32 %v1331_v26, %v1316_v27  ;;  %v1332_v32 = vadd.f32 %v1331_v26, %v1315_v30  ;;  %v1350_v33 = vsel %vm1349_vm4, 0.0, %v1348_v28 }
  0x3d   : > { %v1352_v34 = vadd.f32 %v1348_v28, %v1333_v31  ;;  %v1351_v35 = vadd.f32 %v1350_v33, %v1332_v32 }
  0x3f   : > { %1353 = vadd.xlane.f32.xlu0 %v1352_v34 }
  0x43   : > { %1361 = vadd.xlane.f32.xlu0 %v1351_v35 }
  0xcc   : > { %v1354_v36 = vpop.xlane.xlu0 %1353 }
  0xcd   : > { %v1355_v37 = vrot.slane %v1354_v36, 4 }
  0xcf   : > { %v1356_v38 = vadd.f32 %v1355_v37, %v1354_v36 }
  0xd0   : > { %v1362_v39 = vpop.xlane.xlu0 %1361 }
  0xd1   : > { %v1357_v40 = vrot.slane %v1356_v38, 2  ;;  %v1363_v41 = vrot.slane %v1362_v39, 4 }
  0xd3   : > { %v1364_v42 = vadd.f32 %v1363_v41, %v1362_v39  ;;  %v1358_v43 = vadd.f32 %v1357_v40, %v1356_v38 }
  0xd5   : > { %v1365_v44 = vrot.slane %v1364_v42, 2  ;;  %v1359_v46 = vrot.slane %v1358_v43, 1 }
  0xd7   : > { %v1366_v45 = vadd.f32 %v1365_v44, %v1364_v42  ;;  %v1360_v49 = vadd.f32 %v1359_v46, %v1358_v43 }
  0xd9   : > { %v1367_v47 = vrot.slane %v1366_v45, 1 }
  0xdb   : > { %v1368_v48 = vadd.f32 %v1367_v47, %v1366_v45 }
  0xdd   : > { %1454 = vpush %v1368_v48 }
  0xde   : > { %1456 = vpush %v1360_v49 }
 0x10e   : > { %s1455_s17 = spop %1454 }
 0x10f   : > { %s1457_s18 = spop %1456 }
 0x110   : > { %s1371_s25 = smul.f32 1e-10, %s1457_s18 }
 0x112   : > { %p1372_p8 = scmp.le.f32.partialorder %s1455_s17, %s1371_s25 }
 0x113   : > { %s1826_s26 = smov (!%p1372_p8), 0  }
 0x114   : > { %1375 = sbr.rel (%p1372_p8) target bundleno = 958 (0x3be), region = 365 }
 0x11b LB: >> { %s1831_s23 = smov 0   ;;  %s1660_s26 = sphi %s1826_s26, %s2121_s26  }
 0x11c LB: >>> { %s467_s28 = smov [#allocation15]  ;;  %v471_v5 = vmov %v1784_v5  ;;  %v474_v6 = vmov %v1786_v6  ;;  %s487_s29 = smov [#allocation16]  ;;  %vm790_vm14 = vcmp.eq.s32.totalorder %v1786_v6, 0  ;;  %vm802_vm15 = vcmp.eq.s32.totalorder %v1786_v6, 7  ;;  %s1664_s23 = sphi %s1831_s23, %s466_s23  }
 0x11d   : >>> { %v491_v5 = vmov %v1784_v5  ;;  %v494_v6 = vmov %v1786_v6  ;;  %v475_v50 = vld [vmem:[%s467_s28] sm:$0xff]  ;;  %vm478_vm5 = vcmp.eq.s32.totalorder %v474_v6, %v471_v5  ;;  %s507_s15 = smov [#allocation18]  ;;  %s468_s17 = smov [#allocation19] }
 0x11e   : >>> { %vm498_vm6 = vcmp.eq.s32.totalorder %v494_v6, %v491_v5  ;;  %v511_v5 = vmov %v1784_v5  ;;  %v514_v6 = vmov %v1786_v6  ;;  %v479_v51 = vsel %vm478_vm5, %v475_v50, 0.0  ;;  %v495_v52 = vld [vmem:[%s487_s29] sm:$0xff]  ;;  %s488_s18 = smov [#allocation20]  ;;  %s508_s25 = smov [#allocation21] }
 0x11f   : >>> { %vm518_vm7 = vcmp.eq.s32.totalorder %v514_v6, %v511_v5  ;;  %v480_v53 = vrot.slane %v479_v51, 4  ;;  %v499_v54 = vsel %vm498_vm6, %v495_v52, 0.0  ;;  %v515_v55 = vld [vmem:[%s507_s15] sm:$0xff]  ;;  %s531_s28 = smov [#allocation20]  ;;  %s529_s29 = smov [#allocation19]  ;;  %v580_v5 = vmov %v1784_v5 }
 0x120   : >>> { %v500_v56 = vrot.slane %v499_v54, 4  ;;  %v519_v57 = vsel %vm518_vm7, %v515_v55, 0.0  ;;  %s533_s15 = smov [#allocation21]  ;;  %v583_v6 = vmov %v1786_v6  ;;  %v595_v5 = vmov %v1784_v5  ;;  %s1848_s19 = smov [#allocation16] }
 0x121   : >>> { %v481_v58 = vadd.f32 %v480_v53, %v479_v51  ;;  %v520_v59 = vrot.slane %v519_v57, 4  ;;  %v598_v6 = vmov %v1786_v6  ;;  %vm585_vm12 = vcmp.eq.s32.totalorder %v583_v6, %v580_v5  ;;  %s830_s27 = smov [#allocation26]  ;;  %s1853_s16 = smov %s1788_s16  ;;  %v615_v50 = vld [vmem:[%s1848_s19] sm:$0xff] }
 0x122   : >>> { %v501_v60 = vadd.f32 %v500_v56, %v499_v54  ;;  %vm600_vm13 = vcmp.eq.s32.totalorder %v598_v6, %v595_v5  ;;  %s1856_s30 = smov %s1791_s30  ;;  %s1859_s21 = smov %s1794_s21  ;;  %v838_v52 = vld [vmem:[%s1853_s16] sm:$0xff]  ;;  %v693_v5 = vmov %v1784_v5  ;;  %v696_v6 = vmov %v1786_v6 }
 0x123   : >>> { %v482_v61 = vrot.slane %v481_v58, 2  ;;  %v521_v62 = vadd.f32 %v520_v59, %v519_v57  ;;  %s1863_s24 = smov %s1797_s24  ;;  %v839_v53 = vld [vmem:[%s1856_s30] sm:$0xff]  ;;  %s832_s0 = smov [#allocation27]  ;;  %v666_v5 = vmov %v1784_v5  ;;  %v669_v6 = vmov %v1786_v6 }
 0x124   : >>> { %v502_v63 = vrot.slane %v501_v60, 2  ;;  %v840_v56 = vld [vmem:[%s1859_s21] sm:$0xff]  ;;  %v707_v5 = vmov %v1784_v5  ;;  %v710_v6 = vmov %v1786_v6  ;;  %vm700_vm0 = vcmp.eq.s32.totalorder %v696_v6, %v693_v5  ;;  %s466_s23 = sadd.s32 1, %s1664_s23  }
 0x125   : >>> { %v483_v0 = vadd.f32 %v482_v61, %v481_v58  ;;  %v522_v1 = vrot.slane %v521_v62, 2  ;;  %v841_v57 = vld [vmem:[%s1863_s24] sm:$0xff]  ;;  %v680_v5 = vmov %v1784_v5  ;;  %v683_v6 = vmov %v1786_v6  ;;  %p463_p9 = scmp.ge.s32.totalorder %s466_s23, 15  }
 0x126   : >>> { %v503_v2 = vadd.f32 %v502_v63, %v501_v60  ;;  %vm674_vm1 = vcmp.eq.s32.totalorder %v669_v6, %v666_v5  ;;  %vm715_vm3 = vcmp.eq.s32.totalorder %v710_v6, %v707_v5  ;;  %vm687_vm4 = vcmp.eq.s32.totalorder %v683_v6, %v680_v5 }
 0x127   : >>> { %v484_v3 = vrot.slane %v483_v0, 1  ;;  %v523_v4 = vadd.f32 %v522_v1, %v521_v62  ;;  %vm729_vm5 = vcmp.eq.s32.totalorder %v1784_v5, 0  ;;  %vm733_vm6 = vcmp.eq.s32.totalorder %v1784_v5, 1 }
 0x128   : >>> { %v504_v7 = vrot.slane %v503_v2, 1  ;;  %vm746_vm7 = vcmp.eq.s32.totalorder %v1784_v5, 7  ;;  %v367_v5 = vmov (%p463_p9), %v1784_v5  ;;  %v370_v6 = vmov (%p463_p9), %v1786_v6 }
 0x129   : >>> { %v485_v8 = vadd.f32 %v484_v3, %v483_v0  ;;  %v524_v9 = vrot.slane %v523_v4, 1  ;;  %v420_v5 = vmov (%p463_p9), %v1784_v5 }
 0x12a   : >>> { %v505_v10 = vadd.f32 %v504_v7, %v503_v2 }
 0x12b   : >>> { %486 = vst [vmem:[%s468_s17] sm:$0x1] %v485_v8  ;;  %v525_v11 = vadd.f32 %v524_v9, %v523_v4  ;;  %s568_s17 = smov [#allocation22] }
 0x12c   : >>> { %506 = vst [vmem:[%s488_s18] sm:$0x1] %v505_v10  ;;  %s570_s18 = smov [#allocation23] }
 0x12d   : >>> { %526 = vst [vmem:[%s508_s25] sm:$0x1] %v525_v11  ;;  %s527_s25 = smov [#allocation24] }
 0x12e   : >>> { %s572_s25 = smov %s527_s25 }
 0x132   : >>> { %v530_v14 = vld [vmem:[%s529_s29] sm:$0xff]  ;;  %s576_s29 = smov [#allocation24] }
 0x133   : >>> { %v532_v12 = vld [vmem:[%s531_s28] sm:$0xff]  ;;  %v553_v27 = vand.u32 2147483647, %v530_v14  ;;  %s528_s28 = smov [#allocation25] }
 0x134   : >>> { %v536_v13 = vmul.f32 2.0, %v532_v12  ;;  %v534_v15 = vld [vmem:[%s533_s15] sm:$0xff]  ;;  %v554_v32 = vand.u32 2147483647, %v532_v12  ;;  %s574_s28 = smov %s528_s28  ;;  %s591_s15 = smov [#allocation25] }
 0x135   : >>> { %v535_v16 = vsub.f32 %v534_v15, %v530_v14  ;;  %v555_v28 = vand.u32 2147483647, %v534_v15 }
 0x136   : >>> { %1510 = vrcp.f32 %v536_v13 }
 0x137   : >>> { %v556_v31 = vmin.f32 %v553_v27, %v555_v28 }
 0x139   : >>> { %v557_v33 = vmul.f32 1.1920929e-08, %v556_v31 }
 0x13b   : >>> { %vm558_vm11 = vcmp.le.f32.partialorder %v554_v32, %v557_v33 }
 0x140   : >>> { %v1511_v17 = vpop.eup %1510 }
 0x141   : >>> { %v538_v18 = vmul.f32 %v1511_v17, %v535_v16 }
 0x143   : >>> { %v540_v19 = vmul.f32 %v538_v18, %v538_v18  ;;  %vm539_vm10 = vcmp.ge.f32.partialorder %v538_v18, 0.0 }
 0x145   : >>> { %v541_v20 = vadd.f32 1.0, %v540_v19 }
 0x147   : >>> { %1512 = vrsqrt.f32 %v541_v20  ;;  %vm544_vm8 = vcmp.eq.f32.partialorder %v541_v20, inf  ;;  %v547_v22 = vand.u32 2147483648, %v541_v20  ;;  %vm546_vm9 = vcmp.eq.f32.partialorder %v541_v20, 0.0 }
 0x151   : >>> { %v1513_v21 = vpop.eup %1512 }
 0x152   : >>> { %v543_v23 = vmul.f32 %v1513_v21, %v541_v20 }
 0x154   : >>> { %v545_v24 = vsel %vm544_vm8, %v541_v20, %v543_v23  ;;  %vm382_vm8 = vcmp.eq.s32.totalorder (%p463_p9), %v370_v6, %v367_v5  ;;  %v423_v6 = vmov (%p463_p9), %v1786_v6  ;;  %v386_v5 = vmov (%p463_p9), %v1784_v5 }
 0x155   : >>> { %v548_v25 = vsel %vm546_vm9, %v547_v22, %v545_v24  ;;  %v389_v6 = vmov (%p463_p9), %v1786_v6  ;;  %v403_v5 = vmov (%p463_p9), %v1784_v5  ;;  %vm435_vm9 = vcmp.eq.s32.totalorder (%p463_p9), %v423_v6, %v420_v5 }
 0x156   : >>> { %v549_v26 = vxor.u32 2147483648, %v548_v25  ;;  %v406_v6 = vmov (%p463_p9), %v1786_v6 }
 0x158   : >>> { %v550_v29 = vsel %vm539_vm10, %v548_v25, %v549_v26 }
 0x159   : >>> { %v551_v30 = vadd.f32 %v550_v29, %v538_v18 }
 0x15b   : >>> { %1514 = vrcp.f32 %v551_v30 }
 0x165   : >>> { %v1515_v34 = vpop.eup %1514 }
 0x166   : >>> { %v559_v35 = vsel %vm558_vm11, 0.0, %v1515_v34 }
 0x167   : >>> { %v560_v36 = vmul.f32 %v559_v35, %v559_v35  ;;  %v564_v37 = vmul.f32 %v559_v35, %v532_v12 }
 0x169   : >>> { %v561_v38 = vadd.f32 1.0, %v560_v36  ;;  %v565_v39 = vsub.f32 %v530_v14, %v564_v37  ;;  %v567_v40 = vadd.f32 %v564_v37, %v534_v15 }
 0x16b   : >>> { %1516 = vrsqrt.f32 %v561_v38  ;;  %569 = vst [vmem:[%s568_s17] sm:$0xff] %v565_v39  ;;  %571 = vst [vmem:[%s570_s18] sm:$0xff] %v567_v40  ;;  %s589_s17 = smov [#allocation26]  ;;  %s606_s18 = smov [#allocation26] }
 0x175   : >>> { %v1517_v41 = vpop.eup %1516 }
 0x176   : >>> { %573 = vst [vmem:[%s572_s25] sm:$0xff] %v1517_v41  ;;  %v563_v42 = vmul.f32 %v1517_v41, %v559_v35  ;;  %s1846_s25 = smov [#allocation15] }
 0x177   : >>> { %v614_v49 = vld [vmem:[%s1846_s25] sm:$0xff] }
 0x178   : >>> { %575 = vst [vmem:[%s574_s28] sm:$0xff] %v563_v42  ;;  %s604_s28 = smov [#allocation27] }
 0x17d   : >>> { %v577_v43 = vld [vmem:[%s576_s29] ss:$0 sm:$0xff]  ;;  %s1850_s29 = smov [#allocation18] }
 0x17e   : >>> { %v586_v44 = vsel %vm585_vm12, %v577_v43, 0.0  ;;  %v617_v51 = vld [vmem:[%s1850_s29] sm:$0xff] }
 0x17f   : >>> { %587 = vadd.xlane.f32.xlu0 %v586_v44  ;;  %v592_v45 = vld [vmem:[%s591_s15] ss:$0 sm:$0xff]  ;;  %s1865_s15 = smov [#allocation17] }
 0x180   : >>> { %v601_v46 = vsel %vm600_vm13, %v592_v45, 0.0  ;;  %v616_v58 = vld [vmem:[%s1865_s15] sm:$0xff] }
 0x183   : >>> { %602 = vadd.xlane.f32.xlu0 %v601_v46 }
 0x20c   : >>> { %v588_v47 = vpop.xlane.xlu0 %587 }
 0x20d   : >>> { %590 = vst [vmem:[%s589_s17] sm:$0xff] %v588_v47  ;;  %s608_s17 = smov [#allocation27] }
 0x210   : >>> { %v603_v48 = vpop.xlane.xlu0 %602 }
 0x211   : >>> { %605 = vst [vmem:[%s604_s28] sm:$0xff] %v603_v48  ;;  %s1898_s28 = smov [#allocation16] }
 0x214   : >>> { %v607_v54 = vld [vmem:[%s606_s18] sm:$0xff]  ;;  %s1894_s18 = smov [#allocation18] }
 0x215   : >>> { %v831_v55 = vld [vmem:[%s830_s27] sm:$0xff]  ;;  %v618_v59 = vmul.f32 %v614_v49, %v607_v54  ;;  %v621_v60 = vmul.f32 %v615_v50, %v607_v54  ;;  %v628_v61 = vmul.f32 %v617_v51, %v607_v54  ;;  %v625_v4 = vmul.f32 %v616_v58, %v607_v54  ;;  %s636_s27 = smov [#allocation25] }
 0x216   : >>> { %v842_v62 = vmul.f32 %v838_v52, %v831_v55  ;;  %v845_v63 = vmul.f32 %v839_v53, %v831_v55  ;;  %v849_v0 = vmul.f32 %v840_v56, %v831_v55  ;;  %v852_v1 = vmul.f32 %v841_v57, %v831_v55  ;;  %v637_v24 = vld [vmem:[%s636_s27] ss:$0 sm:$0xff]  ;;  %s703_s27 = smov [#allocation18] }
 0x218   : >>> { %v609_v2 = vld [vmem:[%s608_s17] sm:$0xff]  ;;  %s690_s17 = smov [#allocation17] }
 0x219   : >>> { %v833_v3 = vld [vmem:[%s832_s0] sm:$0xff]  ;;  %v622_v7 = vmul.f32 %v617_v51, %v609_v2  ;;  %v624_v8 = vmul.f32 %v614_v49, %v609_v2  ;;  %v627_v9 = vmul.f32 %v615_v50, %v609_v2  ;;  %v619_v14 = vmul.f32 %v616_v58, %v609_v2  ;;  %s634_s0 = smov [#allocation24] }
 0x21a   : >>> { %v843_v10 = vmul.f32 %v840_v56, %v833_v3  ;;  %v846_v11 = vmul.f32 %v841_v57, %v833_v3  ;;  %v848_v12 = vmul.f32 %v838_v52, %v833_v3  ;;  %v851_v13 = vmul.f32 %v839_v53, %v833_v3  ;;  %v635_v23 = vld [vmem:[%s634_s0] ss:$0 sm:$0xff]  ;;  %s662_s0 = smov [#allocation15] }
 0x21b   : >>> { %v623_v15 = vsub.f32 %v621_v60, %v622_v7  ;;  %v629_v16 = vadd.f32 %v628_v61, %v627_v9  ;;  %v626_v18 = vadd.f32 %v625_v4, %v624_v8  ;;  %v620_v22 = vsub.f32 %v618_v59, %v619_v14 }
 0x21c   : >>> { %v844_v17 = vsub.f32 %v842_v62, %v843_v10  ;;  %v847_v19 = vsub.f32 %v845_v63, %v846_v11  ;;  %v850_v20 = vadd.f32 %v849_v0, %v848_v12  ;;  %v853_v21 = vadd.f32 %v852_v1, %v851_v13 }
 0x21d   : >>> { %631 = vst [vmem:[%s1848_s19] sm:$0xff] %v623_v15  ;;  %633 = vst [vmem:[%s1850_s29] sm:$0xff] %v629_v16  ;;  %s1892_s19 = smov [#allocation17]  ;;  %s663_s29 = smov [#allocation22] }
 0x21e   : >>> { %854 = vst [vmem:[%s1853_s16] sm:$0xff] %v844_v17  ;;  %632 = vst [vmem:[%s1865_s15] sm:$0xff] %v626_v18  ;;  %s858_s16 = smov %s1788_s16  ;;  %s704_s15 = smov [#allocation23]  ;;  %v670_v55 = vld [vmem:[%s663_s29] ss:$0 sm:$0xff] }
 0x21f   : >>> { %855 = vst [vmem:[%s1856_s30] sm:$0xff] %v847_v19  ;;  %856 = vst [vmem:[%s1859_s21] sm:$0xff] %v850_v20  ;;  %s859_s21 = smov %s1794_s21  ;;  %s1885_s30 = smov %s1791_s30  ;;  %v711_v56 = vld [vmem:[%s704_s15] ss:$0 sm:$0xff] }
 0x220   : >>> { %857 = vst [vmem:[%s1863_s24] sm:$0xff] %v853_v21  ;;  %630 = vst [vmem:[%s1846_s25] sm:$0xff] %v620_v22  ;;  %s1888_s24 = smov %s1797_s24  ;;  %s1896_s25 = smov [#allocation15] }
 0x221   : >>> { %s719_s29 = smov [#allocation16]  ;;  %s1668_s15 = smov 127  }
 0x224   : >>> { %v645_v39 = vld [vmem:[%s1894_s18] sm:$0xff] }
 0x225   : >>> { %v860_v25 = vld [vmem:[%s858_s16] ss:$0 sm:$0xff]  ;;  %v1433_v27 = vld [vmem:[%s858_s16 + $0x7] ss:$0 sm:$0xff]  ;;  %v653_v42 = vmul.f32 %v645_v39, %v637_v24  ;;  %v656_v46 = vmul.f32 %v645_v39, %v635_v23 }
 0x226   : >>> { %v1432_v26 = vld [vmem:[%s858_s16 - $0x1] sm:$0xfe]  ;;  %v1437_v34 = vld [vmem:[%s1885_s30 + $0x7] ss:$0 sm:$0xff] }
 0x227   : >>> { %v867_v28 = vsel %vm790_vm14, %v860_v25, %v1432_v26  ;;  %v871_v29 = vld [vmem:[%s859_s21] ss:$0 sm:$0xff]  ;;  %v1435_v30 = vld [vmem:[%s859_s21 + $0x1] sm:$0x7f] }
 0x228   : >>> { %v884_v31 = vld [vmem:[%s1885_s30] ss:$0 sm:$0xff]  ;;  %870 = vst [vmem:[%s858_s16] sm:$0xff] %v867_v28  ;;  %v879_v32 = vsel %vm802_vm15, %v1433_v27, %v1435_v30  ;;  %v1439_v37 = vld [vmem:[%s1888_s24 + $0x1] sm:$0x7f] }
 0x229   : >>> { %v1436_v33 = vld [vmem:[%s1885_s30 - $0x1] sm:$0xfe]  ;;  %1434 = vst [vmem:[%s858_s16 + $0x1] sm:$0x1] %v871_v29  ;;  %881 = vst [vmem:[%s859_s21] sm:$0xff] %v879_v32  ;;  %v903_v40 = vsel %vm802_vm15, %v1437_v34, %v1439_v37 }
 0x22a   : >>> { %v895_v35 = vld [vmem:[%s1888_s24] ss:$0 sm:$0xff]  ;;  %v891_v36 = vsel %vm790_vm14, %v884_v31, %v1436_v33 }
 0x22b   : >>> { %v644_v38 = vld [vmem:[%s1892_s19] sm:$0xff]  ;;  %894 = vst [vmem:[%s1885_s30] sm:$0xff] %v891_v36  ;;  %905 = vst [vmem:[%s1888_s24] sm:$0xff] %v903_v40 }
 0x22c   : >>> { %v652_v41 = vmul.f32 %v644_v38, %v635_v23  ;;  %v655_v43 = vmul.f32 %v644_v38, %v637_v24  ;;  %v642_v44 = vld [vmem:[%s1896_s25] sm:$0xff]  ;;  %1438 = vst [vmem:[%s1885_s30 + $0x1] sm:$0x1] %v895_v35 }
 0x22d   : >>> { %v643_v45 = vld [vmem:[%s1898_s28] sm:$0xff]  ;;  %v646_v47 = vmul.f32 %v642_v44, %v635_v23  ;;  %v649_v49 = vmul.f32 %v642_v44, %v637_v24 }
 0x22e   : >>> { %v647_v48 = vmul.f32 %v643_v45, %v637_v24  ;;  %v654_v50 = vsub.f32 %v652_v41, %v653_v42  ;;  %v650_v51 = vmul.f32 %v643_v45, %v635_v23  ;;  %v657_v52 = vadd.f32 %v656_v46, %v655_v43 }
 0x230   : >>> { %v648_v53 = vsub.f32 %v646_v47, %v647_v48  ;;  %660 = vst [vmem:[%s1892_s19] sm:$0xff] %v654_v50  ;;  %v651_v54 = vadd.f32 %v650_v51, %v649_v49  ;;  %661 = vst [vmem:[%s1894_s18] sm:$0xff] %v657_v52  ;;  %s677_s19 = smov [#allocation16]  ;;  %s1932_s18 = smov [#allocation17] }
 0x232   : >>> { %658 = vst [vmem:[%s1896_s25] sm:$0xff] %v648_v53  ;;  %659 = vst [vmem:[%s1898_s28] sm:$0xff] %v651_v54  ;;  %s718_s25 = smov [#allocation15]  ;;  %s1667_s28 = smov 1  }
 0x237   : >>> { %v697_v57 = vld [vmem:[%s690_s17] sm:$0xff] }
 0x238   : >>> { %v701_v58 = vsel %vm700_vm0, 0.0, %v697_v57  ;;  %v712_v60 = vld [vmem:[%s703_s27] sm:$0xff] }
 0x239   : >>> { %v671_v59 = vld [vmem:[%s662_s0] sm:$0xff]  ;;  %702 = vst [vmem:[%s690_s17] sm:$0xff] %v701_v58  ;;  %v716_v63 = vsel %vm715_vm3, %v711_v56, %v712_v60  ;;  %s1935_s17 = smov [#allocation18] }
 0x23a   : >>> { %v675_v61 = vsel %vm674_vm1, %v670_v55, %v671_v59  ;;  %v684_v62 = vld [vmem:[%s677_s19] sm:$0xff]  ;;  %717 = vst [vmem:[%s703_s27] sm:$0xff] %v716_v63  ;;  %s806_s27 = smov [#allocation16] }
 0x23b   : >>> { %676 = vst [vmem:[%s662_s0] sm:$0xff] %v675_v61  ;;  %v688_v0 = vsel %vm687_vm4, 0.0, %v684_v62  ;;  %s782_s0 = smov [#allocation15] }
 0x23c   : >>> { %689 = vst [vmem:[%s677_s19] sm:$0xff] %v688_v0  ;;  %s783_s19 = smov [#allocation17] }
 0x240   : >>> { %v756_v1 = vld [vmem:[%s1932_s18] sm:$0xff] }
 0x241   : >>> { %757 = vrot.lane.b32.xlu0 %v756_v1, %s1667_s28  ;;  %v752_v4 = vld [vmem:[%s1935_s17] sm:$0xff] }
 0x242   : >>> { %v724_v2 = vld [vmem:[%s718_s25] sm:$0xff] }
 0x243   : >>> { %725 = vrot.lane.b32.xlu1 %v724_v2, %s1667_s28  ;;  %v720_v3 = vld [vmem:[%s719_s29] sm:$0xff] }
 0x247   : >>> { %721 = vrot.lane.b32.xlu1 %v720_v3, %s1667_s28 }
 0x24b   : >>> { %742 = vrot.lane.b32.xlu1 %v720_v3, %s1668_s15 }
 0x24f   : >>> { %753 = vrot.lane.b32.xlu1 %v752_v4, %s1667_s28  ;;  %s371_s28 = smov (%p463_p9), [#allocation15] }
 0x253   : >>> { %774 = vrot.lane.b32.xlu1 %v752_v4, %s1668_s15  ;;  %s407_s15 = smov (%p463_p9), [#allocation17] }
 0x2b3   : >>> { %v758_v13 = vpop.permute.xlu0 %757 }
 0x2b4   : >>> { %v762_v15 = vsel %vm729_vm5, %v756_v1, %v758_v13 }
 0x2b5   : >>> { %v726_v7 = vpop.permute.xlu1 %725 }
 0x2b6   : >>> { %v730_v8 = vsel %vm729_vm5, %v724_v2, %v726_v7 }
 0x2b9   : >>> { %v722_v9 = vpop.permute.xlu1 %721 }
 0x2ba   : >>> { %v734_v10 = vsel %vm733_vm6, %v722_v9, %v730_v8 }
 0x2bb   : >>> { %v740_v11 = vsel %vm1293_vm2, %v734_v10, 0.0 }
 0x2bc   : >>> { %748 = vst [vmem:[%s718_s25] sm:$0xff] %v740_v11  ;;  %s807_s25 = smov [#allocation18] }
 0x2bd   : >>> { %v743_v12 = vpop.permute.xlu1 %742 }
 0x2be   : >>> { %v747_v14 = vsel %vm746_vm7, %v724_v2, %v743_v12 }
 0x2bf   : >>> { %749 = vst [vmem:[%s719_s29] sm:$0xff] %v747_v14  ;;  %s390_s29 = smov (%p463_p9), [#allocation16] }
 0x2c1   : >>> { %v754_v16 = vpop.permute.xlu1 %753 }
 0x2c2   : >>> { %v766_v17 = vsel %vm733_vm6, %v754_v16, %v762_v15 }
 0x2c3   : >>> { %v784_v18 = vld [vmem:[%s782_s0] ss:$0 sm:$0xff]  ;;  %v1425_v20 = vld [vmem:[%s782_s0 + $0x7] ss:$0 sm:$0xff]  ;;  %v772_v22 = vsel %vm1293_vm2, %v766_v17, 0.0 }
 0x2c4   : >>> { %v1424_v19 = vld [vmem:[%s782_s0 - $0x1] sm:$0xfe]  ;;  %780 = vst [vmem:[%s1932_s18] sm:$0xff] %v772_v22  ;;  %s906_s18 = sadd.s32 (%p463_p9), 1, %s1660_s26  }
 0x2c5   : >>> { %v791_v21 = vsel %vm790_vm14, %v784_v18, %v1424_v19  ;;  %v775_v23 = vpop.permute.xlu1 %774  ;;  %p459_p10 = scmp.ge.s32.totalorder (%p463_p9), %s906_s18, 15  ;;  %s2121_s26 = smov (%p463_p9), %s906_s18 }
 0x2c6   : >>> { %794 = vst [vmem:[%s782_s0] sm:$0xff] %v791_v21  ;;  %v808_v24 = vld [vmem:[%s806_s27] ss:$0 sm:$0xff]  ;;  %v1429_v26 = vld [vmem:[%s806_s27 + $0x7] ss:$0 sm:$0xff]  ;;  %v779_v27 = vsel %vm746_vm7, %v756_v1, %v775_v23 }
 0x2c7   : >>> { %v1428_v25 = vld [vmem:[%s806_s27 - $0x1] sm:$0xfe]  ;;  %781 = vst [vmem:[%s1935_s17] sm:$0xff] %v779_v27  ;;  %s424_s17 = smov (%p463_p9), [#allocation18] }
 0x2c8   : >>> { %v815_v28 = vsel %vm790_vm14, %v808_v24, %v1428_v25 }
 0x2c9   : >>> { %818 = vst [vmem:[%s806_s27] sm:$0xff] %v815_v28 }
 0x2cb   : >>> { %v795_v29 = vld [vmem:[%s783_s19] ss:$0 sm:$0xff]  ;;  %v1427_v30 = vld [vmem:[%s783_s19 + $0x1] sm:$0x7f] }
 0x2cc   : >>> { %1426 = vst [vmem:[%s782_s0 + $0x1] sm:$0x1] %v795_v29  ;;  %v803_v31 = vsel %vm802_vm15, %v1425_v20, %v1427_v30  ;;  %465 = sbr.rel (!%p463_p9) target bundleno = 284 (0x11c), region = 360 }
 0x2cd   : >>> { %805 = vst [vmem:[%s783_s19] sm:$0xff] %v803_v31 }
 0x2ce   : >>> { %v819_v32 = vld [vmem:[%s807_s25] ss:$0 sm:$0xff]  ;;  %v1431_v33 = vld [vmem:[%s807_s25 + $0x1] sm:$0x7f] }
 0x2cf   : >>> { %1430 = vst [vmem:[%s806_s27 + $0x1] sm:$0x1] %v819_v32  ;;  %v827_v34 = vsel %vm802_vm15, %v1429_v26, %v1431_v33 }
 0x2d0   : >>> { %829 = vst [vmem:[%s807_s25] sm:$0xff] %v827_v34 }
 0x2d3   : >> { %v377_v35 = vld [vmem:[%s371_s28] sm:$0xff] }
 0x2d4   : >> { %v378_v37 = vsel %vm1293_vm2, %v377_v35, 0.0  ;;  %v413_v39 = vld [vmem:[%s407_s15] sm:$0xff] }
 0x2d5   : >> { %v379_v41 = vmul.f32 %v378_v37, %v378_v37  ;;  %v414_v43 = vsel %vm1293_vm2, %v413_v39, 0.0 }
 0x2d6   : >> { %v396_v36 = vld [vmem:[%s390_s29] sm:$0xff]  ;;  %v415_v45 = vmul.f32 %v414_v43, %v414_v43 }
 0x2d7   : >> { %v397_v38 = vsel %vm1293_vm2, %v396_v36, 0.0  ;;  %v430_v40 = vld [vmem:[%s424_s17] sm:$0xff]  ;;  %v383_v48 = vsel %vm382_vm8, 0.0, %v379_v41 }
 0x2d8   : >> { %v398_v42 = vmul.f32 %v397_v38, %v397_v38  ;;  %v431_v44 = vsel %vm1293_vm2, %v430_v40, 0.0 }
 0x2d9   : >> { %v432_v47 = vmul.f32 %v431_v44, %v431_v44 }
 0x2da   : >> { %v400_v46 = vadd.f32 %v398_v42, %v379_v41  ;;  %v399_v49 = vadd.f32 %v398_v42, %v383_v48 }
 0x2db   : >> { %v436_v52 = vsel %vm435_vm9, 0.0, %v432_v47 }
 0x2dc   : >> { %v417_v50 = vadd.f32 %v415_v45, %v400_v46  ;;  %v416_v51 = vadd.f32 %v415_v45, %v399_v49 }
 0x2de   : >> { %v438_v53 = vadd.f32 %v432_v47, %v417_v50  ;;  %v437_v54 = vadd.f32 %v436_v52, %v416_v51 }
 0x2e0   : >> { %439 = vadd.xlane.f32.xlu0 %v438_v53 }
 0x2e4   : >> { %447 = vadd.xlane.f32.xlu0 %v437_v54 }
 0x36d   : >> { %v440_v55 = vpop.xlane.xlu0 %439 }
 0x36e   : >> { %v441_v56 = vrot.slane %v440_v55, 4 }
 0x370   : >> { %v442_v57 = vadd.f32 %v441_v56, %v440_v55 }
 0x371   : >> { %v448_v58 = vpop.xlane.xlu0 %447 }
 0x372   : >> { %v443_v59 = vrot.slane %v442_v57, 2  ;;  %v449_v60 = vrot.slane %v448_v58, 4 }
 0x374   : >> { %v450_v61 = vadd.f32 %v449_v60, %v448_v58  ;;  %v444_v62 = vadd.f32 %v443_v59, %v442_v57 }
 0x376   : >> { %v451_v63 = vrot.slane %v450_v61, 2  ;;  %v445_v1 = vrot.slane %v444_v62, 1 }
 0x378   : >> { %v452_v0 = vadd.f32 %v451_v63, %v450_v61  ;;  %v446_v4 = vadd.f32 %v445_v1, %v444_v62 }
 0x37a   : >> { %v453_v2 = vrot.slane %v452_v0, 1 }
 0x37c   : >> { %v454_v3 = vadd.f32 %v453_v2, %v452_v0 }
 0x37e   : >> { %1458 = vpush %v454_v3 }
 0x37f   : >> { %1460 = vpush %v446_v4 }
 0x3af   : >> { %s1459_s23 = spop %1458 }
 0x3b0   : >> { %s1461_s0 = spop %1460 }
 0x3b1   : >> { %s457_s27 = smul.f32 1e-10, %s1461_s0 }
 0x3b3   : >> { %p458_p11 = scmp.le.f32.partialorder %s1459_s23, %s457_s27 }
 0x3b5   : >> { %p460_p12 = por %p459_p10, %p458_p11 }
 0x3b7   : > { %908 = sbr.rel (!%p460_p12) target bundleno = 283 (0x11b), region = 371 }
 0x3be PF: > { %s913_s19 = smov [#allocation15]  ;;  %v917_v5 = vmov %v1784_v5  ;;  %v920_v6 = vmov %v1786_v6  ;;  %s933_s25 = smov [#allocation18] }
 0x3bf   : > { %v937_v5 = vmov %v1784_v5  ;;  %v940_v6 = vmov %v1786_v6  ;;  %v921_v7 = vld [vmem:[%s913_s19] sm:$0xff]  ;;  %vm924_vm10 = vcmp.eq.s32.totalorder %v920_v6, %v917_v5  ;;  %s909_s26 = sand.u32 7, %s1739_s12   ;;  %s2122_s29 = scalar_lea.vmem [#allocation5], %s1782_s22 }
 0x3c0   : > { %vm944_vm11 = vcmp.eq.s32.totalorder %v940_v6, %v937_v5  ;;  %v925_v8 = vsel %vm924_vm10, %v921_v7, 0.0  ;;  %v941_v10 = vld [vmem:[%s933_s25] sm:$0xff]  ;;  %s910_s18 = scalar_lea.vmem [#allocation4], %s909_s26  ;;  %s912_s28 = scalar_lea.vmem [#allocation6], %s909_s26 }
 0x3c1   : > { %v926_v9 = vrot.slane %v925_v8, 4  ;;  %v945_v11 = vsel %vm944_vm11, %v941_v10, 0.0  ;;  %s914_s18 = smov %s910_s18  ;;  %s934_s28 = smov %s912_s28 }
 0x3c2   : > { %v946_v13 = vrot.slane %v945_v11, 4  ;;  %s2123_s15 = scalar_lea.vmem [#allocation7], %s1782_s22  ;;  %s996_s27 = sshrl.u32 (%p1754_p3), %s1739_s12, 3 }
 0x3c3   : > { %v927_v12 = vadd.f32 %v926_v9, %v925_v8  ;;  %s2124_s19 = scalar_lea.vmem (%p1754_p3), [#allocation5], %s1782_s22  ;;  %s1446_s25 = sshll.u32 (%p1754_p3), %s996_s27, 1 }
 0x3c4   : > { %v947_v15 = vadd.f32 %v946_v13, %v945_v11 }
 0x3c5   : > { %v928_v14 = vrot.slane %v927_v12, 2 }
 0x3c6   : > { %v948_v17 = vrot.slane %v947_v15, 2 }
 0x3c7   : > { %v929_v16 = vadd.f32 %v928_v14, %v927_v12 }
 0x3c8   : > { %v949_v19 = vadd.f32 %v948_v17, %v947_v15 }
 0x3c9   : > { %v930_v18 = vrot.slane %v929_v16, 1 }
 0x3ca   : > { %v950_v6 = vrot.slane %v949_v19, 1 }
 0x3cb   : > { %v931_v5 = vadd.f32 %v930_v18, %v929_v16 }
 0x3cc   : > { %v951_v20 = vadd.f32 %v950_v6, %v949_v19 }
 0x3cd   : > { %932 = vst [vmem:[%s914_s18] sm:$0x1] %v931_v5 }
 0x3ce   : > { %952 = vst [vmem:[%s934_s28] sm:$0x1] %v951_v20  ;;  %s998_s28 = scalar_lea.vmem (%p1754_p3), %s2111_s4, %s1446_s25 }
 0x3d0   : > { %995 = sbr.rel (!%p1754_p3) target bundleno = 990 (0x3de), region = 174 }
 0x3d4   : > { %v956_v21 = vld [vmem:[#allocation4] sm:$0x3] }
 0x3d5   : > { %958 = vst [vmem:[%s2122_s29] sm:$0x3] %v956_v21  ;;  %v962_v22 = vld [vmem:[#allocation6] sm:$0x3] }
 0x3d6   : > { %964 = vst [vmem:[%s2123_s15] sm:$0x3] %v962_v22 }
 0x3dc   : > { %v1014_v23 = vld [vmem:[%s2124_s19] sm:$0x3] }
 0x3dd   : > { %1015 = vst [vmem:[%s998_s28] sm:$0x3] %v1014_v23 }
 0x3de PF: > { %1032 = sbr.rel (!%p1754_p3) target bundleno = 998 (0x3e6), region = 208  ;;  %s1033_s29 = sshrl.u32 (%p1754_p3), %s1739_s12, 3 }
 0x3df   : > { %s2125_s15 = scalar_lea.vmem (%p1754_p3), [#allocation7], %s1782_s22  ;;  %s1447_s0 = sshll.u32 (%p1754_p3), %s1033_s29, 1 }
 0x3e0   : > { %s1035_s19 = scalar_lea.vmem (%p1754_p3), %s2112_s5, %s1447_s0 }
 0x3e4   : > { %v1051_v24 = vld [vmem:[%s2125_s15] sm:$0x3] (%p1754_p3) }
 0x3e5   : > { %1052 = vst [vmem:[%s1035_s19] sm:$0x3] %v1051_v24 }
 0x3e6 PF: > { %s2015_s27 = sshll.u32 %s1739_s12, 7  ;;  %s1083_s25 = sshll.u32 %s1791_s30, 4  ;;  %s1084_s25 = int_to_ptr.vmem [resolvable:$true] %s1083_s25 }
 0x3e7   : > { %s1081_s18 = scalar_lea.hbm %s2114_s7, %s2015_s27  ;;  %s1518_s22 = scalar_lea.vmem %s1084_s25, 128 }
 0x3e8   : > { %p1519_p13 = scmp.ne.s32.totalorder %s1084_s25, %s1518_s22  ;;  %s1669_s28 = smov [#allocation10]  }
 0x3e9   : > { %s1520_s29 = sshll.u32 %s1669_s28, 4  ;;  %s1521_s29 = int_to_ptr.vmem [resolvable:$false] %s1520_s29 }
 0x3ea   : > { %s1522_s17 = scalar_lea.vmem %s1521_s29, 256  ;;  %p1523_p0 = scmp.lt.s32.totalorder %s1084_s25, %s1521_s29 }
 0x3eb   : > { %p1524_p1 = scmp.lt.s32.totalorder %s1522_s17, %s1518_s22 }
 0x3ed   : > { %p1525_p2 = por %p1524_p1, %p1523_p0 }
 0x3ef   : > { %p1526_p3 = pnand %p1525_p2, %p1519_p13 }
 0x3f1   : > { %1529 = shalt.err (!%p1526_p3)
}
 0x3f2   : > { %s1530_s12 = scalar_lea.hbm %s1081_s18, 128  ;;  %s1532_s0 = scalar_lea.hbm %s2114_s7, 256 }
 0x3f3   : > { %p1531_p5 = scmp.ne.s32.totalorder %s1081_s18, %s1530_s12  ;;  %p1533_p6 = scmp.lt.u32.totalorder %s1081_s18, %s2114_s7 }
 0x3f4   : > { %p1534_p7 = scmp.lt.u32.totalorder %s1532_s0, %s1530_s12  ;;  %p1536_p9 = scmp.lt.u32.totalorder %s1530_s12, %s1081_s18 }
 0x3f6   : > { %p1535_p8 = por %p1534_p7, %p1533_p6 }
 0x3f8   : > { %p1537_p10 = por %p1536_p9, %p1535_p8 }
 0x3fa   : > { %p1538_p11 = pnand %p1537_p10, %p1531_p5 }
 0x3fc   : > { %1541 = shalt.err (!%p1538_p11)
}
 0x3fd   : > { %s2126_s20 = scalar_lea.sflag [#allocation11], %s1778_s13  ;;  %s1071_s28 = scalar_lea.hbm %s2113_s6, %s2015_s27 }
 0x3fe   : > { %1086 = dma.vmem_to_hbm [thread:$0]  %s1084_s25, 128, %s1081_s18, %s2126_s20  }
 0x3ff   : > { %s1073_s29 = sshll.u32 %s1788_s16, 4  ;;  %s2039_s30 = scalar_lea.hbm %s2115_s8, %s2015_s27  ;;  %s1074_s29 = int_to_ptr.vmem [resolvable:$true] %s1073_s29 }
 0x400   : > { %s1542_s12 = scalar_lea.vmem %s1074_s29, 128  ;;  %s1670_s0 = smov [#allocation8]  }
 0x401   : > { %p1543_p12 = scmp.ne.s32.totalorder %s1074_s29, %s1542_s12  ;;  %s1544_s15 = sshll.u32 %s1670_s0, 4  ;;  %s1545_s15 = int_to_ptr.vmem [resolvable:$false] %s1544_s15 }
 0x402   : > { %s1546_s19 = scalar_lea.vmem %s1545_s15, 256  ;;  %p1547_p13 = scmp.lt.s32.totalorder %s1074_s29, %s1545_s15 }
 0x403   : > { %p1548_p0 = scmp.lt.s32.totalorder %s1546_s19, %s1542_s12 }
 0x405   : > { %p1549_p1 = por %p1548_p0, %p1547_p13 }
 0x407   : > { %p1550_p2 = pnand %p1549_p1, %p1543_p12 }
 0x409   : > { %1553 = shalt.err (!%p1550_p2)
}
 0x40a   : > { %s1554_s25 = scalar_lea.hbm %s1071_s28, 128  ;;  %s1556_s20 = scalar_lea.hbm %s2113_s6, 256 }
 0x40b   : > { %p1555_p3 = scmp.ne.s32.totalorder %s1071_s28, %s1554_s25  ;;  %p1557_p5 = scmp.lt.u32.totalorder %s1071_s28, %s2113_s6 }
 0x40c   : > { %p1558_p6 = scmp.lt.u32.totalorder %s1556_s20, %s1554_s25  ;;  %p1560_p8 = scmp.lt.u32.totalorder %s1554_s25, %s1071_s28 }
 0x40e   : > { %p1559_p7 = por %p1558_p6, %p1557_p5 }
 0x410   : > { %p1561_p9 = por %p1560_p8, %p1559_p7 }
 0x412   : > { %p1562_p10 = pnand %p1561_p9, %p1555_p3 }
 0x414   : > { %1565 = shalt.err (!%p1562_p10)
}
 0x415   : > { %s2127_s17 = scalar_lea.sflag [#allocation9], %s1778_s13  ;;  %s1093_s23 = sshll.u32 %s1794_s21, 4  ;;  %s1094_s23 = int_to_ptr.vmem [resolvable:$true] %s1093_s23 }
 0x416   : > { %1076 = dma.vmem_to_hbm [thread:$0]  %s1074_s29, 128, %s1071_s28, %s2127_s17  }
 0x417   : > { %s2054_s15 = scalar_lea.hbm %s2116_s9, %s2015_s27  ;;  %s1103_s19 = sshll.u32 %s1797_s24, 4  ;;  %s1104_s19 = int_to_ptr.vmem [resolvable:$true] %s1103_s19 }
 0x418   : > { %s1566_s16 = scalar_lea.vmem %s1094_s23, 128  ;;  %s1671_s25 = smov [#allocation12]  }
 0x419   : > { %p1567_p11 = scmp.ne.s32.totalorder %s1094_s23, %s1566_s16  ;;  %s1568_s18 = sshll.u32 %s1671_s25, 4  ;;  %s1569_s18 = int_to_ptr.vmem [resolvable:$false] %s1568_s18 }
 0x41a   : > { %s1570_s20 = scalar_lea.vmem %s1569_s18, 256  ;;  %p1571_p12 = scmp.lt.s32.totalorder %s1094_s23, %s1569_s18 }
 0x41b   : > { %p1572_p13 = scmp.lt.s32.totalorder %s1570_s20, %s1566_s16 }
 0x41d   : > { %p1573_p0 = por %p1572_p13, %p1571_p12 }
 0x41f   : > { %p1574_p1 = pnand %p1573_p0, %p1567_p11 }
 0x421   : > { %1577 = shalt.err (!%p1574_p1)
}
 0x422   : > { %s1578_s21 = scalar_lea.hbm %s2039_s30, 128  ;;  %s1580_s24 = scalar_lea.hbm %s2115_s8, 256 }
 0x423   : > { %p1579_p2 = scmp.ne.s32.totalorder %s2039_s30, %s1578_s21  ;;  %p1581_p3 = scmp.lt.u32.totalorder %s2039_s30, %s2115_s8 }
 0x424   : > { %p1582_p5 = scmp.lt.u32.totalorder %s1580_s24, %s1578_s21  ;;  %p1584_p7 = scmp.lt.u32.totalorder %s1578_s21, %s2039_s30 }
 0x426   : > { %p1583_p6 = por %p1582_p5, %p1581_p3 }
 0x428   : > { %p1585_p8 = por %p1584_p7, %p1583_p6 }
 0x42a   : > { %p1586_p9 = pnand %p1585_p8, %p1579_p2 }
 0x42c   : > { %1589 = shalt.err (!%p1586_p9)
}
 0x42d   : > { %s2128_s22 = scalar_lea.sflag [#allocation11], %s1778_s13  ;;  %s1590_s17 = scalar_lea.vmem %s1104_s19, 128 }
 0x42e   : > { %1096 = dma.vmem_to_hbm [thread:$0]  %s1094_s23, 128, %s2039_s30, %s2128_s22  }
 0x42f   : > { %p1591_p10 = scmp.ne.s32.totalorder %s1104_s19, %s1590_s17  ;;  %s1672_s12 = smov [#allocation13]  }
 0x430   : > { %s1592_s0 = sshll.u32 %s1672_s12, 4  ;;  %s1593_s0 = int_to_ptr.vmem [resolvable:$false] %s1592_s0 }
 0x431   : > { %s1594_s16 = scalar_lea.vmem %s1593_s0, 256  ;;  %p1595_p11 = scmp.lt.s32.totalorder %s1104_s19, %s1593_s0 }
 0x432   : > { %p1596_p12 = scmp.lt.s32.totalorder %s1594_s16, %s1590_s17 }
 0x434   : > { %p1597_p13 = por %p1596_p12, %p1595_p11 }
 0x436   : > { %p1598_p0 = pnand %p1597_p13, %p1591_p10 }
 0x438   : > { %1601 = shalt.err (!%p1598_p0)
}
 0x439   : > { %s1602_s25 = scalar_lea.hbm %s2054_s15, 128  ;;  %s1604_s23 = scalar_lea.hbm %s2116_s9, 256 }
 0x43a   : > { %p1603_p1 = scmp.ne.s32.totalorder %s2054_s15, %s1602_s25  ;;  %p1605_p2 = scmp.lt.u32.totalorder %s2054_s15, %s2116_s9 }
 0x43b   : > { %p1606_p3 = scmp.lt.u32.totalorder %s1604_s23, %s1602_s25  ;;  %p1608_p6 = scmp.lt.u32.totalorder %s1602_s25, %s2054_s15 }
 0x43d   : > { %p1607_p5 = por %p1606_p3, %p1605_p2 }
 0x43f   : > { %p1609_p7 = por %p1608_p6, %p1607_p5 }
 0x441   : > { %p1610_p8 = pnand %p1609_p7, %p1603_p1 }
 0x443   : > { %1613 = shalt.err (!%p1610_p8)
}
 0x444   : > { %s2129_s27 = scalar_lea.sflag [#allocation14], %s1778_s13 }
 0x445   : > { %1106 = dma.vmem_to_hbm [thread:$0]  %s1104_s19, 128, %s2054_s15, %s2129_s27  }
 0x446 PF: > { %s2130_s28 = sadd.s32 4294967294, %s1656_s11  }
 0x447   : > { %s1126_s24 = sand.u32 1, %s2130_s28  }
 0x448   : > { %s1127_s29 = scalar_lea.sflag [#allocation9], %s1126_s24 }
 0x449   : > { %1635 = dma.done.wait (%p1404_p4), %s1127_s29, 128  }
 0x44a   : > { %1637 = vsyncadd (%p1404_p4), %s1127_s29, 4294967168  ;;  %s1133_s26 = scalar_lea.sflag [#allocation11], %s1126_s24 }
 0x44b   : > { %1639 = dma.done.wait (%p1404_p4), %s1133_s26, 256  }
 0x44c   : > { %1641 = vsyncadd (%p1404_p4), %s1133_s26, 4294967040  ;;  %s1145_s13 = scalar_lea.sflag [#allocation14], %s1126_s24 }
 0x44d   : > { %1643 = dma.done.wait (%p1404_p4), %s1145_s13, 128  }
 0x44e   : > { %1645 = vsyncadd (%p1404_p4), %s1145_s13, 4294967168  ;;  %s2131_s15 = sld [smem:[#allocation31_spill]]  ;;  %p22_p9 = scmp.ge.s32.totalorder %s1743_s14, 4  }
 0x44f   : > { %s2132_s30 = smov %s1652_s10  ;;  %s2134_s11 = smov %s1743_s14 }
 0x450   :  { %24 = sbr.rel (!%p22_p9) target bundleno = 9 (0x9), region = 382 }
 0x454   : > { %s2133_s10 = smov %s2131_s15 }
 0x457   :  { %1150 = vsyncpa [#allocation9], 1 }
 0x458   :  { %1152 = vsyncpa [#allocation9 + $0x1], 1 }
 0x459   :  { %1153 = vsyncpa [#allocation11], 1 }
 0x45a   :  { %1155 = vsyncpa [#allocation11 + $0x1], 1 }
 0x45b   :  { %1156 = vsyncpa [#allocation14], 1 }
 0x45c   :  { %1158 = vsyncpa [#allocation14 + $0x1], 1 }

// kernel: custom-call.7
= control target key start
LH: loop header
LB: loop body
LE: loop exit
PB: predicated region body
PF: predicated region fallthrough
CT: control target
= control target key end

     0   :  { %s2278_s0 = inlined_call_operand.vmem [shape: f32[2,2,8,8], index: 0, kind: input, shape index: {}]   ;;  %s2279_s1 = inlined_call_operand.vmem [shape: f32[2,2,8,8], index: 1, kind: input, shape index: {}]   ;;  %s2280_s2 = inlined_call_operand.vmem [shape: f32[2,2,8,8], index: 2, kind: input, shape index: {}]   ;;  %s2281_s3 = inlined_call_operand.vmem [shape: f32[2,2,8,8], index: 3, kind: input, shape index: {}]   ;;  %s2282_s4 = inlined_call_operand.vmem [shape: f32[2,2,8], index: 4, kind: output, shape index: {0}]   ;;  %s2283_s5 = inlined_call_operand.vmem [shape: f32[2,2,8], index: 5, kind: output, shape index: {1}]   ;;  %s2284_s6 = inlined_call_operand.hbm [shape: f32[2,2,8,8], index: 6, kind: output, shape index: {2}]   ;;  %s2285_s7 = inlined_call_operand.hbm [shape: f32[2,2,8,8], index: 7, kind: output, shape index: {3}]   ;;  %s2286_s8 = inlined_call_operand.hbm [shape: f32[2,2,8,8], index: 8, kind: output, shape index: {4}]   ;;  %s2287_s9 = inlined_call_operand.hbm [shape: f32[2,2,8,8], index: 9, kind: output, shape index: {5}]  }
   0x1   :  { %2294 = sst [smem:[#allocation36_spill]] %s2287_s9 }
   0x2   :  { %11 = vsyncpa [#allocation9], 0 }
   0x3   :  { %13 = vsyncpa [#allocation9 + $0x1], 0 }
   0x4   :  { %14 = vsyncpa [#allocation11], 0 }
   0x5   :  { %16 = vsyncpa [#allocation11 + $0x1], 0 }
   0x6   :  { %17 = vsyncpa [#allocation14], 0 }
   0x7   :  { %19 = vsyncpa [#allocation14 + $0x1], 0  ;;  %s1859_s30 = smov 0   ;;  %s1861_s10 = smov 0  }
   0x8   :  { %s1863_s11 = smov 0   ;;  %s1865_s12 = smov 0  }
   0x9   :  { %s1867_s13 = smov 0   ;;  %s1869_s14 = smov 0  }
   0xa   :  { %s1871_s15 = smov 0  }
   0xb LB: > { %2295 = sst [smem:[#allocation31_spill]] %s1772_s10  ;;  %s2288_s17 = sadd.s32 4294967295, %s1792_s15   ;;  %s1792_s15 = sphi %s1871_s15, %s25_s15   ;;  %s1788_s14 = sphi %s1869_s14, %s2318_s14   ;;  %s1784_s13 = sphi %s1867_s13, %s2320_s13   ;;  %s1780_s12 = sphi %s1865_s12, %s2316_s12   ;;  %s1776_s11 = sphi %s1863_s11, %s2319_s11   ;;  %s1772_s10 = sphi %s1861_s10, %s2315_s10   ;;  %s1768_s30 = sphi %s1859_s30, %s2314_s30  }
   0xc   : > { %2296 = sst [smem:[#allocation32_spill]] %s1788_s14  ;;  %s34_s18 = sadd.s32 1, %s1784_s13 }
   0xd   : > { %p35_p0 = scmp.ge.s32.totalorder %s34_s18, 2  ;;  %s37_s19 = sadd.s32 1, %s1788_s14 }
   0xe   : > { %s41_s20 = sshrl.u32 %s1784_s13, 3  ;;  %p58_p1 = scmp.ne.s32.totalorder %s1772_s10, %s1768_s30 }
   0xf   : > { %s2322_s18 = smov (%p35_p0, %s34_s18), 0  ;;  %s2324_s19 = smov (!%p35_p0, %s37_s19), %s1788_s14 }
  0x10   : > { %2297 = sst [smem:[#allocation33_spill]] %s2322_s18  ;;  %s42_s21 = sshrl.u32 %s2322_s18, 3 }
  0x11   : > { %p59_p2 = scmp.eq.s32.totalorder %s2288_s17, 3  ;;  %p39_p3 = scmp.ge.s32.totalorder %s2324_s19, 2 }
  0x12   : > { %s44_s22 = ssub.s32 %s41_s20, %s42_s21  ;;  %s48_s26 = sadd.s32 1, %s1772_s10 }
  0x13   : > { %p1907_p4 = por %p59_p2, %p58_p1  ;;  %s2326_s19 = smov (%p39_p3, %s2324_s19), 0 }
  0x14   : > { %2299 = sst [smem:[#allocation34_spill]] %s2326_s19  ;;  %s43_s24 = ssub.s32 %s1788_s14, %s2326_s19 }
  0x15   : > { %s45_s25 = sor.u32 %s44_s22, %s43_s24  ;;  %p1468_p6 = scmp.ge.s32.totalorder %s1792_s15, 4 }
  0x16   : > { %p46_p5 = scmp.eq.s32.totalorder %s45_s25, 0  ;;  %s113_s28 = sand.u32 (!%p1468_p6), 1, %s1792_s15  }
  0x17   : > { %111 = sbr.rel (%p1468_p6) target bundleno = 33 (0x21), region = 16  ;;  %s1470_s29 = sshll.u32 (!%p1468_p6), %s1788_s14, 1 }
  0x18   : > { %s1917_s27 = scalar_select %p46_p5, %s1772_s10, %s48_s26  }
  0x19   : > { %s1469_s20 = sshll.u32 (!%p1468_p6), %s113_s28, 3  ;;  %s117_s21 = sadd.s32 (!%p1468_p6), %s1784_s13, %s1470_s29 }
  0x1a   : > { %2300 = sst [smem:[#allocation35_spill]] %s1917_s27  ;;  %s1471_s16 = sshll.u32 (!%p1468_p6), %s117_s21, 3 }
  0x1b   : > { %s119_s19 = scalar_lea.vmem (!%p1468_p6), %s2278_s0, %s1471_s16  ;;  %s159_s25 = scalar_lea.vmem (!%p1468_p6), %s2279_s1, %s1471_s16 }
  0x1c   : > { %v147_v0 = vld [vmem:[%s119_s19] sm:$0xff] (!%p1468_p6)  ;;  %s115_s26 = scalar_lea.vmem (!%p1468_p6), [#allocation0], %s1469_s20  ;;  %s199_s9 = scalar_lea.vmem (!%p1468_p6), %s2280_s2, %s1471_s16 }
  0x1d   : > { %148 = vst [vmem:[%s115_s26] sm:$0xff] (!%p1468_p6), %v147_v0  ;;  %v187_v1 = vld [vmem:[%s159_s25] sm:$0xff] (!%p1468_p6)  ;;  %s155_s14 = scalar_lea.vmem (!%p1468_p6), [#allocation1], %s1469_s20  ;;  %s239_s17 = scalar_lea.vmem (!%p1468_p6), %s2281_s3, %s1471_s16 }
  0x1e   : > { %188 = vst [vmem:[%s155_s14] sm:$0xff] %v187_v1  ;;  %v227_v2 = vld [vmem:[%s199_s9] sm:$0xff]  ;;  %s195_s18 = scalar_lea.vmem [#allocation2], %s1469_s20  ;;  %s235_s19 = scalar_lea.vmem [#allocation3], %s1469_s20 }
  0x1f   : > { %228 = vst [vmem:[%s195_s18] sm:$0xff] %v227_v2  ;;  %v267_v3 = vld [vmem:[%s239_s17] sm:$0xff] }
  0x20   : > { %268 = vst [vmem:[%s235_s19] sm:$0xff] %v267_v3 }
  0x21 PF: > { %p1481_p7 = scmp.ge.s32.totalorder %s1792_s15, 1  ;;  %p273_p8 = scmp.lt.s32.totalorder %s1792_s15, 5 }
  0x23   : > { %p274_p9 = pnand %p1481_p7, %p273_p8 }
  0x25   : > { %277 = sbr.rel (%p274_p9) target bundleno = 1101 (0x44d), region = 156 }
  0x2c   : > { %s2301_s10 = sadd.s32 4294967295, %s1792_s15   ;;  %s314_s14 = sand.u32 1, %s1768_s30   ;;  %v362_v4 = vlaneseq  ;;  %v1802_v11 = vmov 0.0  }
  0x2d   : > { %s1939_s9 = sand.u32 1, %s2301_s10   ;;  %s1943_s27 = sshll.u32 %s314_s14, 1 }
  0x2e   : > { %s1482_s16 = sshll.u32 %s1939_s9, 3  ;;  %v1945_v5 = vand.u32 127, %v362_v4  ;;  %v1947_v6 = vshrl.u32 %v362_v4, 7  ;;  %s345_s26 = smov [#allocation15] }
  0x2f   : > { %s282_s20 = scalar_lea.vmem [#allocation0], %s1482_s16  ;;  %s286_s21 = scalar_lea.vmem [#allocation1], %s1482_s16 }
  0x30   : > { %v346_v7 = vld [vmem:[%s282_s20] sm:$0xff]  ;;  %v349_v8 = vld [vmem:[%s286_s21] sm:$0xff]  ;;  %s290_s22 = scalar_lea.vmem [#allocation2], %s1482_s16  ;;  %s294_s24 = scalar_lea.vmem [#allocation3], %s1482_s16  ;;  %v364_v5 = vmov %v1945_v5  ;;  %v367_v6 = vmov %v1947_v6  ;;  %vm1345_vm2 = vcmp.lt.s32.totalorder %v1945_v5, 8 }
  0x31   : > { %v352_v9 = vld [vmem:[%s290_s22] sm:$0xff]  ;;  %v355_v10 = vld [vmem:[%s294_s24] sm:$0xff]  ;;  %s1949_s25 = scalar_lea.vmem [#allocation8], %s1482_s16  ;;  %s1952_s30 = scalar_lea.vmem [#allocation10], %s1482_s16  ;;  %347 = vst [vmem:[%s345_s26] sm:$0xff] %v346_v7  ;;  %v377_v5 = vmov %v1945_v5  ;;  %v380_v6 = vmov %v1947_v6  ;;  %vm371_vm0 = vcmp.eq.s32.totalorder %v367_v6, %v364_v5 }
  0x32   : > { %357 = vst [vmem:[%s1949_s25] sm:$0xff] %v1802_v11  ;;  %358 = vst [vmem:[%s1952_s30] sm:$0xff] %v1802_v11  ;;  %s348_s28 = smov [#allocation16]  ;;  %s1955_s29 = scalar_lea.vmem [#allocation12], %s1482_s16  ;;  %vm384_vm1 = vcmp.eq.s32.totalorder %v380_v6, %v377_v5  ;;  %v1337_v5 = vmov %v1945_v5  ;;  %v1340_v6 = vmov %v1947_v6 }
  0x33   : > { %359 = vst [vmem:[%s1955_s29] sm:$0xff] %v1802_v11  ;;  %s1958_s17 = scalar_lea.vmem [#allocation13], %s1482_s16  ;;  %350 = vst [vmem:[%s348_s28] sm:$0xff] %v349_v8  ;;  %s351_s18 = smov [#allocation17]  ;;  %vm1350_vm3 = vcmp.eq.s32.totalorder %v1340_v6, %v1337_v5  ;;  %v1388_v5 = vmov %v1945_v5  ;;  %v1357_v6 = vmov %v1947_v6 }
  0x34   : > { %360 = vst [vmem:[%s1958_s17] sm:$0xff] %v1802_v11  ;;  %s354_s19 = smov [#allocation18]  ;;  %353 = vst [vmem:[%s351_s18] sm:$0xff] %v352_v9  ;;  %s361_s25 = smov %s1949_s25  ;;  %v1354_v5 = vmov %v1945_v5  ;;  %v1391_v6 = vmov %v1947_v6 }
  0x35   : > { %356 = vst [vmem:[%s354_s19] sm:$0xff] %v355_v10  ;;  %s374_s17 = smov %s1958_s17  ;;  %s1341_s16 = smov [#allocation15]  ;;  %v1371_v5 = vmov %v1945_v5  ;;  %v1374_v6 = vmov %v1947_v6  ;;  %vm1401_vm4 = vcmp.eq.s32.totalorder %v1391_v6, %v1388_v5 }
  0x36   : > { %s1358_s20 = smov [#allocation16]  ;;  %s1375_s21 = smov [#allocation17] }
  0x37   : > { %s1392_s22 = smov [#allocation18] }
  0x38   : > { %v1347_v16 = vld [vmem:[%s1341_s16] sm:$0xff] }
  0x39   : > { %v368_v12 = vld [vmem:[%s361_s25] sm:$0xff]  ;;  %v1348_v18 = vsel %vm1345_vm2, %v1347_v16, 0.0 }
  0x3a   : > { %v372_v13 = vsel %vm371_vm0, 1.0, %v368_v12  ;;  %v1364_v17 = vld [vmem:[%s1358_s20] sm:$0xff]  ;;  %v1349_v22 = vmul.f32 %v1348_v18, %v1348_v18 }
  0x3b   : > { %v381_v14 = vld [vmem:[%s374_s17] sm:$0xff]  ;;  %373 = vst [vmem:[%s361_s25] sm:$0xff] %v372_v13  ;;  %v1365_v19 = vsel %vm1345_vm2, %v1364_v17, 0.0 }
  0x3c   : > { %v385_v15 = vsel %vm384_vm1, 1.0, %v381_v14  ;;  %v1381_v20 = vld [vmem:[%s1375_s21] sm:$0xff]  ;;  %v1366_v23 = vmul.f32 %v1365_v19, %v1365_v19  ;;  %v1351_v29 = vsel %vm1350_vm3, 0.0, %v1349_v22 }
  0x3d   : > { %386 = vst [vmem:[%s374_s17] sm:$0xff] %v385_v15  ;;  %v1398_v21 = vld [vmem:[%s1392_s22] sm:$0xff]  ;;  %v1382_v24 = vsel %vm1345_vm2, %v1381_v20, 0.0 }
  0x3e   : > { %v1399_v25 = vsel %vm1345_vm2, %v1398_v21, 0.0  ;;  %v1383_v26 = vmul.f32 %v1382_v24, %v1382_v24  ;;  %v1368_v27 = vadd.f32 %v1366_v23, %v1349_v22  ;;  %v1367_v30 = vadd.f32 %v1366_v23, %v1351_v29 }
  0x3f   : > { %v1400_v28 = vmul.f32 %v1399_v25, %v1399_v25 }
  0x40   : > { %v1385_v31 = vadd.f32 %v1383_v26, %v1368_v27  ;;  %v1384_v32 = vadd.f32 %v1383_v26, %v1367_v30 }
  0x41   : > { %v1402_v33 = vsel %vm1401_vm4, 0.0, %v1400_v28 }
  0x42   : > { %v1404_v34 = vadd.f32 %v1400_v28, %v1385_v31  ;;  %v1403_v35 = vadd.f32 %v1402_v33, %v1384_v32 }
  0x44   : > { %1405 = vadd.xlane.f32.xlu0 %v1404_v34 }
  0x48   : > { %1413 = vadd.xlane.f32.xlu0 %v1403_v35 }
  0xd1   : > { %v1406_v36 = vpop.xlane.xlu0 %1405 }
  0xd2   : > { %v1407_v37 = vrot.slane %v1406_v36, 4 }
  0xd4   : > { %v1408_v38 = vadd.f32 %v1407_v37, %v1406_v36 }
  0xd5   : > { %v1414_v39 = vpop.xlane.xlu0 %1413 }
  0xd6   : > { %v1409_v40 = vrot.slane %v1408_v38, 2  ;;  %v1415_v41 = vrot.slane %v1414_v39, 4 }
  0xd8   : > { %v1416_v42 = vadd.f32 %v1415_v41, %v1414_v39  ;;  %v1410_v43 = vadd.f32 %v1409_v40, %v1408_v38 }
  0xda   : > { %v1417_v44 = vrot.slane %v1416_v42, 2  ;;  %v1411_v46 = vrot.slane %v1410_v43, 1 }
  0xdc   : > { %v1418_v45 = vadd.f32 %v1417_v44, %v1416_v42  ;;  %v1412_v49 = vadd.f32 %v1411_v46, %v1410_v43 }
  0xde   : > { %v1419_v47 = vrot.slane %v1418_v45, 1 }
  0xe0   : > { %v1420_v48 = vadd.f32 %v1419_v47, %v1418_v45 }
  0xe2   : > { %1526 = vpush %v1420_v48 }
  0xe3   : > { %1528 = vpush %v1412_v49 }
 0x113   : > { %s1527_s24 = spop %1526 }
 0x114   : > { %s1529_s26 = spop %1528 }
 0x115   : > { %s1423_s28 = smul.f32 1e-10, %s1529_s26 }
 0x117   : > { %p1424_p10 = scmp.le.f32.partialorder %s1527_s24, %s1423_s28 }
 0x118   : > { %s1987_s18 = smov (!%p1424_p10), 0  }
 0x119   : > { %1427 = sbr.rel (%p1424_p10) target bundleno = 963 (0x3c3), region = 365 }
 0x120 LB: >> { %s1992_s19 = smov 0   ;;  %s1796_s18 = sphi %s1987_s18, %s2302_s18  }
 0x121 LB: >>> { %s491_s16 = smov [#allocation15]  ;;  %v495_v5 = vmov %v1945_v5  ;;  %v498_v6 = vmov %v1947_v6  ;;  %s511_s20 = smov [#allocation16]  ;;  %vm814_vm14 = vcmp.eq.s32.totalorder %v1947_v6, 0  ;;  %vm826_vm15 = vcmp.eq.s32.totalorder %v1947_v6, 7  ;;  %s1800_s19 = sphi %s1992_s19, %s490_s19  }
 0x122   : >>> { %v515_v5 = vmov %v1945_v5  ;;  %v518_v6 = vmov %v1947_v6  ;;  %v499_v50 = vld [vmem:[%s491_s16] sm:$0xff]  ;;  %vm502_vm5 = vcmp.eq.s32.totalorder %v498_v6, %v495_v5  ;;  %s531_s21 = smov [#allocation18]  ;;  %s492_s22 = smov [#allocation19] }
 0x123   : >>> { %vm522_vm6 = vcmp.eq.s32.totalorder %v518_v6, %v515_v5  ;;  %v535_v5 = vmov %v1945_v5  ;;  %v538_v6 = vmov %v1947_v6  ;;  %v503_v51 = vsel %vm502_vm5, %v499_v50, 0.0  ;;  %v519_v52 = vld [vmem:[%s511_s20] sm:$0xff]  ;;  %s512_s24 = smov [#allocation20]  ;;  %s532_s26 = smov [#allocation21] }
 0x124   : >>> { %vm542_vm7 = vcmp.eq.s32.totalorder %v538_v6, %v535_v5  ;;  %v504_v53 = vrot.slane %v503_v51, 4  ;;  %v523_v54 = vsel %vm522_vm6, %v519_v52, 0.0  ;;  %v539_v55 = vld [vmem:[%s531_s21] sm:$0xff]  ;;  %s555_s28 = smov [#allocation20]  ;;  %s553_s16 = smov [#allocation19]  ;;  %v604_v5 = vmov %v1945_v5 }
 0x125   : >>> { %v524_v56 = vrot.slane %v523_v54, 4  ;;  %v543_v57 = vsel %vm542_vm7, %v539_v55, 0.0  ;;  %s557_s20 = smov [#allocation21]  ;;  %s592_s21 = smov [#allocation22]  ;;  %v607_v6 = vmov %v1947_v6  ;;  %v619_v5 = vmov %v1945_v5 }
 0x126   : >>> { %v505_v58 = vadd.f32 %v504_v53, %v503_v51  ;;  %v544_v59 = vrot.slane %v543_v57, 4  ;;  %v622_v6 = vmov %v1947_v6  ;;  %vm609_vm12 = vcmp.eq.s32.totalorder %v607_v6, %v604_v5  ;;  %s854_s14 = smov [#allocation26]  ;;  %s2014_s25 = smov %s1949_s25 }
 0x127   : >>> { %v525_v60 = vadd.f32 %v524_v56, %v523_v54  ;;  %vm624_vm13 = vcmp.eq.s32.totalorder %v622_v6, %v619_v5  ;;  %s2017_s30 = smov %s1952_s30  ;;  %s2020_s29 = smov %s1955_s29  ;;  %v862_v52 = vld [vmem:[%s2014_s25] sm:$0xff]  ;;  %v717_v5 = vmov %v1945_v5  ;;  %v720_v6 = vmov %v1947_v6 }
 0x128   : >>> { %v506_v61 = vrot.slane %v505_v58, 2  ;;  %v545_v62 = vadd.f32 %v544_v59, %v543_v57  ;;  %s2024_s17 = smov %s1958_s17  ;;  %v863_v53 = vld [vmem:[%s2017_s30] sm:$0xff]  ;;  %s856_s10 = smov [#allocation27]  ;;  %v690_v5 = vmov %v1945_v5  ;;  %v693_v6 = vmov %v1947_v6 }
 0x129   : >>> { %v526_v63 = vrot.slane %v525_v60, 2  ;;  %v864_v56 = vld [vmem:[%s2020_s29] sm:$0xff]  ;;  %v731_v5 = vmov %v1945_v5  ;;  %v734_v6 = vmov %v1947_v6  ;;  %vm724_vm0 = vcmp.eq.s32.totalorder %v720_v6, %v717_v5  ;;  %s490_s19 = sadd.s32 1, %s1800_s19  }
 0x12a   : >>> { %v507_v0 = vadd.f32 %v506_v61, %v505_v58  ;;  %v546_v1 = vrot.slane %v545_v62, 2  ;;  %v865_v57 = vld [vmem:[%s2024_s17] sm:$0xff]  ;;  %v704_v5 = vmov %v1945_v5  ;;  %v707_v6 = vmov %v1947_v6  ;;  %p487_p11 = scmp.ge.s32.totalorder %s490_s19, 15  }
 0x12b   : >>> { %v527_v2 = vadd.f32 %v526_v63, %v525_v60  ;;  %vm698_vm1 = vcmp.eq.s32.totalorder %v693_v6, %v690_v5  ;;  %vm739_vm3 = vcmp.eq.s32.totalorder %v734_v6, %v731_v5  ;;  %vm711_vm4 = vcmp.eq.s32.totalorder %v707_v6, %v704_v5 }
 0x12c   : >>> { %v508_v3 = vrot.slane %v507_v0, 1  ;;  %v547_v4 = vadd.f32 %v546_v1, %v545_v62  ;;  %vm753_vm5 = vcmp.eq.s32.totalorder %v1945_v5, 0  ;;  %vm757_vm6 = vcmp.eq.s32.totalorder %v1945_v5, 1 }
 0x12d   : >>> { %v528_v7 = vrot.slane %v527_v2, 1  ;;  %vm770_vm7 = vcmp.eq.s32.totalorder %v1945_v5, 7  ;;  %v391_v5 = vmov (%p487_p11), %v1945_v5  ;;  %v394_v6 = vmov (%p487_p11), %v1947_v6 }
 0x12e   : >>> { %v509_v8 = vadd.f32 %v508_v3, %v507_v0  ;;  %v548_v9 = vrot.slane %v547_v4, 1  ;;  %v444_v5 = vmov (%p487_p11), %v1945_v5 }
 0x12f   : >>> { %v529_v10 = vadd.f32 %v528_v7, %v527_v2 }
 0x130   : >>> { %510 = vst [vmem:[%s492_s22] sm:$0x1] %v509_v8  ;;  %v549_v11 = vadd.f32 %v548_v9, %v547_v4  ;;  %s594_s22 = smov [#allocation23] }
 0x131   : >>> { %530 = vst [vmem:[%s512_s24] sm:$0x1] %v529_v10  ;;  %s551_s24 = smov [#allocation24] }
 0x132   : >>> { %550 = vst [vmem:[%s532_s26] sm:$0x1] %v549_v11  ;;  %s552_s26 = smov [#allocation25]  ;;  %s596_s24 = smov %s551_s24 }
 0x133   : >>> { %s598_s26 = smov %s552_s26 }
 0x137   : >>> { %v554_v14 = vld [vmem:[%s553_s16] sm:$0xff]  ;;  %s615_s16 = smov [#allocation25] }
 0x138   : >>> { %v556_v12 = vld [vmem:[%s555_s28] sm:$0xff]  ;;  %v577_v27 = vand.u32 2147483647, %v554_v14  ;;  %s600_s28 = smov [#allocation24] }
 0x139   : >>> { %v560_v13 = vmul.f32 2.0, %v556_v12  ;;  %v558_v15 = vld [vmem:[%s557_s20] sm:$0xff]  ;;  %v578_v32 = vand.u32 2147483647, %v556_v12  ;;  %s613_s20 = smov [#allocation26] }
 0x13a   : >>> { %v559_v16 = vsub.f32 %v558_v15, %v554_v14  ;;  %v579_v28 = vand.u32 2147483647, %v558_v15 }
 0x13b   : >>> { %1614 = vrcp.f32 %v560_v13 }
 0x13c   : >>> { %v580_v31 = vmin.f32 %v577_v27, %v579_v28 }
 0x13e   : >>> { %v581_v33 = vmul.f32 1.1920929e-08, %v580_v31 }
 0x140   : >>> { %vm582_vm11 = vcmp.le.f32.partialorder %v578_v32, %v581_v33 }
 0x145   : >>> { %v1615_v17 = vpop.eup %1614 }
 0x146   : >>> { %v562_v18 = vmul.f32 %v1615_v17, %v559_v16 }
 0x148   : >>> { %v564_v19 = vmul.f32 %v562_v18, %v562_v18  ;;  %vm563_vm10 = vcmp.ge.f32.partialorder %v562_v18, 0.0 }
 0x14a   : >>> { %v565_v20 = vadd.f32 1.0, %v564_v19 }
 0x14c   : >>> { %1616 = vrsqrt.f32 %v565_v20  ;;  %vm568_vm8 = vcmp.eq.f32.partialorder %v565_v20, inf  ;;  %v571_v22 = vand.u32 2147483648, %v565_v20  ;;  %vm570_vm9 = vcmp.eq.f32.partialorder %v565_v20, 0.0 }
 0x156   : >>> { %v1617_v21 = vpop.eup %1616 }
 0x157   : >>> { %v567_v23 = vmul.f32 %v1617_v21, %v565_v20 }
 0x159   : >>> { %v569_v24 = vsel %vm568_vm8, %v565_v20, %v567_v23  ;;  %vm406_vm8 = vcmp.eq.s32.totalorder (%p487_p11), %v394_v6, %v391_v5  ;;  %v447_v6 = vmov (%p487_p11), %v1947_v6  ;;  %v410_v5 = vmov (%p487_p11), %v1945_v5 }
 0x15a   : >>> { %v572_v25 = vsel %vm570_vm9, %v571_v22, %v569_v24  ;;  %v413_v6 = vmov (%p487_p11), %v1947_v6  ;;  %v427_v5 = vmov (%p487_p11), %v1945_v5  ;;  %vm459_vm9 = vcmp.eq.s32.totalorder (%p487_p11), %v447_v6, %v444_v5 }
 0x15b   : >>> { %v573_v26 = vxor.u32 2147483648, %v572_v25  ;;  %v430_v6 = vmov (%p487_p11), %v1947_v6 }
 0x15d   : >>> { %v574_v29 = vsel %vm563_vm10, %v572_v25, %v573_v26 }
 0x15e   : >>> { %v575_v30 = vadd.f32 %v574_v29, %v562_v18 }
 0x160   : >>> { %1618 = vrcp.f32 %v575_v30 }
 0x16a   : >>> { %v1619_v34 = vpop.eup %1618 }
 0x16b   : >>> { %v583_v35 = vsel %vm582_vm11, 0.0, %v1619_v34 }
 0x16c   : >>> { %v584_v36 = vmul.f32 %v583_v35, %v583_v35  ;;  %v588_v37 = vmul.f32 %v583_v35, %v556_v12 }
 0x16e   : >>> { %v585_v38 = vadd.f32 1.0, %v584_v36  ;;  %v589_v39 = vsub.f32 %v554_v14, %v588_v37  ;;  %v591_v40 = vadd.f32 %v588_v37, %v558_v15 }
 0x170   : >>> { %1620 = vrsqrt.f32 %v585_v38  ;;  %593 = vst [vmem:[%s592_s21] sm:$0xff] %v589_v39  ;;  %595 = vst [vmem:[%s594_s22] sm:$0xff] %v591_v40  ;;  %s630_s21 = smov [#allocation26]  ;;  %s2007_s22 = smov [#allocation15] }
 0x171   : >>> { %v638_v49 = vld [vmem:[%s2007_s22] sm:$0xff] }
 0x17a   : >>> { %v1621_v41 = vpop.eup %1620 }
 0x17b   : >>> { %597 = vst [vmem:[%s596_s24] sm:$0xff] %v1621_v41  ;;  %v587_v42 = vmul.f32 %v1621_v41, %v583_v35  ;;  %s628_s24 = smov [#allocation27] }
 0x17d   : >>> { %599 = vst [vmem:[%s598_s26] sm:$0xff] %v587_v42  ;;  %s2009_s26 = smov [#allocation16] }
 0x17e   : >>> { %v639_v50 = vld [vmem:[%s2009_s26] sm:$0xff] }
 0x182   : >>> { %v601_v43 = vld [vmem:[%s600_s28] ss:$0 sm:$0xff]  ;;  %s2011_s28 = smov [#allocation18] }
 0x183   : >>> { %v610_v44 = vsel %vm609_vm12, %v601_v43, 0.0  ;;  %v641_v51 = vld [vmem:[%s2011_s28] sm:$0xff] }
 0x184   : >>> { %611 = vadd.xlane.f32.xlu0 %v610_v44  ;;  %v616_v45 = vld [vmem:[%s615_s16] ss:$0 sm:$0xff]  ;;  %s2026_s16 = smov [#allocation17] }
 0x185   : >>> { %v625_v46 = vsel %vm624_vm13, %v616_v45, 0.0  ;;  %v640_v58 = vld [vmem:[%s2026_s16] sm:$0xff] }
 0x188   : >>> { %626 = vadd.xlane.f32.xlu0 %v625_v46 }
 0x211   : >>> { %v612_v47 = vpop.xlane.xlu0 %611 }
 0x212   : >>> { %614 = vst [vmem:[%s613_s20] sm:$0xff] %v612_v47  ;;  %s632_s20 = smov [#allocation27] }
 0x215   : >>> { %v627_v48 = vpop.xlane.xlu0 %626 }
 0x216   : >>> { %629 = vst [vmem:[%s628_s24] sm:$0xff] %v627_v48  ;;  %s2055_s24 = smov [#allocation18] }
 0x219   : >>> { %v631_v54 = vld [vmem:[%s630_s21] sm:$0xff]  ;;  %s2053_s21 = smov [#allocation17] }
 0x21a   : >>> { %v855_v55 = vld [vmem:[%s854_s14] sm:$0xff]  ;;  %v642_v59 = vmul.f32 %v638_v49, %v631_v54  ;;  %v645_v60 = vmul.f32 %v639_v50, %v631_v54  ;;  %v652_v61 = vmul.f32 %v641_v51, %v631_v54  ;;  %v649_v4 = vmul.f32 %v640_v58, %v631_v54  ;;  %s660_s14 = smov [#allocation25] }
 0x21b   : >>> { %v866_v62 = vmul.f32 %v862_v52, %v855_v55  ;;  %v869_v63 = vmul.f32 %v863_v53, %v855_v55  ;;  %v873_v0 = vmul.f32 %v864_v56, %v855_v55  ;;  %v876_v1 = vmul.f32 %v865_v57, %v855_v55  ;;  %v661_v24 = vld [vmem:[%s660_s14] ss:$0 sm:$0xff]  ;;  %s727_s14 = smov [#allocation18] }
 0x21d   : >>> { %v633_v2 = vld [vmem:[%s632_s20] sm:$0xff]  ;;  %s714_s20 = smov [#allocation17] }
 0x21e   : >>> { %v857_v3 = vld [vmem:[%s856_s10] sm:$0xff]  ;;  %v646_v7 = vmul.f32 %v641_v51, %v633_v2  ;;  %v648_v8 = vmul.f32 %v638_v49, %v633_v2  ;;  %v651_v9 = vmul.f32 %v639_v50, %v633_v2  ;;  %v643_v14 = vmul.f32 %v640_v58, %v633_v2  ;;  %s658_s10 = smov [#allocation24] }
 0x21f   : >>> { %v867_v10 = vmul.f32 %v864_v56, %v857_v3  ;;  %v870_v11 = vmul.f32 %v865_v57, %v857_v3  ;;  %v872_v12 = vmul.f32 %v862_v52, %v857_v3  ;;  %v875_v13 = vmul.f32 %v863_v53, %v857_v3  ;;  %v659_v23 = vld [vmem:[%s658_s10] ss:$0 sm:$0xff]  ;;  %s686_s10 = smov [#allocation15] }
 0x220   : >>> { %v647_v15 = vsub.f32 %v645_v60, %v646_v7  ;;  %v653_v16 = vadd.f32 %v652_v61, %v651_v9  ;;  %v650_v18 = vadd.f32 %v649_v4, %v648_v8  ;;  %v644_v22 = vsub.f32 %v642_v59, %v643_v14 }
 0x221   : >>> { %v868_v17 = vsub.f32 %v866_v62, %v867_v10  ;;  %v871_v19 = vsub.f32 %v869_v63, %v870_v11  ;;  %v874_v20 = vadd.f32 %v873_v0, %v872_v12  ;;  %v877_v21 = vadd.f32 %v876_v1, %v875_v13 }
 0x222   : >>> { %655 = vst [vmem:[%s2009_s26] sm:$0xff] %v647_v15  ;;  %657 = vst [vmem:[%s2011_s28] sm:$0xff] %v653_v16  ;;  %s2059_s26 = smov [#allocation16]  ;;  %s687_s28 = smov [#allocation22] }
 0x223   : >>> { %878 = vst [vmem:[%s2014_s25] sm:$0xff] %v868_v17  ;;  %656 = vst [vmem:[%s2026_s16] sm:$0xff] %v650_v18  ;;  %s882_s25 = smov %s1949_s25  ;;  %s728_s16 = smov [#allocation23]  ;;  %v694_v55 = vld [vmem:[%s687_s28] ss:$0 sm:$0xff] }
 0x224   : >>> { %879 = vst [vmem:[%s2017_s30] sm:$0xff] %v871_v19  ;;  %880 = vst [vmem:[%s2020_s29] sm:$0xff] %v874_v20  ;;  %s883_s29 = smov %s1955_s29  ;;  %s2046_s30 = smov %s1952_s30  ;;  %v735_v56 = vld [vmem:[%s728_s16] ss:$0 sm:$0xff] }
 0x225   : >>> { %881 = vst [vmem:[%s2024_s17] sm:$0xff] %v877_v21  ;;  %654 = vst [vmem:[%s2007_s22] sm:$0xff] %v644_v22  ;;  %s2049_s17 = smov %s1958_s17  ;;  %s2057_s22 = smov [#allocation15] }
 0x226   : >>> { %s743_s28 = smov [#allocation16]  ;;  %s1804_s16 = smov 127  }
 0x229   : >>> { %v669_v39 = vld [vmem:[%s2055_s24] sm:$0xff] }
 0x22a   : >>> { %v884_v25 = vld [vmem:[%s882_s25] ss:$0 sm:$0xff]  ;;  %v1501_v27 = vld [vmem:[%s882_s25 + $0x7] ss:$0 sm:$0xff]  ;;  %v677_v42 = vmul.f32 %v669_v39, %v661_v24  ;;  %v680_v46 = vmul.f32 %v669_v39, %v659_v23 }
 0x22b   : >>> { %v1500_v26 = vld [vmem:[%s882_s25 - $0x1] sm:$0xfe]  ;;  %v1505_v34 = vld [vmem:[%s2046_s30 + $0x7] ss:$0 sm:$0xff] }
 0x22c   : >>> { %v891_v28 = vsel %vm814_vm14, %v884_v25, %v1500_v26  ;;  %v895_v29 = vld [vmem:[%s883_s29] ss:$0 sm:$0xff]  ;;  %v1503_v30 = vld [vmem:[%s883_s29 + $0x1] sm:$0x7f] }
 0x22d   : >>> { %v908_v31 = vld [vmem:[%s2046_s30] ss:$0 sm:$0xff]  ;;  %894 = vst [vmem:[%s882_s25] sm:$0xff] %v891_v28  ;;  %v903_v32 = vsel %vm826_vm15, %v1501_v27, %v1503_v30  ;;  %v1507_v37 = vld [vmem:[%s2049_s17 + $0x1] sm:$0x7f] }
 0x22e   : >>> { %v1504_v33 = vld [vmem:[%s2046_s30 - $0x1] sm:$0xfe]  ;;  %1502 = vst [vmem:[%s882_s25 + $0x1] sm:$0x1] %v895_v29  ;;  %905 = vst [vmem:[%s883_s29] sm:$0xff] %v903_v32  ;;  %v927_v40 = vsel %vm826_vm15, %v1505_v34, %v1507_v37 }
 0x22f   : >>> { %v919_v35 = vld [vmem:[%s2049_s17] ss:$0 sm:$0xff]  ;;  %v915_v36 = vsel %vm814_vm14, %v908_v31, %v1504_v33 }
 0x230   : >>> { %v668_v38 = vld [vmem:[%s2053_s21] sm:$0xff]  ;;  %918 = vst [vmem:[%s2046_s30] sm:$0xff] %v915_v36  ;;  %929 = vst [vmem:[%s2049_s17] sm:$0xff] %v927_v40 }
 0x231   : >>> { %v676_v41 = vmul.f32 %v668_v38, %v659_v23  ;;  %v679_v43 = vmul.f32 %v668_v38, %v661_v24  ;;  %v666_v44 = vld [vmem:[%s2057_s22] sm:$0xff]  ;;  %1506 = vst [vmem:[%s2046_s30 + $0x1] sm:$0x1] %v919_v35 }
 0x232   : >>> { %v667_v45 = vld [vmem:[%s2059_s26] sm:$0xff]  ;;  %v670_v47 = vmul.f32 %v666_v44, %v659_v23  ;;  %v673_v49 = vmul.f32 %v666_v44, %v661_v24 }
 0x233   : >>> { %v671_v48 = vmul.f32 %v667_v45, %v661_v24  ;;  %v678_v50 = vsub.f32 %v676_v41, %v677_v42  ;;  %v674_v51 = vmul.f32 %v667_v45, %v659_v23  ;;  %v681_v52 = vadd.f32 %v680_v46, %v679_v43 }
 0x235   : >>> { %v672_v53 = vsub.f32 %v670_v47, %v671_v48  ;;  %684 = vst [vmem:[%s2053_s21] sm:$0xff] %v678_v50  ;;  %v675_v54 = vadd.f32 %v674_v51, %v673_v49  ;;  %685 = vst [vmem:[%s2055_s24] sm:$0xff] %v681_v52  ;;  %s701_s21 = smov [#allocation16]  ;;  %s2093_s24 = smov [#allocation17] }
 0x237   : >>> { %682 = vst [vmem:[%s2057_s22] sm:$0xff] %v672_v53  ;;  %683 = vst [vmem:[%s2059_s26] sm:$0xff] %v675_v54  ;;  %s742_s22 = smov [#allocation15]  ;;  %s1803_s26 = smov 1  }
 0x23c   : >>> { %v721_v57 = vld [vmem:[%s714_s20] sm:$0xff] }
 0x23d   : >>> { %v725_v58 = vsel %vm724_vm0, 0.0, %v721_v57  ;;  %v736_v60 = vld [vmem:[%s727_s14] sm:$0xff] }
 0x23e   : >>> { %v695_v59 = vld [vmem:[%s686_s10] sm:$0xff]  ;;  %726 = vst [vmem:[%s714_s20] sm:$0xff] %v725_v58  ;;  %v740_v63 = vsel %vm739_vm3, %v735_v56, %v736_v60  ;;  %s2096_s20 = smov [#allocation18] }
 0x23f   : >>> { %v699_v61 = vsel %vm698_vm1, %v694_v55, %v695_v59  ;;  %v708_v62 = vld [vmem:[%s701_s21] sm:$0xff]  ;;  %741 = vst [vmem:[%s727_s14] sm:$0xff] %v740_v63  ;;  %s830_s14 = smov [#allocation16] }
 0x240   : >>> { %700 = vst [vmem:[%s686_s10] sm:$0xff] %v699_v61  ;;  %v712_v0 = vsel %vm711_vm4, 0.0, %v708_v62  ;;  %s806_s10 = smov [#allocation15] }
 0x241   : >>> { %713 = vst [vmem:[%s701_s21] sm:$0xff] %v712_v0  ;;  %s807_s21 = smov [#allocation17] }
 0x245   : >>> { %v780_v1 = vld [vmem:[%s2093_s24] sm:$0xff] }
 0x246   : >>> { %781 = vrot.lane.b32.xlu0 %v780_v1, %s1803_s26  ;;  %v776_v4 = vld [vmem:[%s2096_s20] sm:$0xff] }
 0x247   : >>> { %v748_v2 = vld [vmem:[%s742_s22] sm:$0xff] }
 0x248   : >>> { %749 = vrot.lane.b32.xlu1 %v748_v2, %s1803_s26  ;;  %v744_v3 = vld [vmem:[%s743_s28] sm:$0xff] }
 0x24c   : >>> { %745 = vrot.lane.b32.xlu1 %v744_v3, %s1803_s26 }
 0x250   : >>> { %766 = vrot.lane.b32.xlu1 %v744_v3, %s1804_s16 }
 0x254   : >>> { %777 = vrot.lane.b32.xlu1 %v776_v4, %s1803_s26  ;;  %s395_s26 = smov (%p487_p11), [#allocation15] }
 0x258   : >>> { %798 = vrot.lane.b32.xlu1 %v776_v4, %s1804_s16  ;;  %s431_s16 = smov (%p487_p11), [#allocation17] }
 0x2b8   : >>> { %v782_v13 = vpop.permute.xlu0 %781 }
 0x2b9   : >>> { %v786_v15 = vsel %vm753_vm5, %v780_v1, %v782_v13 }
 0x2ba   : >>> { %v750_v7 = vpop.permute.xlu1 %749 }
 0x2bb   : >>> { %v754_v8 = vsel %vm753_vm5, %v748_v2, %v750_v7 }
 0x2be   : >>> { %v746_v9 = vpop.permute.xlu1 %745 }
 0x2bf   : >>> { %v758_v10 = vsel %vm757_vm6, %v746_v9, %v754_v8 }
 0x2c0   : >>> { %v764_v11 = vsel %vm1345_vm2, %v758_v10, 0.0 }
 0x2c1   : >>> { %772 = vst [vmem:[%s742_s22] sm:$0xff] %v764_v11  ;;  %s831_s22 = smov [#allocation18] }
 0x2c2   : >>> { %v767_v12 = vpop.permute.xlu1 %766 }
 0x2c3   : >>> { %v771_v14 = vsel %vm770_vm7, %v748_v2, %v767_v12 }
 0x2c4   : >>> { %773 = vst [vmem:[%s743_s28] sm:$0xff] %v771_v14  ;;  %s414_s28 = smov (%p487_p11), [#allocation16] }
 0x2c6   : >>> { %v778_v16 = vpop.permute.xlu1 %777 }
 0x2c7   : >>> { %v790_v17 = vsel %vm757_vm6, %v778_v16, %v786_v15 }
 0x2c8   : >>> { %v808_v18 = vld [vmem:[%s806_s10] ss:$0 sm:$0xff]  ;;  %v1493_v20 = vld [vmem:[%s806_s10 + $0x7] ss:$0 sm:$0xff]  ;;  %v796_v22 = vsel %vm1345_vm2, %v790_v17, 0.0 }
 0x2c9   : >>> { %v1492_v19 = vld [vmem:[%s806_s10 - $0x1] sm:$0xfe]  ;;  %804 = vst [vmem:[%s2093_s24] sm:$0xff] %v796_v22  ;;  %s930_s24 = sadd.s32 (%p487_p11), 1, %s1796_s18  }
 0x2ca   : >>> { %v815_v21 = vsel %vm814_vm14, %v808_v18, %v1492_v19  ;;  %v799_v23 = vpop.permute.xlu1 %798  ;;  %p483_p12 = scmp.ge.s32.totalorder (%p487_p11), %s930_s24, 15  ;;  %s2302_s18 = smov (%p487_p11), %s930_s24 }
 0x2cb   : >>> { %818 = vst [vmem:[%s806_s10] sm:$0xff] %v815_v21  ;;  %v832_v24 = vld [vmem:[%s830_s14] ss:$0 sm:$0xff]  ;;  %v1497_v26 = vld [vmem:[%s830_s14 + $0x7] ss:$0 sm:$0xff]  ;;  %v803_v27 = vsel %vm770_vm7, %v780_v1, %v799_v23 }
 0x2cc   : >>> { %v1496_v25 = vld [vmem:[%s830_s14 - $0x1] sm:$0xfe]  ;;  %805 = vst [vmem:[%s2096_s20] sm:$0xff] %v803_v27  ;;  %s448_s20 = smov (%p487_p11), [#allocation18] }
 0x2cd   : >>> { %v839_v28 = vsel %vm814_vm14, %v832_v24, %v1496_v25 }
 0x2ce   : >>> { %842 = vst [vmem:[%s830_s14] sm:$0xff] %v839_v28 }
 0x2d0   : >>> { %v819_v29 = vld [vmem:[%s807_s21] ss:$0 sm:$0xff]  ;;  %v1495_v30 = vld [vmem:[%s807_s21 + $0x1] sm:$0x7f] }
 0x2d1   : >>> { %1494 = vst [vmem:[%s806_s10 + $0x1] sm:$0x1] %v819_v29  ;;  %v827_v31 = vsel %vm826_vm15, %v1493_v20, %v1495_v30  ;;  %489 = sbr.rel (!%p487_p11) target bundleno = 289 (0x121), region = 360 }
 0x2d2   : >>> { %829 = vst [vmem:[%s807_s21] sm:$0xff] %v827_v31 }
 0x2d3   : >>> { %v843_v32 = vld [vmem:[%s831_s22] ss:$0 sm:$0xff]  ;;  %v1499_v33 = vld [vmem:[%s831_s22 + $0x1] sm:$0x7f] }
 0x2d4   : >>> { %1498 = vst [vmem:[%s830_s14 + $0x1] sm:$0x1] %v843_v32  ;;  %v851_v34 = vsel %vm826_vm15, %v1497_v26, %v1499_v33 }
 0x2d5   : >>> { %853 = vst [vmem:[%s831_s22] sm:$0xff] %v851_v34 }
 0x2d8   : >> { %v401_v35 = vld [vmem:[%s395_s26] sm:$0xff] }
 0x2d9   : >> { %v402_v37 = vsel %vm1345_vm2, %v401_v35, 0.0  ;;  %v437_v39 = vld [vmem:[%s431_s16] sm:$0xff] }
 0x2da   : >> { %v403_v41 = vmul.f32 %v402_v37, %v402_v37  ;;  %v438_v43 = vsel %vm1345_vm2, %v437_v39, 0.0 }
 0x2db   : >> { %v420_v36 = vld [vmem:[%s414_s28] sm:$0xff]  ;;  %v439_v45 = vmul.f32 %v438_v43, %v438_v43 }
 0x2dc   : >> { %v421_v38 = vsel %vm1345_vm2, %v420_v36, 0.0  ;;  %v454_v40 = vld [vmem:[%s448_s20] sm:$0xff]  ;;  %v407_v48 = vsel %vm406_vm8, 0.0, %v403_v41 }
 0x2dd   : >> { %v422_v42 = vmul.f32 %v421_v38, %v421_v38  ;;  %v455_v44 = vsel %vm1345_vm2, %v454_v40, 0.0 }
 0x2de   : >> { %v456_v47 = vmul.f32 %v455_v44, %v455_v44 }
 0x2df   : >> { %v424_v46 = vadd.f32 %v422_v42, %v403_v41  ;;  %v423_v49 = vadd.f32 %v422_v42, %v407_v48 }
 0x2e0   : >> { %v460_v52 = vsel %vm459_vm9, 0.0, %v456_v47 }
 0x2e1   : >> { %v441_v50 = vadd.f32 %v439_v45, %v424_v46  ;;  %v440_v51 = vadd.f32 %v439_v45, %v423_v49 }
 0x2e3   : >> { %v462_v53 = vadd.f32 %v456_v47, %v441_v50  ;;  %v461_v54 = vadd.f32 %v460_v52, %v440_v51 }
 0x2e5   : >> { %463 = vadd.xlane.f32.xlu0 %v462_v53 }
 0x2e9   : >> { %471 = vadd.xlane.f32.xlu0 %v461_v54 }
 0x372   : >> { %v464_v55 = vpop.xlane.xlu0 %463 }
 0x373   : >> { %v465_v56 = vrot.slane %v464_v55, 4 }
 0x375   : >> { %v466_v57 = vadd.f32 %v465_v56, %v464_v55 }
 0x376   : >> { %v472_v58 = vpop.xlane.xlu0 %471 }
 0x377   : >> { %v467_v59 = vrot.slane %v466_v57, 2  ;;  %v473_v60 = vrot.slane %v472_v58, 4 }
 0x379   : >> { %v474_v61 = vadd.f32 %v473_v60, %v472_v58  ;;  %v468_v62 = vadd.f32 %v467_v59, %v466_v57 }
 0x37b   : >> { %v475_v63 = vrot.slane %v474_v61, 2  ;;  %v469_v1 = vrot.slane %v468_v62, 1 }
 0x37d   : >> { %v476_v0 = vadd.f32 %v475_v63, %v474_v61  ;;  %v470_v4 = vadd.f32 %v469_v1, %v468_v62 }
 0x37f   : >> { %v477_v2 = vrot.slane %v476_v0, 1 }
 0x381   : >> { %v478_v3 = vadd.f32 %v477_v2, %v476_v0 }
 0x383   : >> { %1530 = vpush %v478_v3 }
 0x384   : >> { %1532 = vpush %v470_v4 }
 0x3b4   : >> { %s1531_s19 = spop %1530 }
 0x3b5   : >> { %s1533_s10 = spop %1532 }
 0x3b6   : >> { %s481_s14 = smul.f32 1e-10, %s1533_s10 }
 0x3b8   : >> { %p482_p13 = scmp.le.f32.partialorder %s1531_s19, %s481_s14 }
 0x3ba   : >> { %p484_p0 = por %p483_p12, %p482_p13 }
 0x3bc   : > { %932 = sbr.rel (!%p484_p0) target bundleno = 288 (0x120), region = 371 }
 0x3c3 PF: > { %s937_s21 = smov [#allocation15]  ;;  %v941_v5 = vmov %v1945_v5  ;;  %v944_v6 = vmov %v1947_v6  ;;  %s957_s22 = smov [#allocation18] }
 0x3c4   : > { %v961_v5 = vmov %v1945_v5  ;;  %v964_v6 = vmov %v1947_v6  ;;  %v945_v7 = vld [vmem:[%s937_s21] sm:$0xff]  ;;  %vm948_vm10 = vcmp.eq.s32.totalorder %v944_v6, %v941_v5  ;;  %s933_s18 = sand.u32 7, %s1776_s11   ;;  %s2303_s28 = scalar_lea.vmem [#allocation5], %s1943_s27 }
 0x3c5   : > { %vm968_vm11 = vcmp.eq.s32.totalorder %v964_v6, %v961_v5  ;;  %v949_v8 = vsel %vm948_vm10, %v945_v7, 0.0  ;;  %v965_v10 = vld [vmem:[%s957_s22] sm:$0xff]  ;;  %s934_s24 = scalar_lea.vmem [#allocation4], %s933_s18  ;;  %s936_s26 = scalar_lea.vmem [#allocation6], %s933_s18 }
 0x3c6   : > { %v950_v9 = vrot.slane %v949_v8, 4  ;;  %v969_v11 = vsel %vm968_vm11, %v965_v10, 0.0  ;;  %s938_s24 = smov %s934_s24  ;;  %s958_s26 = smov %s936_s26 }
 0x3c7   : > { %v970_v13 = vrot.slane %v969_v11, 4  ;;  %s2304_s16 = scalar_lea.vmem [#allocation7], %s1943_s27  ;;  %s1020_s14 = sshrl.u32 (%p1907_p4), %s1776_s11, 3 }
 0x3c8   : > { %v951_v12 = vadd.f32 %v950_v9, %v949_v8  ;;  %s1021_s21 = sadd.s32 (%p1907_p4), %s1780_s12, %s1020_s14  ;;  %s2305_s22 = scalar_lea.vmem (%p1907_p4), [#allocation5], %s1943_s27 }
 0x3c9   : > { %v971_v15 = vadd.f32 %v970_v13, %v969_v11  ;;  %s1514_s18 = sshll.u32 (%p1907_p4), %s1021_s21, 1 }
 0x3ca   : > { %v952_v14 = vrot.slane %v951_v12, 2 }
 0x3cb   : > { %v972_v17 = vrot.slane %v971_v15, 2 }
 0x3cc   : > { %v953_v16 = vadd.f32 %v952_v14, %v951_v12 }
 0x3cd   : > { %v973_v19 = vadd.f32 %v972_v17, %v971_v15 }
 0x3ce   : > { %v954_v18 = vrot.slane %v953_v16, 1 }
 0x3cf   : > { %v974_v6 = vrot.slane %v973_v19, 1 }
 0x3d0   : > { %v955_v5 = vadd.f32 %v954_v18, %v953_v16 }
 0x3d1   : > { %v975_v20 = vadd.f32 %v974_v6, %v973_v19 }
 0x3d2   : > { %956 = vst [vmem:[%s938_s24] sm:$0x1] %v955_v5 }
 0x3d3   : > { %976 = vst [vmem:[%s958_s26] sm:$0x1] %v975_v20 }
 0x3d5   : > { %1019 = sbr.rel (!%p1907_p4) target bundleno = 995 (0x3e3), region = 174 }
 0x3d9   : > { %v980_v21 = vld [vmem:[#allocation4] sm:$0x3] }
 0x3da   : > { %982 = vst [vmem:[%s2303_s28] sm:$0x3] %v980_v21  ;;  %v986_v22 = vld [vmem:[#allocation6] sm:$0x3]  ;;  %s1023_s28 = scalar_lea.vmem (%p1907_p4), %s2282_s4, %s1514_s18 }
 0x3db   : > { %988 = vst [vmem:[%s2304_s16] sm:$0x3] %v986_v22 }
 0x3e1   : > { %v1039_v23 = vld [vmem:[%s2305_s22] sm:$0x3] }
 0x3e2   : > { %1040 = vst [vmem:[%s1023_s28] sm:$0x3] %v1039_v23 }
 0x3e3 PF: > { %1057 = sbr.rel (!%p1907_p4) target bundleno = 1003 (0x3eb), region = 208  ;;  %s1058_s16 = sshrl.u32 (%p1907_p4), %s1776_s11, 3 }
 0x3e4   : > { %s1059_s10 = sadd.s32 (%p1907_p4), %s1780_s12, %s1058_s16  ;;  %s2306_s20 = scalar_lea.vmem (%p1907_p4), [#allocation7], %s1943_s27 }
 0x3e5   : > { %s1515_s14 = sshll.u32 (%p1907_p4), %s1059_s10, 1 }
 0x3e6   : > { %s1061_s21 = scalar_lea.vmem (%p1907_p4), %s2283_s5, %s1515_s14 }
 0x3e9   : > { %v1077_v24 = vld [vmem:[%s2306_s20] sm:$0x3] (%p1907_p4) }
 0x3ea   : > { %1078 = vst [vmem:[%s1061_s21] sm:$0x3] %v1077_v24 }
 0x3eb PF: > { %s1516_s23 = sshll.u32 %s1780_s12, 1  ;;  %s1113_s18 = sshll.u32 %s1952_s30, 4  ;;  %s1114_s18 = int_to_ptr.vmem [resolvable:$true] %s1113_s18 }
 0x3ec   : > { %s1097_s24 = sadd.s32 %s1776_s11, %s1516_s23  ;;  %s1101_s27 = sshll.u32 %s1949_s25, 4  ;;  %s1102_s27 = int_to_ptr.vmem [resolvable:$true] %s1101_s27 }
 0x3ed   : > { %s2180_s26 = sshll.u32 %s1097_s24, 7  ;;  %s1622_s22 = scalar_lea.vmem %s1114_s18, 128 }
 0x3ee   : > { %s1111_s19 = scalar_lea.hbm %s2285_s7, %s2180_s26  ;;  %s2191_s14 = scalar_lea.hbm %s2284_s6, %s2180_s26 }
 0x3ef   : > { %p1623_p1 = scmp.ne.s32.totalorder %s1114_s18, %s1622_s22  ;;  %s1805_s12 = smov [#allocation10]  }
 0x3f0   : > { %s1624_s30 = sshll.u32 %s1805_s12, 4  ;;  %s1625_s30 = int_to_ptr.vmem [resolvable:$false] %s1624_s30 }
 0x3f1   : > { %s1626_s11 = scalar_lea.vmem %s1625_s30, 256  ;;  %p1627_p2 = scmp.lt.s32.totalorder %s1114_s18, %s1625_s30 }
 0x3f2   : > { %p1628_p3 = scmp.lt.s32.totalorder %s1626_s11, %s1622_s22 }
 0x3f4   : > { %p1629_p4 = por %p1628_p3, %p1627_p2 }
 0x3f6   : > { %p1630_p5 = pnand %p1629_p4, %p1623_p1 }
 0x3f8   : > { %1633 = shalt.err (!%p1630_p5)
}
 0x3f9   : > { %s1634_s25 = scalar_lea.hbm %s1111_s19, 128  ;;  %s1636_s24 = scalar_lea.hbm %s2285_s7, 512 }
 0x3fa   : > { %p1635_p6 = scmp.ne.s32.totalorder %s1111_s19, %s1634_s25  ;;  %p1637_p7 = scmp.lt.u32.totalorder %s1111_s19, %s2285_s7 }
 0x3fb   : > { %p1638_p8 = scmp.lt.u32.totalorder %s1636_s24, %s1634_s25  ;;  %p1640_p10 = scmp.lt.u32.totalorder %s1634_s25, %s1111_s19 }
 0x3fd   : > { %p1639_p9 = por %p1638_p8, %p1637_p7 }
 0x3ff   : > { %p1641_p11 = por %p1640_p10, %p1639_p9 }
 0x401   : > { %p1642_p12 = pnand %p1641_p11, %p1635_p6 }
 0x403   : > { %1645 = shalt.err (!%p1642_p12)
}
 0x404   : > { %s2307_s28 = scalar_lea.sflag [#allocation11], %s1939_s9  ;;  %s2205_s12 = scalar_lea.hbm %s2286_s8, %s2180_s26 }
 0x405   : > { %1116 = dma.vmem_to_hbm [thread:$0]  %s1114_s18, 128, %s1111_s19, %s2307_s28  }
 0x406   : > { %s1646_s30 = scalar_lea.vmem %s1102_s27, 128  ;;  %s1806_s11 = smov [#allocation8]  }
 0x407   : > { %p1647_p13 = scmp.ne.s32.totalorder %s1102_s27, %s1646_s30  ;;  %s1648_s21 = sshll.u32 %s1806_s11, 4  ;;  %s1649_s21 = int_to_ptr.vmem [resolvable:$false] %s1648_s21 }
 0x408   : > { %s1650_s23 = scalar_lea.vmem %s1649_s21, 256  ;;  %p1651_p0 = scmp.lt.s32.totalorder %s1102_s27, %s1649_s21 }
 0x409   : > { %p1652_p1 = scmp.lt.s32.totalorder %s1650_s23, %s1646_s30 }
 0x40b   : > { %p1653_p2 = por %p1652_p1, %p1651_p0 }
 0x40d   : > { %p1654_p3 = pnand %p1653_p2, %p1647_p13 }
 0x40f   : > { %1657 = shalt.err (!%p1654_p3)
}
 0x410   : > { %s1658_s18 = scalar_lea.hbm %s2191_s14, 128  ;;  %s1660_s24 = scalar_lea.hbm %s2284_s6, 512 }
 0x411   : > { %p1659_p4 = scmp.ne.s32.totalorder %s2191_s14, %s1658_s18  ;;  %p1661_p5 = scmp.lt.u32.totalorder %s2191_s14, %s2284_s6 }
 0x412   : > { %p1662_p6 = scmp.lt.u32.totalorder %s1660_s24, %s1658_s18  ;;  %p1664_p8 = scmp.lt.u32.totalorder %s1658_s18, %s2191_s14 }
 0x414   : > { %p1663_p7 = por %p1662_p6, %p1661_p5 }
 0x416   : > { %p1665_p9 = por %p1664_p8, %p1663_p7 }
 0x418   : > { %p1666_p10 = pnand %p1665_p9, %p1659_p4 }
 0x41a   : > { %1669 = shalt.err (!%p1666_p10)
}
 0x41b   : > { %s2308_s28 = scalar_lea.sflag [#allocation9], %s1939_s9  ;;  %s1125_s16 = sshll.u32 %s1955_s29, 4  ;;  %s1126_s16 = int_to_ptr.vmem [resolvable:$true] %s1125_s16 }
 0x41c   : > { %1104 = dma.vmem_to_hbm [thread:$0]  %s1102_s27, 128, %s2191_s14, %s2308_s28  }
 0x41d   : > { %s2309_s11 = sld [smem:[#allocation36_spill]]  ;;  %s1137_s19 = sshll.u32 %s1958_s17, 4  ;;  %s1138_s19 = int_to_ptr.vmem [resolvable:$true] %s1137_s19 }
 0x41e   : > { %s1670_s25 = scalar_lea.vmem %s1126_s16, 128  ;;  %s1807_s18 = smov [#allocation12]  }
 0x41f   : > { %p1671_p11 = scmp.ne.s32.totalorder %s1126_s16, %s1670_s25  ;;  %s1672_s24 = sshll.u32 %s1807_s18, 4  ;;  %s1673_s24 = int_to_ptr.vmem [resolvable:$false] %s1672_s24 }
 0x420   : > { %s1674_s20 = scalar_lea.vmem %s1673_s24, 256  ;;  %p1675_p12 = scmp.lt.s32.totalorder %s1126_s16, %s1673_s24 }
 0x421   : > { %p1676_p13 = scmp.lt.s32.totalorder %s1674_s20, %s1670_s25 }
 0x423   : > { %s2310_s21 = smov %s2309_s11  ;;  %s2225_s23 = scalar_lea.hbm %s2309_s11, %s2180_s26 }
 0x424   : > { %p1677_p0 = por %p1676_p13, %p1675_p12 }
 0x426   : > { %p1678_p1 = pnand %p1677_p0, %p1671_p11 }
 0x428   : > { %1681 = shalt.err (!%p1678_p1)
}
 0x429   : > { %s1682_s29 = scalar_lea.hbm %s2205_s12, 128  ;;  %s1684_s17 = scalar_lea.hbm %s2286_s8, 512 }
 0x42a   : > { %p1683_p2 = scmp.ne.s32.totalorder %s2205_s12, %s1682_s29  ;;  %p1685_p3 = scmp.lt.u32.totalorder %s2205_s12, %s2286_s8 }
 0x42b   : > { %p1686_p4 = scmp.lt.u32.totalorder %s1684_s17, %s1682_s29  ;;  %p1688_p6 = scmp.lt.u32.totalorder %s1682_s29, %s2205_s12 }
 0x42d   : > { %p1687_p5 = por %p1686_p4, %p1685_p3 }
 0x42f   : > { %p1689_p7 = por %p1688_p6, %p1687_p5 }
 0x431   : > { %p1690_p8 = pnand %p1689_p7, %p1683_p2 }
 0x433   : > { %1693 = shalt.err (!%p1690_p8)
}
 0x434   : > { %s2311_s28 = scalar_lea.sflag [#allocation11], %s1939_s9  ;;  %s1694_s22 = scalar_lea.vmem %s1138_s19, 128 }
 0x435   : > { %1128 = dma.vmem_to_hbm [thread:$0]  %s1126_s16, 128, %s2205_s12, %s2311_s28  }
 0x436   : > { %p1695_p9 = scmp.ne.s32.totalorder %s1138_s19, %s1694_s22  ;;  %s1808_s30 = smov [#allocation13]  }
 0x437   : > { %s1696_s11 = sshll.u32 %s1808_s30, 4  ;;  %s1697_s11 = int_to_ptr.vmem [resolvable:$false] %s1696_s11 }
 0x438   : > { %s1698_s25 = scalar_lea.vmem %s1697_s11, 256  ;;  %p1699_p10 = scmp.lt.s32.totalorder %s1138_s19, %s1697_s11 }
 0x439   : > { %p1700_p11 = scmp.lt.s32.totalorder %s1698_s25, %s1694_s22 }
 0x43b   : > { %p1701_p12 = por %p1700_p11, %p1699_p10 }
 0x43d   : > { %p1702_p13 = pnand %p1701_p12, %p1695_p9 }
 0x43f   : > { %1705 = shalt.err (!%p1702_p13)
}
 0x440   : > { %s1706_s18 = scalar_lea.hbm %s2225_s23, 128  ;;  %s1708_s16 = scalar_lea.hbm %s2310_s21, 512 }
 0x441   : > { %p1707_p0 = scmp.ne.s32.totalorder %s2225_s23, %s1706_s18  ;;  %p1709_p1 = scmp.lt.u32.totalorder %s2225_s23, %s2310_s21 }
 0x442   : > { %p1710_p2 = scmp.lt.u32.totalorder %s1708_s16, %s1706_s18  ;;  %p1712_p4 = scmp.lt.u32.totalorder %s1706_s18, %s2225_s23 }
 0x444   : > { %p1711_p3 = por %p1710_p2, %p1709_p1 }
 0x446   : > { %p1713_p5 = por %p1712_p4, %p1711_p3 }
 0x448   : > { %p1714_p6 = pnand %p1713_p5, %p1707_p0 }
 0x44a   : > { %1717 = shalt.err (!%p1714_p6)
}
 0x44b   : > { %s2312_s26 = scalar_lea.sflag [#allocation14], %s1939_s9 }
 0x44c   : > { %1140 = dma.vmem_to_hbm [thread:$0]  %s1138_s19, 128, %s2225_s23, %s2312_s26  }
 0x44d PF: > { %p1538_p7 = scmp.ge.s32.totalorder %s1792_s15, 2  ;;  %s2313_s27 = sadd.s32 4294967294, %s1792_s15  }
 0x44e   : > { %s1160_s17 = sand.u32 1, %s2313_s27  }
 0x44f   : > { %s1161_s14 = scalar_lea.sflag [#allocation9], %s1160_s17 }
 0x450   : > { %1755 = dma.done.wait (%p1538_p7), %s1161_s14, 128  }
 0x451   : > { %1757 = vsyncadd (%p1538_p7), %s1161_s14, 4294967168  ;;  %s1167_s10 = scalar_lea.sflag [#allocation11], %s1160_s17 }
 0x452   : > { %1759 = dma.done.wait (%p1538_p7), %s1167_s10, 256  }
 0x453   : > { %1761 = vsyncadd (%p1538_p7), %s1167_s10, 4294967040  ;;  %s1179_s28 = scalar_lea.sflag [#allocation14], %s1160_s17 }
 0x454   : > { %1763 = dma.done.wait (%p1538_p7), %s1179_s28, 128  }
 0x455   : > { %1765 = vsyncadd (%p1538_p7), %s1179_s28, 4294967168  ;;  %s25_s15 = sadd.s32 1, %s1792_s15   ;;  %s2314_s30 = sld [smem:[#allocation31_spill]] }
 0x456   : > { %p22_p8 = scmp.ge.s32.totalorder %s25_s15, 6   ;;  %s2315_s10 = sld [smem:[#allocation35_spill]] }
 0x457   : > { %s2316_s12 = sld [smem:[#allocation32_spill]]  ;;  %s2317_s9 = sld [smem:[#allocation33_spill]] }
 0x458   : > { %s2318_s14 = sld [smem:[#allocation34_spill]]  ;;  %s2319_s11 = smov %s1784_s13 }
 0x459   :  { %24 = sbr.rel (!%p22_p8) target bundleno = 11 (0xb), region = 382 }
 0x45d   : > { %s2320_s13 = smov %s2317_s9 }
 0x460   :  { %1184 = vsyncpa [#allocation9], 1 }
 0x461   :  { %1186 = vsyncpa [#allocation9 + $0x1], 1 }
 0x462   :  { %1187 = vsyncpa [#allocation11], 1 }
 0x463   :  { %1189 = vsyncpa [#allocation11 + $0x1], 1 }
 0x464   :  { %1190 = vsyncpa [#allocation14], 1 }
 0x465   :  { %1192 = vsyncpa [#allocation14 + $0x1], 1 }

// kernel: _sdpool_core.5
= control target key start
LH: loop header
LB: loop body
LE: loop exit
PB: predicated region body
PF: predicated region fallthrough
CT: control target
= control target key end

     0   :  { %s2055_s27 = smov 0   ;;  %s2279_s0 = inlined_call_operand.vmem [shape: f32[2,16,16], index: 0, kind: input, shape index: {}]   ;;  %s2280_s1 = inlined_call_operand.vmem [shape: f32[2,16,16], index: 1, kind: input, shape index: {}]   ;;  %s2281_s2 = inlined_call_operand.vmem [shape: f32[2,16,32], index: 2, kind: input, shape index: {}]   ;;  %s2282_s3 = inlined_call_operand.vmem [shape: f32[2,16,1], index: 3, kind: input, shape index: {}]   ;;  %s2283_s4 = inlined_call_operand.vmem [shape: f32[16,16], index: 4, kind: input, shape index: {}]   ;;  %s2284_s5 = inlined_call_operand.vmem [shape: f32[2,2,16,16], index: 5, kind: output, shape index: {0}]   ;;  %s2285_s6 = inlined_call_operand.vmem [shape: f32[2,16,16], index: 6, kind: output, shape index: {1}]   ;;  %s2286_s7 = inlined_call_operand.vmem [shape: f32[2,8,16], index: 7, kind: output, shape index: {2}]   ;;  %s2287_s8 = inlined_call_operand.vmem [shape: f32[2,8,64], index: 8, kind: output, shape index: {3}]  }
   0x1 LB: > { %s1755_s28 = sadd.s32 4294967295, %s2001_s27   ;;  %p1759_p0 = scmp.ge.s32.totalorder %s2001_s27, 1  ;;  %s2001_s27 = sphi %s2055_s27, %s19_s27  }
   0x2   : > { %p299_p1 = scmp.lt.s32.totalorder %s2001_s27, 3 }
   0x4   : > { %p300_p2 = pnand %p1759_p0, %p299_p1 }
   0x5   : > { %p361_p3 = scmp.lt.s32.totalorder (!%p300_p2), %s1755_s28, 1  ;;  %vm500_vm0 = vcmask (!%p300_p2), 64512   ;;  %v2003_v12 = vmov (!%p300_p2), 0   ;;  %vm1022_vm1 = vcmask (!%p300_p2), 130112   ;;  %v2004_v26 = vmov (!%p300_p2), 0.0|0.0   ;;  %s2007_s17 = smov (!%p300_p2), 120  }
   0x6   : > { %303 = sbr.rel (%p300_p2) target bundleno = 2256 (0x8d0), region = 40  ;;  %1947 = vset.pattern.permute.xlu0 (!%p300_p2), %v2003_v12  ;;  %1948 = vset.pattern.permute.xlu1 (!%p300_p2), %v2003_v12  ;;  %vm2005_vm2 = vmmov (!%p300_p2), 0   ;;  %v2006_v32 = vmov (!%p300_p2), 0.0   ;;  %vm2120_vm3 = vmpackc.low (!%p300_p2), %vm500_vm0, %vm500_vm0  ;;  %vm427_vm4 = vcmask (!%p300_p2), 130048   ;;  %vm1565_vm5 = vcmask (!%p300_p2), 261120  }
   0x7   : > { %1905 = vmatprep.subr.bf16.mxu1 (!%p300_p2), %v2004_v26  ;;  %1902 = vmatprep.subr.bf16.mxu0 (!%p300_p2), %v2004_v26  ;;  %vm1567_vm6 = vcmask (!%p300_p2), 523264  }
   0x8   : > { %1840 = vmatprep.mubr.msk.f32.mxu0 (!%p300_p2), %vm2005_vm2, %v2006_v32  ;;  %1847 = vmatprep.mubr.msk.f32.mxu1 (!%p300_p2), %vm2005_vm2, %v2006_v32 }
   0xd   : > { %s2291_s28 = smov (!%p361_p3, %s1755_s28), 1 }
   0xe   : > { %s2066_s29 = sshll.u32 %s2291_s28, 4  ;;  %s1802_s9 = sshll.u32 %s2291_s28, 5 }
   0xf   : > { %s365_s10 = scalar_lea.vmem %s2279_s0, %s2066_s29  ;;  %s380_s13 = scalar_lea.vmem %s2282_s3, %s2066_s29 }
  0x10   : > { %v399_v0 = vld [vmem:[%s365_s10] sm:$0xff]  ;;  %v400_v1 = vld [vmem:[%s365_s10 + $0x8] sm:$0xff]  ;;  %s370_s16 = scalar_lea.vmem %s2280_s1, %s2066_s29  ;;  %s375_s22 = scalar_lea.vmem %s2281_s2, %s2066_s29 }
  0x11   : > { %v1774_v2 = vmul.f32 -1.442695, %v399_v0  ;;  %v1775_v3 = vmul.f32 -1.442695, %v400_v1  ;;  %v2081_v13 = vld [vmem:[%s380_s13] sm:$0xff]  ;;  %v2088_v25 = vld [vmem:[%s380_s13 + $0x8] sm:$0xff]  ;;  %s390_s30 = scalar_lea.vmem %s2285_s6, %s2066_s29  ;;  %s385_s12 = scalar_lea.vmem %s2284_s5, %s1802_s9 }
  0x12   : > { %v2099_v30 = vld [vmem:[%s370_s16] sm:$0xff]  ;;  %v2101_v31 = vld [vmem:[%s370_s16 + $0x8] sm:$0xff]  ;;  %s2008_s29 = smov 32   ;;  %s1772_s13 = sshll.u32 %s2291_s28, 3 }
  0x13   : > { %1949 = vpow2.f32 %v1774_v2  ;;  %v2109_v33 = vpack.c.bf16 %v2101_v31, %v2099_v30  ;;  %s398_s16 = scalar_lea.vmem %s2287_s8, %s1772_s13  ;;  %s394_s19 = scalar_lea.vmem %s2286_s7, %s1772_s13 }
  0x14   : > { %1951 = vpow2.f32 %v1775_v3 }
  0x15   : > { %1904 = vmatpush3.bf16.msra.mxu0 %v2109_v33 }
  0x1d   : > { %v1950_v4 = vpop.eup %1949 }
  0x1e   : > { %v1952_v5 = vpop.eup %1951  ;;  %v494_v6 = vadd.f32 1.0, %v1950_v4 }
  0x1f   : > { %v495_v7 = vadd.f32 1.0, %v1952_v5 }
  0x20   : > { %1953 = vrcp.f32 %v494_v6 }
  0x21   : > { %1955 = vrcp.f32 %v495_v7 }
  0x2a   : > { %v1954_v8 = vpop.eup %1953 }
  0x2b   : > { %v2072_v9 = vpop.eup %1955  ;;  %v501_v10 = vsel %vm500_vm0, %v1954_v8, -inf  ;;  %v1023_v14 = vsel %vm1022_vm1, %v1954_v8, -inf }
  0x2c   : > { %502 = vmax.xlane.f32.xlu0 %v501_v10  ;;  %v504_v11 = vsel %vm500_vm0, %v2072_v9, -inf  ;;  %v1026_v60 = vsel %vm1022_vm1, %v2072_v9, -inf }
  0x30   : > { %505 = vmax.xlane.f32.xlu0 %v504_v11 }
  0x46   : > { %525 = vperm.xlu0 %1947, %v2081_v13  }
  0x65   : > { %1024 = vmax.xlane.f32.xlu0 %v1023_v14 }
  0xb9   : > { %v503_v15 = vpop.xlane.xlu0 %502 }
  0xba   : > { %v507_v16 = vsub.f32 %v1954_v8, %v503_v15 }
  0xbc   : > { %v509_v17 = vmul.f32 1.442695, %v507_v16 }
  0xbd   : > { %v506_v18 = vpop.xlane.xlu0 %505 }
  0xbe   : > { %1957 = vpow2.f32 %v509_v17  ;;  %v508_v19 = vsub.f32 %v2072_v9, %v506_v18 }
  0xc0   : > { %v511_v20 = vmul.f32 1.442695, %v508_v19 }
  0xc2   : > { %1959 = vpow2.f32 %v511_v20 }
  0xc5   : > { %v2093_v27 = vpop.permute.xlu0 %525 }
  0xc8   : > { %v1958_v21 = vpop.eup %1957 }
  0xc9   : > { %v513_v22 = vsel %vm500_vm0, %v1958_v21, 0.0 }
  0xca   : > { %514 = vadd.xlane.f32.xlu1 %v513_v22 }
  0xcc   : > { %v1960_v23 = vpop.eup %1959 }
  0xcd   : > { %v516_v24 = vsel %vm500_vm0, %v1960_v23, 0.0 }
  0xce   : > { %517 = vadd.xlane.f32.xlu1 %v516_v24 }
  0xdf   : > { %530 = vperm.xlu1 %1948, %v2088_v25  }
  0xf2   : > { %v1025_v28 = vpop.xlane.xlu0 %1024 }
  0xf3   : > { %v1029_v29 = vsub.f32 %v1954_v8, %v1025_v28 }
  0xf5   : > { %v1031_v34 = vmul.f32 1.442695, %v1029_v29 }
  0xf7   : > { %1961 = vpow2.f32 %v1031_v34 }
 0x101   : > { %v1962_v35 = vpop.eup %1961 }
 0x102   : > { %1037 = vrot.lane.b32.xlu0 %v1962_v35, %s2007_s17 }
 0x157   : > { %v515_v36 = vpop.xlane.xlu1 %514 }
 0x158   : > { %1963 = vrcp.f32 %v515_v36  ;;  %v412_v36 = vsub.f32 1.0, %v2088_v25 }
 0x15b   : > { %v518_v37 = vpop.xlane.xlu1 %517 }
 0x15c   : > { %1965 = vrcp.f32 %v518_v37 }
 0x15f   : > { %v531_v42 = vpop.permute.xlu1 %530 }
 0x162   : > { %v1964_v38 = vpop.eup %1963 }
 0x163   : > { %v520_v39 = vmul.f32 %v1964_v38, %v1958_v21  ;;  %v2154_v38 = vld [vmem:[%s2283_s4] sm:$0xff] }
 0x165   : > { %v533_v40 = vmul.f32 %v2093_v27, %v520_v39  ;;  %v2161_v39 = vsub.f32 1.0, %v2154_v38 }
 0x166   : > { %v1966_v41 = vpop.eup %1965 }
 0x167   : > { %535 = vxpose.xlu1.b32.start [1/2] (short) (narrow) %v533_v40, 8  ;;  %v522_v43 = vmul.f32 %v1966_v41, %v1960_v23  ;;  %v714_v45 = vsel %vm500_vm0, %v533_v40, 0.0 }
 0x169   : > { %v534_v44 = vmul.f32 %v531_v42, %v522_v43 }
 0x16b   : > { %v715_v46 = vsel %vm500_vm0, %v534_v44, 0.0  ;;  %536 = vxpose.xlu1.b32.end [2/2] (short) (narrow) %v534_v44, 8  ;;  %v1906_v47 = vpack.c.bf16 %v534_v44, %v533_v40 }
 0x16c   : > { %v716_v48 = vadd.f32 %v715_v46, %v714_v45 }
 0x16d   : > { %1907 = vmatpush3.bf16.msra.mxu1 %v1906_v47 }
 0x16e   : > { %v717_v49 = vrot.slane %v716_v48, 4 }
 0x170   : > { %v718_v50 = vadd.f32 %v717_v49, %v716_v48  ;;  %v2190_v49 = vld [vmem:[%s2283_s4 + $0x8] sm:$0xff] }
 0x172   : > { %v719_v51 = vrot.slane %v718_v50, 2 }
 0x174   : > { %v720_v52 = vadd.f32 %v719_v51, %v718_v50  ;;  %v1038_v2 = vpop.permute.xlu0 %1037 }
 0x175   : > { %v1043_v3 = vsel %vm500_vm0, %v1038_v2, 0.0 }
 0x176   : > { %v721_v53 = vrot.slane %v720_v52, 1 }
 0x178   : > { %v722_v54 = vadd.f32 %v721_v53, %v720_v52 }
 0x17a   : > { %1967 = vrcp.f32 %v722_v54 }
 0x184   : > { %v1968_v55 = vpop.eup %1967 }
 0x185   : > { %v724_v56 = vmul.f32 %v1968_v55, %v533_v40  ;;  %v2116_v57 = vmul.f32 %v1968_v55, %v534_v44  ;;  %v404_v40 = vld [vmem:[%s375_s22 + $0x8] sm:$0xff] }
 0x187   : > { %v1908_v59 = vpack.c.bf16 %v2116_v57, %v724_v56 }
 0x189   : > { %1910 = vmatprep.subr.msk.bf16.mxu1 %vm2120_vm3, %v1908_v59 }
 0x192   : > { %1027 = vmax.xlane.f32.xlu1 %v1026_v60 }
 0x1e7   : > { %v2129_v61 = vpop.trf.xlu1 }
 0x1e8   : > { %1841 = vmatmul.mubr.msk.f32.vlgmr.msra.gmra.mrb[0].mxu0 %vm427_vm4, %v2129_v61 }
 0x1e9   : > { %1852 = vmatprep.mubr.msk.f32.mxu0 %vm500_vm0, %v724_v56 }
 0x21f   : > { %v1028_v62 = vpop.xlane.xlu1 %1027 }
 0x220   : > { %v1030_v63 = vsub.f32 %v2072_v9, %v1028_v62 }
 0x222   : > { %v1033_v0 = vmul.f32 1.442695, %v1030_v63 }
 0x224   : > { %1969 = vpow2.f32 %v1033_v0 }
 0x22e   : > { %v1970_v1 = vpop.eup %1969 }
 0x22f   : > { %1039 = vrot.lane.b32.xlu0 %v1970_v1, %s2007_s17 }
 0x24e   : > { %1044 = vadd.xlane.f32.xlu0 %v1043_v3 }
 0x2a1   : > { %v1040_v4 = vpop.permute.xlu0 %1039 }
 0x2a2   : > { %v1046_v5 = vsel %vm500_vm0, %v1040_v4, 0.0 }
 0x2a3   : > { %1047 = vadd.xlane.f32.xlu1 %v1046_v5 }
 0x2bb   : > { %v636_v6 = vpop.f32.mrb[0].mxu0 }
 0x2bc   : > { %1848 = vmatmul.mubr.msk.f32.vlgmr.msra.gmra.mrb[0].mxu1 %vm427_vm4, %v636_v6  ;;  %v1842_v7 = vpop.f32.mrb[1].mxu0 }
 0x2bd   : > { %1913 = vmatpush3.bf16.xpose.msk.msra.mxu1 %vm2120_vm3, %v1908_v59 }
 0x2be   : > { %1920 = vmatprep.subr.bf16.mxu1 %v2004_v26 }
 0x2db   : > { %v1045_v8 = vpop.xlane.xlu0 %1044 }
 0x2dc   : > { %1971 = vrcp.f32 %v1045_v8 }
 0x2e6   : > { %v1972_v9 = vpop.eup %1971 }
 0x2e7   : > { %v1050_v10 = vmul.f32 %v1972_v9, %v1962_v35  ;;  %v411_v35 = vsub.f32 1.0, %v2081_v13  ;;  %v403_v13 = vld [vmem:[%s375_s22] sm:$0xff] }
 0x2e8   : > { %v2166_v43 = vpack.c.bf16 %v404_v40, %v403_v13 }
 0x2e9   : > { %v1053_v11 = vmul.f32 %v1050_v10, %v2093_v27 }
 0x2eb   : > { %1057 = vrot.lane.b32.xlu1 %v1053_v11, %s2007_s17  ;;  %v1242_v17 = vsel %vm1022_vm1, %v1053_v11, 0.0 }
 0x330   : > { %v1048_v12 = vpop.xlane.xlu1 %1047 }
 0x331   : > { %1973 = vrcp.f32 %v1048_v12 }
 0x33b   : > { %v1974_v14 = vpop.eup %1973 }
 0x33c   : > { %v1052_v15 = vmul.f32 %v1974_v14, %v1970_v1 }
 0x33e   : > { %v1054_v16 = vmul.f32 %v1052_v15, %v531_v42 }
 0x340   : > { %v1243_v18 = vsel %vm1022_vm1, %v1054_v16, 0.0  ;;  %1059 = vrot.lane.b32.xlu1 %v1054_v16, %s2007_s17 }
 0x341   : > { %v1244_v19 = vadd.f32 %v1243_v18, %v1242_v17 }
 0x343   : > { %v1245_v20 = vrot.slane %v1244_v19, 4 }
 0x345   : > { %v1246_v21 = vadd.f32 %v1245_v20, %v1244_v19 }
 0x347   : > { %v1247_v22 = vrot.slane %v1246_v21, 2 }
 0x349   : > { %v1248_v23 = vadd.f32 %v1247_v22, %v1246_v21 }
 0x34b   : > { %v1249_v24 = vrot.slane %v1248_v23, 1 }
 0x34d   : > { %v1250_v27 = vadd.f32 %v1249_v24, %v1248_v23  ;;  %v410_v24 = vsub.f32 1.0, %v2190_v49 }
 0x34f   : > { %1975 = vrcp.f32 %v1250_v27 }
 0x359   : > { %v1976_v28 = vpop.eup %1975 }
 0x35a   : > { %v1252_v29 = vmul.f32 %v1976_v28, %v1053_v11  ;;  %v1253_v34 = vmul.f32 %v1976_v28, %v1054_v16 }
 0x35c   : > { %1256 = vrot.lane.b32.xlu0 %v1252_v29, %s2007_s17 }
 0x35d   : > { %v1058_v37 = vpop.permute.xlu1 %1057 }
 0x360   : > { %1258 = vrot.lane.b32.xlu0 %v1253_v34, %s2007_s17  ;;  %s2009_s17 = smov 8  }
 0x364   : > { %415 = vperm.xlu0 %1947, %v411_v35  }
 0x368   : > { %420 = vperm.xlu0 %1947, %v412_v36  }
 0x369   : > { %1063 = vxpose.xlu1.b32.start [1/2] (short) (narrow) %v1058_v37, 8 }
 0x38f   : > { %v709_v41 = vpop.f32.mrb[0].mxu1 }
 0x390   : > { %v2164_v25 = vmul.f32 %v709_v41, %v2161_v39  ;;  %v1849_v42 = vpop.f32.mrb[1].mxu1 }
 0x392   : > { %1850 = vmatprep.subr.mxu0 %v2164_v25 }
 0x393   : > { %1851 = vmatpush3.msra.mxu0 %v2164_v25 }
 0x394   : > { %1853 = vmatmul.mubr.msk.f32.vlgmr.msra.gmra.mrb[2].mxu0 %vm500_vm0, %v2116_v57  ;;  %1914 = vmatprep.subr.bf16.mxu0 %v2004_v26 }
 0x395   : > { %1916 = vmatpush3.bf16.msra.mxu0 %v2166_v43  ;;  %1866 = vmatprep.mubr.msk.f32.mxu0 %vm2005_vm2, %v2006_v32 }
 0x396   : > { %1917 = vmatprep.subr.bf16.mxu0 %v2004_v26 }
 0x398   : > { %1867 = vmatmul.mubr.msk.f32.vlgmr.msra.gmra.mrb[4].mxu0 %vm427_vm4, %v2129_v61 }
 0x399   : > { %1919 = vmatpush3.bf16.msra.mxu0 %v2109_v33  ;;  %1873 = vmatprep.mubr.msk.f32.mxu0 %vm2005_vm2, %v2006_v32 }
 0x3b2   : > { %v1060_v44 = vpop.permute.xlu1 %1059 }
 0x3b3   : > { %1064 = vxpose.xlu1.b32.end [2/2] (short) (narrow) %v1060_v44, 8  ;;  %v1921_v61 = vpack.c.bf16 %v1060_v44, %v1058_v37 }
 0x3ce   : > { %v1257_v45 = vpop.permute.xlu0 %1256 }
 0x3d2   : > { %v2182_v46 = vpop.permute.xlu0 %1258 }
 0x3e3   : > { %v416_v47 = vpop.permute.xlu0 %415 }
 0x3e4   : > { %v2185_v48 = vmul.f32 %v416_v47, %v2154_v38 }
 0x3e6   : > { %v425_v33 = vadd.f32 %v2185_v48, %v2099_v30 }
 0x3e7   : > { %v421_v50 = vpop.permute.xlu0 %420 }
 0x3e8   : > { %v2195_v51 = vmul.f32 %v421_v50, %v2190_v49  ;;  %v428_v52 = vsel %vm427_vm4, %v425_v33, 0.0 }
 0x3e9   : > { %429 = vadd.xlane.f32.xlu0 %v428_v52 }
 0x3ea   : > { %v426_v53 = vadd.f32 %v2195_v51, %v2101_v31  ;;  %v1923_v31 = vpack.c.bf16 %v2182_v46, %v1257_v45 }
 0x3ec   : > { %v431_v54 = vsel %vm427_vm4, %v426_v53, 0.0 }
 0x3ed   : > { %432 = vadd.xlane.f32.xlu1 %v431_v54  ;;  %v436_v55 = vadd.f32 %v431_v54, %v428_v52 }
 0x3ef   : > { %v437_v30 = vrot.slane %v436_v55, 4 }
 0x3f1   : > { %v438_v57 = vadd.f32 %v437_v30, %v436_v55 }
 0x3f3   : > { %v439_v62 = vrot.slane %v438_v57, 2 }
 0x3f5   : > { %v440_v1 = vadd.f32 %v439_v62, %v438_v57 }
 0x3f7   : > { %v441_v2 = vrot.slane %v440_v1, 1 }
 0x3f9   : > { %v442_v3 = vadd.f32 %v441_v2, %v440_v1 }
 0x42f   : > { %v2201_v56 = vpop.trf.xlu1 }
 0x430   : > { %1874 = vmatmul.mubr.msk.f32.vlgmr.msra.gmra.mrb[6].mxu0 %vm427_vm4, %v2201_v56 }
 0x431   : > { %1885 = vmatprep.mubr.msk.f32.mxu0 %vm500_vm0, %v1257_v45 }
 0x467   : > { %v1854_v59 = vpop.f32.mrb[2].mxu0 }
 0x468   : > { %v798_v60 = vpop.f32.mrb[3].mxu0 }
 0x469   : > { %1859 = vmatprep.mubr.msk.f32.mxu1 %vm500_vm0, %v798_v60 }
 0x46a   : > { %1860 = vmatmul.mubr.msk.f32.vlgmr.msra.gmra.mrb[2].mxu1 %vm500_vm0, %v1854_v59 }
 0x46b   : > { %1922 = vmatpush3.bf16.msra.mxu1 %v1921_v61  ;;  %v2209_v63 = vpop.f32.mrb[4].mxu0  ;;  %1880 = vmatprep.mubr.msk.f32.mxu1 %vm2005_vm2, %v2006_v32 }
 0x46c   : > { %1925 = vmatprep.subr.msk.bf16.mxu1 %vm2120_vm3, %v1923_v31  ;;  %v1868_v0 = vpop.f32.mrb[5].mxu0 }
 0x476   : > { %v430_v4 = vpop.xlane.xlu0 %429 }
 0x477   : > { %1977 = vrsqrt.f32 %v430_v4 }
 0x478   : > { %1979 = vrsqrt.f32 %v442_v3 }
 0x47a   : > { %v433_v5 = vpop.xlane.xlu1 %432 }
 0x47b   : > { %1981 = vrsqrt.f32 %v433_v5 }
 0x481   : > { %v1978_v6 = vpop.eup %1977 }
 0x482   : > { %v444_v7 = vmul.f32 %v1978_v6, %v425_v33  ;;  %v1980_v8 = vpop.eup %1979 }
 0x484   : > { %v446_v9 = vmul.f32 %v1980_v8, %v444_v7 }
 0x485   : > { %v1982_v10 = vpop.eup %1981 }
 0x486   : > { %v448_v11 = vsub.f32 %v2154_v38, %v446_v9  ;;  %v445_v12 = vmul.f32 %v1982_v10, %v426_v53 }
 0x488   : > { %450 = vxpose.xlu0.b32.start [1/2] (short) (narrow) %v448_v11, 16  ;;  %v447_v14 = vmul.f32 %v1980_v8, %v445_v12 }
 0x48a   : > { %v449_v15 = vsub.f32 %v2190_v49, %v447_v14 }
 0x48c   : > { %451 = vxpose.xlu0.b32.end [2/2] (short) (narrow) %v449_v15, 16 }
 0x503   : > { %v1164_v16 = vpop.f32.mrb[6].mxu0 }
 0x504   : > { %v1875_v17 = vpop.f32.mrb[7].mxu0  ;;  %1881 = vmatmul.mubr.msk.f32.vlgmr.msra.gmra.mrb[4].mxu1 %vm427_vm4, %v1164_v16 }
 0x505   : > { %1928 = vmatpush3.bf16.xpose.msk.msra.mxu1 %vm2120_vm3, %v1923_v31 }
 0x508   : > { %v466_v18 = vpop.trf.xlu0 }
 0x509   : > { %v482_v19 = vadd.f32 %v466_v18, %v448_v11 }
 0x50b   : > { %v484_v20 = vmul.f32 0.5, %v482_v19 }
 0x50c   : > { %v467_v21 = vpop.trf.xlu0 }
 0x50d   : > { %486 = vst.msk [vmem:[%s390_s30] sm:$0xff] %vm427_vm4, %v484_v20  ;;  %v483_v22 = vadd.f32 %v467_v21, %v449_v15 }
 0x50f   : > { %v485_v23 = vmul.f32 0.5, %v483_v22 }
 0x511   : > { %487 = vst.msk [vmem:[%s390_s30 + $0x8] sm:$0xff] %vm427_vm4, %v485_v23 }
 0x53d   : > { %v1861_v27 = vpop.f32.mrb[2].mxu1 }
 0x53e   : > { %v889_v28 = vmul.f32 %v1861_v27, %v410_v24  ;;  %v879_v58 = vpop.f32.mrb[3].mxu1 }
 0x53f   : > { %v888_v29 = vmul.f32 %v879_v58, %v2161_v39 }
 0x540   : > { %v891_v34 = vadd.f32 %v889_v28, %v2195_v51 }
 0x541   : > { %v890_v35 = vadd.f32 %v888_v29, %v2185_v48 }
 0x542   : > { %v895_v36 = vsel %vm427_vm4, %v891_v34, 0.0 }
 0x543   : > { %896 = vadd.xlane.f32.xlu1 %v895_v36  ;;  %v892_v37 = vsel %vm427_vm4, %v890_v35, 0.0 }
 0x544   : > { %v900_v13 = vadd.f32 %v895_v36, %v892_v37 }
 0x547   : > { %893 = vadd.xlane.f32.xlu1 %v892_v37 }
 0x5d0   : > { %v897_v59 = vpop.xlane.xlu1 %896 }
 0x5d4   : > { %v894_v61 = vpop.xlane.xlu1 %893 }
 0x5d5   : > { %1983 = vrsqrt.f32 %v894_v61 }
 0x5d6   : > { %1985 = vrsqrt.f32 %v897_v59 }
 0x5d7   : > { %v1237_v40 = vpop.f32.mrb[4].mxu1 }
 0x5d8   : > { %v2233_v41 = vmul.f32 %v1237_v40, %v2161_v39  ;;  %v1882_v42 = vpop.f32.mrb[5].mxu1 }
 0x5da   : > { %1883 = vmatprep.subr.mxu0 %v2233_v41 }
 0x5db   : > { %1884 = vmatpush3.msra.mxu0 %v2233_v41 }
 0x5dc   : > { %1886 = vmatmul.mubr.msk.f32.vlgmr.msra.gmra.mrb[8].mxu0 %vm500_vm0, %v2182_v46  ;;  %1929 = vmatprep.subr.bf16.mxu0 %v2004_v26 }
 0x5dd   : > { %1931 = vmatpush3.bf16.msra.mxu0 %v2166_v43  ;;  %1899 = vmatprep.mubr.msk.f32.mxu0 %vm2005_vm2, %v2006_v32 }
 0x5e0   : > { %1900 = vmatmul.mubr.msk.f32.vlgmr.msra.gmra.mrb[10].mxu0 %vm427_vm4, %v2201_v56  ;;  %v901_v56 = vrot.slane %v900_v13, 4 }
 0x5e2   : > { %v902_v30 = vadd.f32 %v901_v56, %v900_v13 }
 0x5e4   : > { %v903_v57 = vrot.slane %v902_v30, 2 }
 0x5e6   : > { %v904_v60 = vadd.f32 %v903_v57, %v902_v30 }
 0x5e8   : > { %v905_v62 = vrot.slane %v904_v60, 1 }
 0x6af   : > { %v1887_v44 = vpop.f32.mrb[8].mxu0 }
 0x6b0   : > { %v1330_v45 = vpop.f32.mrb[9].mxu0 }
 0x6b1   : > { %1892 = vmatprep.mubr.msk.f32.mxu1 %vm500_vm0, %v1330_v45 }
 0x6b2   : > { %1893 = vmatmul.mubr.msk.f32.vlgmr.msra.gmra.mrb[6].mxu1 %vm500_vm0, %v1887_v44 }
 0x6b3   : > { %v1551_v47 = vpop.f32.mrb[10].mxu0 }
 0x6b4   : > { %v1901_v33 = vpop.f32.mrb[11].mxu0 }
 0x785   : > { %v1894_v50 = vpop.f32.mrb[6].mxu1 }
 0x786   : > { %v1421_v46 = vmul.f32 %v1894_v50, %v410_v24  ;;  %v1411_v52 = vpop.f32.mrb[7].mxu1 }
 0x787   : > { %v1420_v26 = vmul.f32 %v1411_v52, %v2161_v39  ;;  %v906_v39 = vadd.f32 %v905_v62, %v904_v60 }
 0x788   : > { %v1423_v43 = vadd.f32 %v1421_v46, %v2195_v51  ;;  %v1984_v51 = vpop.eup %1983 }
 0x789   : > { %v1422_v32 = vadd.f32 %v1420_v26, %v2185_v48  ;;  %1987 = vrsqrt.f32 %v906_v39  ;;  %v908_v48 = vmul.f32 %v1984_v51, %v890_v35  ;;  %v1986_v31 = vpop.eup %1985 }
 0x78a   : > { %v1427_v53 = vsel %vm427_vm4, %v1423_v43, 0.0  ;;  %v909_v1 = vmul.f32 %v1986_v31, %v891_v34 }
 0x78b   : > { %1428 = vadd.xlane.f32.xlu1 %v1427_v53  ;;  %v1424_v54 = vsel %vm427_vm4, %v1422_v32, 0.0 }
 0x78c   : > { %v1432_v55 = vadd.f32 %v1427_v53, %v1424_v54 }
 0x78e   : > { %v1433_v6 = vrot.slane %v1432_v55, 4 }
 0x78f   : > { %1425 = vadd.xlane.f32.xlu1 %v1424_v54 }
 0x790   : > { %v1434_v7 = vadd.f32 %v1433_v6, %v1432_v55 }
 0x792   : > { %v1435_v8 = vrot.slane %v1434_v7, 2 }
 0x793   : > { %v1988_v0 = vpop.eup %1987 }
 0x794   : > { %v910_v2 = vmul.f32 %v1988_v0, %v908_v48  ;;  %v911_v3 = vmul.f32 %v1988_v0, %v909_v1  ;;  %v1436_v9 = vadd.f32 %v1435_v8, %v1434_v7 }
 0x796   : > { %v912_v4 = vsub.f32 %v2154_v38, %v910_v2  ;;  %v913_v5 = vsub.f32 %v2190_v49, %v911_v3  ;;  %v1437_v10 = vrot.slane %v1436_v9, 1 }
 0x798   : > { %v1438_v12 = vadd.f32 %v1437_v10, %v1436_v9 }
 0x7c2   : > { %914 = vxpose.xlu1.b32.start [1/2] (short) (narrow) %v912_v4, 16 }
 0x7c6   : > { %915 = vxpose.xlu1.b32.end [2/2] (short) (narrow) %v913_v5, 16 }
 0x7e4   : > { %1562 = vrot.lane.b32.xlu1 %v1551_v47, %s2008_s29 }
 0x818   : > { %v1429_v11 = vpop.xlane.xlu1 %1428 }
 0x819   : > { %1989 = vrsqrt.f32 %v1429_v11 }
 0x81c   : > { %v1426_v14 = vpop.xlane.xlu1 %1425 }
 0x81d   : > { %1991 = vrsqrt.f32 %v1426_v14 }
 0x81e   : > { %1993 = vrsqrt.f32 %v1438_v12 }
 0x823   : > { %v1990_v15 = vpop.eup %1989 }
 0x824   : > { %v1441_v18 = vmul.f32 %v1990_v15, %v1423_v43 }
 0x827   : > { %v1992_v16 = vpop.eup %1991 }
 0x828   : > { %v1440_v17 = vmul.f32 %v1992_v16, %v1422_v32  ;;  %v1994_v19 = vpop.eup %1993 }
 0x829   : > { %v1443_v22 = vmul.f32 %v1994_v19, %v1441_v18 }
 0x82a   : > { %v1442_v20 = vmul.f32 %v1994_v19, %v1440_v17 }
 0x82b   : > { %v1445_v23 = vsub.f32 %v2190_v49, %v1443_v22 }
 0x82c   : > { %v1444_v21 = vsub.f32 %v2154_v38, %v1442_v20 }
 0x82e   : > { %1446 = vxpose.xlu0.b32.start [1/2] (short) (narrow) %v1444_v21, 16 }
 0x832   : > { %1447 = vxpose.xlu0.b32.end [2/2] (short) (narrow) %v1445_v23, 16 }
 0x842   : > { %v930_v24 = vpop.trf.xlu1 }
 0x843   : > { %v946_v27 = vadd.f32 %v930_v24, %v912_v4 }
 0x845   : > { %v948_v28 = vmul.f32 0.5, %v946_v27 }
 0x846   : > { %v931_v58 = vpop.trf.xlu1 }
 0x847   : > { %950 = vst.msk [vmem:[%s385_s12] sm:$0xff] %vm427_vm4, %v948_v28  ;;  %v947_v29 = vadd.f32 %v931_v58, %v913_v5 }
 0x849   : > { %v949_v34 = vmul.f32 0.5, %v947_v29 }
 0x84b   : > { %951 = vst.msk [vmem:[%s385_s12 + $0x8] sm:$0xff] %vm427_vm4, %v949_v34 }
 0x856   : > { %v1563_v38 = vpop.permute.xlu1 %1562 }
 0x857   : > { %v1566_v49 = vsel %vm1565_vm5, %v2209_v63, %v1563_v38 }
 0x858   : > { %1568 = vst.msk [vmem:[%s398_s16] sm:$0xff] %vm1567_vm6, %v1566_v49 }
 0x85b   : > { %1556 = vrot.lane.b32.xlu0 %v2233_v41, %s2009_s17 }
 0x8ae   : > { %v1462_v35 = vpop.trf.xlu0 }
 0x8af   : > { %v1478_v36 = vadd.f32 %v1462_v35, %v1444_v21 }
 0x8b1   : > { %v1480_v37 = vmul.f32 0.5, %v1478_v36 }
 0x8b2   : > { %v1463_v13 = vpop.trf.xlu0 }
 0x8b3   : > { %1793 = vst.msk [vmem:[%s385_s12 + $0x10] sm:$0xff] %vm427_vm4, %v1480_v37  ;;  %v1479_v40 = vadd.f32 %v1463_v13, %v1445_v23 }
 0x8b5   : > { %v1481_v42 = vmul.f32 0.5, %v1479_v40 }
 0x8b7   : > { %1794 = vst.msk [vmem:[%s385_s12 + $0x18] sm:$0xff] %vm427_vm4, %v1481_v42 }
 0x8cd   : > { %v1557_v44 = vpop.permute.xlu0 %1556 }
 0x8ce   : > { %v1559_v63 = vsel %vm500_vm0, %v2164_v25, %v1557_v44 }
 0x8cf   : > { %1560 = vst.msk [vmem:[%s394_s19] sm:$0xff] %vm427_vm4, %v1559_v63 }
 0x8d0 PF: > { %s19_s27 = sadd.s32 1, %s2001_s27  }
 0x8d1   : > { %p16_p4 = scmp.ge.s32.totalorder %s19_s27, 4  }
 0x8d3   :  { %18 = sbr.rel (!%p16_p4) target bundleno = 1 (0x1), region = 116 }

</bundles_post_ra>
